<compile_context>
chip_gen: v7x
topology: tpu7x:2x2x1
jax: 0.10.0
libtpu: 0.0.40
codegen_flags: <defaults>
</compile_context>

<pallas_src>
import functools

import jax
import jax.numpy as jnp
from jax.experimental import pallas as pl
from jax.experimental.pallas import tpu as pltpu

# Exact f32 matmuls in both kernel and reference (see note above re: review item 6).
jax.config.update("jax_default_matmul_precision", "highest")


def _encoder_bloc_kernel(x_ref,
                         wkvq_ref, wo_ref, w1_ref, w2_ref,
                         hmat_ref, vec_ref,
                         o_ref, *, eps):
    Bt, S, D = x_ref.shape
    inner = w1_ref.shape[1]

    x = x_ref[...]                                        # (Bt, S, D)

    # ---- unpack the (8, P) vector pack (static row / lane-0-aligned slices) ----
    bkvq = vec_ref[0:1, :3 * D]                           # (1, 3D)  [bk | bv | bq]
    bo   = vec_ref[1:2, :D]
    g1   = vec_ref[2:3, :D]
    be1  = vec_ref[3:4, :D]
    g2   = vec_ref[4:5, :D]
    be2  = vec_ref[5:6, :D]
    b1   = vec_ref[6:7, :inner]
    b2   = vec_ref[7:8, :D]

    # ---- LayerNorm 1 (all tokens; K/V need them) ----
    mu = jnp.mean(x, axis=-1, keepdims=True)
    var = jnp.mean((x - mu) ** 2, axis=-1, keepdims=True)
    xn = (x - mu) * jax.lax.rsqrt(var + eps) * g1 + be1   # (Bt, S, D)

    # ---- fused K/V/Q projection: one (Bt*S, D) x (D, 3D) MXU matmul ----
    kvq = jnp.dot(xn.reshape(Bt * S, D), wkvq_ref[...],
                  preferred_element_type=jnp.float32) + bkvq
    kvq3 = kvq.reshape(Bt, S, 3 * D)
    k3 = kvq3[:, :, :D]                                   # lane-aligned
    v3 = kvq3[:, :, D:2 * D]                              # one XLU lane-rotate (free slot)
    q0 = kvq3[:, 0, 2 * D:3 * D]                          # (Bt, D); token-0 rows only

    # ---- attention for query token 0 (collapse-mask row 0 keeps every key) ----
    # Per-head scores via one (D, D) same-head matmul (softmax scale folded into hmat):
    # s[b, t, d] = scale * sum_{e: head(e)==head(d)} q0[b, e] * k[b, t, e]
    qk = q0[:, None, :] * k3                              # (Bt, S, D)
    s = jnp.dot(qk.reshape(Bt * S, D), hmat_ref[...],
                preferred_element_type=jnp.float32).reshape(Bt, S, D)
    s = s - jnp.max(s, axis=1, keepdims=True)             # stabilize over keys
    p = jnp.exp(s)
    p = p / jnp.sum(p, axis=1, keepdims=True)             # exact normalization
    attn0 = jnp.sum(p * v3, axis=1)                       # (Bt, D)

    # ---- output projection + residual (token 0 only) ----
    x0 = x[:, 0, :] + jnp.dot(attn0, wo_ref[...],
                              preferred_element_type=jnp.float32) + bo

    # ---- LayerNorm 2 ----
    mu2 = jnp.mean(x0, axis=-1, keepdims=True)
    var2 = jnp.mean((x0 - mu2) ** 2, axis=-1, keepdims=True)
    x0n = (x0 - mu2) * jax.lax.rsqrt(var2 + eps) * g2 + be2

    # ---- MLP (fc1 -> relu -> fc2) + residual; dropout is identity in eval ----
    h1 = jnp.maximum(
        jnp.dot(x0n, w1_ref[...], preferred_element_type=jnp.float32) + b1, 0.0)
    o_ref[...] = x0 + jnp.dot(h1, w2_ref[...], preferred_element_type=jnp.float32) + b2


def pack_params(params, *, num_heads):
    """One-time parameter fusion/packing (hoisted out of the per-call path)."""
    D = params["wq_t"].shape[0]
    inner = params["w1_t"].shape[1]
    hd = D // num_heads

    # Fused [K | V | Q] projection weights / biases.
    wkvq = jnp.concatenate([params["wk_t"], params["wv_t"], params["wq_t"]], axis=1)
    bkvq = jnp.concatenate([params["bk"], params["bv"], params["bq"]], axis=1)

    # Same-head matrix with the 1/sqrt(head_dim) scale folded in.
    head = jnp.arange(D, dtype=jnp.int32) // hd
    hmat = (head[:, None] == head[None, :]).astype(jnp.float32) * (1.0 / (hd ** 0.5))

    # Pack the 8 small bias / LayerNorm vectors into a single (8, P) array.
    P = max(3 * D, inner)

    def row(v):
        v = v.reshape(1, -1)
        return jnp.pad(v, ((0, 0), (0, P - v.shape[-1])))

    vec = jnp.concatenate([
        row(bkvq), row(params["bo"]),
        row(params["g1"]), row(params["be1"]),
        row(params["g2"]), row(params["be2"]),
        row(params["b1"]), row(params["b2"]),
    ], axis=0)

    return dict(wkvq=wkvq, wo=params["wo_t"], w1=params["w1_t"], w2=params["w2_t"],
                hmat=hmat, vec=vec)


def _num_grid_steps(B):
    # Generation-aware split: the grid is a serial loop on single-TC chips (v5e/v6e), so
    # default to 1 step.  Only split on chips with 2 TensorCores (v4/v5p megacore, v7x),
    # and only when the half-batch keeps the sublane dimension full.  At these tiny shapes
    # even that is marginal (per-step overhead ~0.35 us); measure nb=1 vs nb=2 if it matters.
    try:
        kind = jax.devices()[0].device_kind.lower()
    except Exception:
        return 1
    two_tc = any(t in kind for t in ("v7", "v4", "v5p"))
    if two_tc and B % 2 == 0 and (B // 2) % 8 == 0:
        return 2
    return 1


def transformer_encoder_bloc(x, packed, *, eps=1e-5):
    B, S, D = x.shape
    inner = packed["w1"].shape[1]
    P = packed["vec"].shape[1]
    nb = _num_grid_steps(B)
    Bt = B // nb

    def rep(shape):
        # Grid-resident weights/constants: constant block index across the batch axis.
        # (pl.Buffered(1) would drop their redundant double-buffer; skipped at D=32 —
        #  revisit when D/inner scale, especially on v7x's 64 MiB VMEM.)
        return pl.BlockSpec(shape, lambda b: (0,) * len(shape))

    kernel = functools.partial(_encoder_bloc_kernel, eps=eps)
    return pl.pallas_call(
        kernel,
        grid=(nb,),
        in_specs=[
            pl.BlockSpec((Bt, S, D), lambda b: (b, 0, 0)),   # x
            rep((D, 3 * D)),                                 # fused [K|V|Q] weights
            rep((D, D)),                                     # out-proj weights
            rep((D, inner)),                                 # fc1 weights
            rep((inner, D)),                                 # fc2 weights
            rep((D, D)),                                     # same-head matrix (scaled)
            rep((8, P)),                                     # packed bias/LN vectors
        ],
        out_specs=pl.BlockSpec((Bt, D), lambda b: (b, 0)),
        out_shape=jax.ShapeDtypeStruct((B, D), jnp.float32),
        compiler_params=pltpu.CompilerParams(dimension_semantics=("parallel",)),
    )(x, packed["wkvq"], packed["wo"], packed["w1"], packed["w2"],
      packed["hmat"], packed["vec"])


def reference(x, p, *, num_heads, eps=1e-5):
    """Pure-JAX replica of the PyTorch forward (eval mode) for verification."""
    B, S, D = x.shape
    hd = D // num_heads

    def ln(t, g, b):
        mu = t.mean(-1, keepdims=True)
        var = ((t - mu) ** 2).mean(-1, keepdims=True)
        return (t - mu) / jnp.sqrt(var + eps) * g + b

    xn = ln(x, p["g1"], p["be1"])
    q = (xn @ p["wq_t"] + p["bq"]).reshape(B, S, num_heads, hd).transpose(0, 2, 1, 3)
    k = (xn @ p["wk_t"] + p["bk"]).reshape(B, S, num_heads, hd).transpose(0, 2, 1, 3)
    v = (xn @ p["wv_t"] + p["bv"]).reshape(B, S, num_heads, hd).transpose(0, 2, 1, 3)
    s = jnp.einsum("bhqd,bhkd->bhqk", q / (hd ** 0.5), k)
    rows = jnp.arange(S)[:, None]
    cols = jnp.arange(S)[None, :]
    keep = (rows == 0) | (rows == cols)                    # collapse mask (idx=0)
    s = jnp.where(keep[None, None], s, -jnp.inf)
    a = jax.nn.softmax(s, axis=-1)
    o = jnp.einsum("bhqk,bhkd->bhqd", a, v).transpose(0, 2, 1, 3).reshape(B, S, D)
    o = o @ p["wo_t"] + p["bo"]
    xres = x + o
    x0 = xres[:, 0, :]
    x0n = ln(x0, p["g2"][0], p["be2"][0])
    h1 = jax.nn.relu(x0n @ p["w1_t"] + p["b1"][0])
    return x0 + (h1 @ p["w2_t"] + p["b2"][0])


def init_params(key, D, inner):
    keys = jax.random.split(key, 16)

    def f(k, shape, s=0.05):
        return jax.random.normal(k, shape, jnp.float32) * s

    return dict(
        wq_t=f(keys[0], (D, D)), wk_t=f(keys[1], (D, D)), wv_t=f(keys[2], (D, D)),
        bq=f(keys[3], (1, D)), bk=f(keys[4], (1, D)), bv=f(keys[5], (1, D)),
        wo_t=f(keys[6], (D, D)), bo=f(keys[7], (1, D)),
        g1=1.0 + f(keys[8], (1, D), 0.1), be1=f(keys[9], (1, D), 0.1),
        g2=1.0 + f(keys[10], (1, D), 0.1), be2=f(keys[11], (1, D), 0.1),
        w1_t=f(keys[12], (D, inner)), b1=f(keys[13], (1, inner)),
        w2_t=f(keys[14], (inner, D)), b2=f(keys[15], (1, D)),
    )


if __name__ == "__main__":
    # embed_dim=32, num_heads=4, inner_dim=64, seq=8, batch=16.
    B, S, D, H, INNER = 16, 8, 32, 4, 64
    key = jax.random.PRNGKey(0)
    kx, kp = jax.random.split(key)
    x = jax.random.normal(kx, (B, S, D), jnp.float32)
    params = init_params(kp, D, INNER)

    packed = pack_params(params, num_heads=H)              # one-time host-side packing
    fwd = jax.jit(transformer_encoder_bloc)

    out = jax.block_until_ready(fwd(x, packed))

    ref = reference(x, params, num_heads=H)
    assert out.shape == (B, D)
    err = float(jnp.max(jnp.abs(out - ref)))
    # Exact f32 matmuls + exact softmax normalization -> tight parity with the reference.
    assert jnp.allclose(out, ref, atol=2e-4, rtol=2e-4), f"max abs err {err}"
    print("KERNEL_OK")
</pallas_src>

<mosaic_0001>
module attributes {stable_mosaic.version = 11 : i64} {
  func.func @_encoder_bloc_kernel(%arg0: i32, %arg1: memref<16x8x32xf32, #tpu.memory_space<vmem>>, %arg2: memref<32x96xf32, #tpu.memory_space<vmem>>, %arg3: memref<32x32xf32, #tpu.memory_space<vmem>>, %arg4: memref<32x64xf32, #tpu.memory_space<vmem>>, %arg5: memref<64x32xf32, #tpu.memory_space<vmem>>, %arg6: memref<32x32xf32, #tpu.memory_space<vmem>>, %arg7: memref<8x96xf32, #tpu.memory_space<vmem>>, %arg8: memref<16x32xf32, #tpu.memory_space<vmem>>) attributes {dimension_semantics = [#tpu.dimension_semantics<parallel>], iteration_bounds = array<i64: 1>, scalar_prefetch = 0 : i64, scratch_operands = 0 : i64, tpu.core_type = #tpu.core_type<tc>, window_params = [{transform_indices = @transform_0, window_bounds = array<i64: 16, 8, 32>}, {pipeline_mode = #tpu.pipeline_mode<synchronous>, transform_indices = @transform_1, window_bounds = array<i64: 32, 96>}, {pipeline_mode = #tpu.pipeline_mode<synchronous>, transform_indices = @transform_2, window_bounds = array<i64: 32, 32>}, {pipeline_mode = #tpu.pipeline_mode<synchronous>, transform_indices = @transform_3, window_bounds = array<i64: 32, 64>}, {pipeline_mode = #tpu.pipeline_mode<synchronous>, transform_indices = @transform_4, window_bounds = array<i64: 64, 32>}, {pipeline_mode = #tpu.pipeline_mode<synchronous>, transform_indices = @transform_5, window_bounds = array<i64: 32, 32>}, {pipeline_mode = #tpu.pipeline_mode<synchronous>, transform_indices = @transform_6, window_bounds = array<i64: 8, 96>}, {transform_indices = @transform_7, window_bounds = array<i64: 16, 32>}]} {
    %c0 = arith.constant 0 : index
    %c0_0 = arith.constant 0 : index
    %c0_1 = arith.constant 0 : index
    %0 = vector.load %arg1[%c0, %c0_0, %c0_1] : memref<16x8x32xf32, #tpu.memory_space<vmem>>, vector<16x8x32xf32>
    %c0_2 = arith.constant 0 : index
    %c0_3 = arith.constant 0 : index
    %1 = vector.load %arg7[%c0_2, %c0_3] : memref<8x96xf32, #tpu.memory_space<vmem>>, vector<1x96xf32>
    %c1 = arith.constant 1 : index
    %c0_4 = arith.constant 0 : index
    %2 = vector.load %arg7[%c1, %c0_4] : memref<8x96xf32, #tpu.memory_space<vmem>>, vector<1x32xf32>
    %c2 = arith.constant 2 : index
    %c0_5 = arith.constant 0 : index
    %3 = vector.load %arg7[%c2, %c0_5] : memref<8x96xf32, #tpu.memory_space<vmem>>, vector<1x32xf32>
    %c3 = arith.constant 3 : index
    %c0_6 = arith.constant 0 : index
    %4 = vector.load %arg7[%c3, %c0_6] : memref<8x96xf32, #tpu.memory_space<vmem>>, vector<1x32xf32>
    %c4 = arith.constant 4 : index
    %c0_7 = arith.constant 0 : index
    %5 = vector.load %arg7[%c4, %c0_7] : memref<8x96xf32, #tpu.memory_space<vmem>>, vector<1x32xf32>
    %c5 = arith.constant 5 : index
    %c0_8 = arith.constant 0 : index
    %6 = vector.load %arg7[%c5, %c0_8] : memref<8x96xf32, #tpu.memory_space<vmem>>, vector<1x32xf32>
    %c6 = arith.constant 6 : index
    %c0_9 = arith.constant 0 : index
    %7 = vector.load %arg7[%c6, %c0_9] : memref<8x96xf32, #tpu.memory_space<vmem>>, vector<1x64xf32>
    %c7 = arith.constant 7 : index
    %c0_10 = arith.constant 0 : index
    %8 = vector.load %arg7[%c7, %c0_10] : memref<8x96xf32, #tpu.memory_space<vmem>>, vector<1x32xf32>
    %cst = arith.constant dense<0.000000e+00> : vector<16x8xf32>
    %9 = vector.multi_reduction <add>, %0, %cst [2] : vector<16x8x32xf32> to vector<16x8xf32>
    %10 = vector.shape_cast %9 : vector<16x8xf32> to vector<16x8x1xf32>
    %cst_11 = arith.constant 3.200000e+01 : f32
    %11 = vector.broadcast %cst_11 : f32 to vector<16x8x1xf32>
    %12 = arith.divf %10, %11 : vector<16x8x1xf32>
    %13 = vector.broadcast %12 : vector<16x8x1xf32> to vector<16x8x32xf32>
    %14 = arith.subf %0, %13 : vector<16x8x32xf32>
    %15 = arith.mulf %14, %14 : vector<16x8x32xf32>
    %cst_12 = arith.constant dense<0.000000e+00> : vector<16x8xf32>
    %16 = vector.multi_reduction <add>, %15, %cst_12 [2] : vector<16x8x32xf32> to vector<16x8xf32>
    %17 = vector.shape_cast %16 : vector<16x8xf32> to vector<16x8x1xf32>
    %cst_13 = arith.constant 3.200000e+01 : f32
    %18 = vector.broadcast %cst_13 : f32 to vector<16x8x1xf32>
    %19 = arith.divf %17, %18 : vector<16x8x1xf32>
    %20 = vector.broadcast %12 : vector<16x8x1xf32> to vector<16x8x32xf32>
    %21 = arith.subf %0, %20 : vector<16x8x32xf32>
    %cst_14 = arith.constant 9.99999974E-6 : f32
    %22 = vector.broadcast %cst_14 : f32 to vector<16x8x1xf32>
    %23 = arith.addf %19, %22 : vector<16x8x1xf32>
    %24 = math.rsqrt %23 : vector<16x8x1xf32>
    %25 = vector.broadcast %24 : vector<16x8x1xf32> to vector<16x8x32xf32>
    %26 = arith.mulf %21, %25 : vector<16x8x32xf32>
    %27 = vector.shape_cast %3 : vector<1x32xf32> to vector<1x1x32xf32>
    %28 = vector.broadcast %27 : vector<1x1x32xf32> to vector<16x8x32xf32>
    %29 = arith.mulf %26, %28 : vector<16x8x32xf32>
    %30 = vector.shape_cast %4 : vector<1x32xf32> to vector<1x1x32xf32>
    %31 = vector.broadcast %30 : vector<1x1x32xf32> to vector<16x8x32xf32>
    %32 = arith.addf %29, %31 : vector<16x8x32xf32>
    %33 = vector.shape_cast %32 : vector<16x8x32xf32> to vector<128x32xf32>
    %c0_15 = arith.constant 0 : index
    %c0_16 = arith.constant 0 : index
    %34 = vector.load %arg2[%c0_15, %c0_16] : memref<32x96xf32, #tpu.memory_space<vmem>>, vector<32x96xf32>
    %cst_17 = arith.constant dense<0.000000e+00> : vector<128x96xf32>
    %35 = tpu.matmul %33, %34, %cst_17 {dimension_numbers = #tpu.dot_dimension_numbers<[1], [0], [0], [1], [0, 0, 1, 1], [], []>, precision = #tpu.contract_precision<fp32>} : vector<128x32xf32>, vector<32x96xf32>, vector<128x96xf32> -> vector<128x96xf32>
    %36 = vector.broadcast %1 : vector<1x96xf32> to vector<128x96xf32>
    %37 = arith.addf %35, %36 : vector<128x96xf32>
    %38 = vector.shape_cast %37 : vector<128x96xf32> to vector<16x8x96xf32>
    %39 = vector.extract_strided_slice %38 {offsets = [0, 0, 0], sizes = [16, 8, 32], strides = [1, 1, 1]} : vector<16x8x96xf32> to vector<16x8x32xf32>
    %40 = vector.extract_strided_slice %38 {offsets = [0, 0, 32], sizes = [16, 8, 32], strides = [1, 1, 1]} : vector<16x8x96xf32> to vector<16x8x32xf32>
    %41 = vector.extract_strided_slice %38 {offsets = [0, 0, 64], sizes = [16, 1, 32], strides = [1, 1, 1]} : vector<16x8x96xf32> to vector<16x1x32xf32>
    %42 = vector.shape_cast %41 : vector<16x1x32xf32> to vector<16x32xf32>
    %43 = vector.shape_cast %42 : vector<16x32xf32> to vector<16x1x32xf32>
    %44 = vector.broadcast %43 : vector<16x1x32xf32> to vector<16x8x32xf32>
    %45 = arith.mulf %44, %39 : vector<16x8x32xf32>
    %46 = vector.shape_cast %45 : vector<16x8x32xf32> to vector<128x32xf32>
    %c0_18 = arith.constant 0 : index
    %c0_19 = arith.constant 0 : index
    %47 = vector.load %arg6[%c0_18, %c0_19] : memref<32x32xf32, #tpu.memory_space<vmem>>, vector<32x32xf32>
    %cst_20 = arith.constant dense<0.000000e+00> : vector<128x32xf32>
    %48 = tpu.matmul %46, %47, %cst_20 {dimension_numbers = #tpu.dot_dimension_numbers<[1], [0], [0], [1], [0, 0, 1, 1], [], []>, precision = #tpu.contract_precision<fp32>} : vector<128x32xf32>, vector<32x32xf32>, vector<128x32xf32> -> vector<128x32xf32>
    %49 = vector.shape_cast %48 : vector<128x32xf32> to vector<16x8x32xf32>
    %cst_21 = arith.constant dense<0xFF800000> : vector<16x32xf32>
    %50 = vector.multi_reduction <maximumf>, %49, %cst_21 [1] : vector<16x8x32xf32> to vector<16x32xf32>
    %51 = vector.shape_cast %50 : vector<16x32xf32> to vector<16x1x32xf32>
    %52 = vector.broadcast %51 : vector<16x1x32xf32> to vector<16x8x32xf32>
    %53 = arith.subf %49, %52 : vector<16x8x32xf32>
    %54 = math.exp %53 : vector<16x8x32xf32>
    %cst_22 = arith.constant dense<0.000000e+00> : vector<16x32xf32>
    %55 = vector.multi_reduction <add>, %54, %cst_22 [1] : vector<16x8x32xf32> to vector<16x32xf32>
    %56 = vector.shape_cast %55 : vector<16x32xf32> to vector<16x1x32xf32>
    %57 = vector.broadcast %56 : vector<16x1x32xf32> to vector<16x8x32xf32>
    %58 = arith.divf %54, %57 : vector<16x8x32xf32>
    %59 = arith.mulf %58, %40 : vector<16x8x32xf32>
    %cst_23 = arith.constant dense<0.000000e+00> : vector<16x32xf32>
    %60 = vector.multi_reduction <add>, %59, %cst_23 [1] : vector<16x8x32xf32> to vector<16x32xf32>
    %61 = vector.extract_strided_slice %0 {offsets = [0, 0, 0], sizes = [16, 1, 32], strides = [1, 1, 1]} : vector<16x8x32xf32> to vector<16x1x32xf32>
    %62 = vector.shape_cast %61 : vector<16x1x32xf32> to vector<16x32xf32>
    %c0_24 = arith.constant 0 : index
    %c0_25 = arith.constant 0 : index
    %63 = vector.load %arg3[%c0_24, %c0_25] : memref<32x32xf32, #tpu.memory_space<vmem>>, vector<32x32xf32>
    %cst_26 = arith.constant dense<0.000000e+00> : vector<16x32xf32>
    %64 = tpu.matmul %60, %63, %cst_26 {dimension_numbers = #tpu.dot_dimension_numbers<[1], [0], [0], [1], [0, 0, 1, 1], [], []>, precision = #tpu.contract_precision<fp32>} : vector<16x32xf32>, vector<32x32xf32>, vector<16x32xf32> -> vector<16x32xf32>
    %65 = arith.addf %62, %64 : vector<16x32xf32>
    %66 = vector.broadcast %2 : vector<1x32xf32> to vector<16x32xf32>
    %67 = arith.addf %65, %66 : vector<16x32xf32>
    %cst_27 = arith.constant dense<0.000000e+00> : vector<16xf32>
    %68 = vector.multi_reduction <add>, %67, %cst_27 [1] : vector<16x32xf32> to vector<16xf32>
    %69 = vector.shape_cast %68 : vector<16xf32> to vector<16x1xf32>
    %cst_28 = arith.constant 3.200000e+01 : f32
    %70 = vector.broadcast %cst_28 : f32 to vector<16x1xf32>
    %71 = arith.divf %69, %70 : vector<16x1xf32>
    %72 = vector.broadcast %71 : vector<16x1xf32> to vector<16x32xf32>
    %73 = arith.subf %67, %72 : vector<16x32xf32>
    %74 = arith.mulf %73, %73 : vector<16x32xf32>
    %cst_29 = arith.constant dense<0.000000e+00> : vector<16xf32>
    %75 = vector.multi_reduction <add>, %74, %cst_29 [1] : vector<16x32xf32> to vector<16xf32>
    %76 = vector.shape_cast %75 : vector<16xf32> to vector<16x1xf32>
    %cst_30 = arith.constant 3.200000e+01 : f32
    %77 = vector.broadcast %cst_30 : f32 to vector<16x1xf32>
    %78 = arith.divf %76, %77 : vector<16x1xf32>
    %79 = vector.broadcast %71 : vector<16x1xf32> to vector<16x32xf32>
    %80 = arith.subf %67, %79 : vector<16x32xf32>
    %cst_31 = arith.constant 9.99999974E-6 : f32
    %81 = vector.broadcast %cst_31 : f32 to vector<16x1xf32>
    %82 = arith.addf %78, %81 : vector<16x1xf32>
    %83 = math.rsqrt %82 : vector<16x1xf32>
    %84 = vector.broadcast %83 : vector<16x1xf32> to vector<16x32xf32>
    %85 = arith.mulf %80, %84 : vector<16x32xf32>
    %86 = vector.broadcast %5 : vector<1x32xf32> to vector<16x32xf32>
    %87 = arith.mulf %85, %86 : vector<16x32xf32>
    %88 = vector.broadcast %6 : vector<1x32xf32> to vector<16x32xf32>
    %89 = arith.addf %87, %88 : vector<16x32xf32>
    %c0_32 = arith.constant 0 : index
    %c0_33 = arith.constant 0 : index
    %90 = vector.load %arg4[%c0_32, %c0_33] : memref<32x64xf32, #tpu.memory_space<vmem>>, vector<32x64xf32>
    %cst_34 = arith.constant dense<0.000000e+00> : vector<16x64xf32>
    %91 = tpu.matmul %89, %90, %cst_34 {dimension_numbers = #tpu.dot_dimension_numbers<[1], [0], [0], [1], [0, 0, 1, 1], [], []>, precision = #tpu.contract_precision<fp32>} : vector<16x32xf32>, vector<32x64xf32>, vector<16x64xf32> -> vector<16x64xf32>
    %92 = vector.broadcast %7 : vector<1x64xf32> to vector<16x64xf32>
    %93 = arith.addf %91, %92 : vector<16x64xf32>
    %cst_35 = arith.constant 0.000000e+00 : f32
    %94 = vector.broadcast %cst_35 : f32 to vector<16x64xf32>
    %95 = arith.maximumf %93, %94 : vector<16x64xf32>
    %c0_36 = arith.constant 0 : index
    %c0_37 = arith.constant 0 : index
    %96 = vector.load %arg5[%c0_36, %c0_37] : memref<64x32xf32, #tpu.memory_space<vmem>>, vector<64x32xf32>
    %cst_38 = arith.constant dense<0.000000e+00> : vector<16x32xf32>
    %97 = tpu.matmul %95, %96, %cst_38 {dimension_numbers = #tpu.dot_dimension_numbers<[1], [0], [0], [1], [0, 0, 1, 1], [], []>, precision = #tpu.contract_precision<fp32>} : vector<16x64xf32>, vector<64x32xf32>, vector<16x32xf32> -> vector<16x32xf32>
    %98 = arith.addf %67, %97 : vector<16x32xf32>
    %99 = vector.broadcast %8 : vector<1x32xf32> to vector<16x32xf32>
    %100 = arith.addf %98, %99 : vector<16x32xf32>
    %c0_39 = arith.constant 0 : index
    %c0_40 = arith.constant 0 : index
    %101 = vector.load %arg8[%c0_39, %c0_40] : memref<16x32xf32, #tpu.memory_space<vmem>>, vector<16x32xf32>
    tpu.vector_store %arg8[%c0_39, %c0_40], %100 {strides = array<i32>} : memref<16x32xf32, #tpu.memory_space<vmem>>, vector<16x32xf32>,
    return
  }
  func.func @transform_0(%arg0: i32) -> (i32, i32, i32) {
    %c0_i32 = arith.constant 0 : i32
    %c0_i32_0 = arith.constant 0 : i32
    %c0_i32_1 = arith.constant 0 : i32
    return %arg0, %c0_i32, %c0_i32_0 : i32, i32, i32
  }
  func.func @transform_1(%arg0: i32) -> (i32, i32) {
    %c0_i32 = arith.constant 0 : i32
    %c0_i32_0 = arith.constant 0 : i32
    %c0_i32_1 = arith.constant 0 : i32
    return %c0_i32, %c0_i32_0 : i32, i32
  }
  func.func @transform_2(%arg0: i32) -> (i32, i32) {
    %c0_i32 = arith.constant 0 : i32
    %c0_i32_0 = arith.constant 0 : i32
    %c0_i32_1 = arith.constant 0 : i32
    return %c0_i32, %c0_i32_0 : i32, i32
  }
  func.func @transform_3(%arg0: i32) -> (i32, i32) {
    %c0_i32 = arith.constant 0 : i32
    %c0_i32_0 = arith.constant 0 : i32
    %c0_i32_1 = arith.constant 0 : i32
    return %c0_i32, %c0_i32_0 : i32, i32
  }
  func.func @transform_4(%arg0: i32) -> (i32, i32) {
    %c0_i32 = arith.constant 0 : i32
    %c0_i32_0 = arith.constant 0 : i32
    %c0_i32_1 = arith.constant 0 : i32
    return %c0_i32, %c0_i32_0 : i32, i32
  }
  func.func @transform_5(%arg0: i32) -> (i32, i32) {
    %c0_i32 = arith.constant 0 : i32
    %c0_i32_0 = arith.constant 0 : i32
    %c0_i32_1 = arith.constant 0 : i32
    return %c0_i32, %c0_i32_0 : i32, i32
  }
  func.func @transform_6(%arg0: i32) -> (i32, i32) {
    %c0_i32 = arith.constant 0 : i32
    %c0_i32_0 = arith.constant 0 : i32
    %c0_i32_1 = arith.constant 0 : i32
    return %c0_i32, %c0_i32_0 : i32, i32
  }
  func.func @transform_7(%arg0: i32) -> (i32, i32) {
    %c0_i32 = arith.constant 0 : i32
    %c0_i32_0 = arith.constant 0 : i32
    return %arg0, %c0_i32 : i32, i32
  }
}

</mosaic_0001>

<bundles_post_ra>
// kernel: transformer_encoder_bloc.1
= control target key start
LH: loop header
LB: loop body
LE: loop exit
PB: predicated region body
PF: predicated region fallthrough
CT: control target
= control target key end

     0   :  { %12 = vsyncpa [#allocation3], 0  ;;  %s9115_s0 = inlined_call_operand.hbm [shape: f32[16,8,32], index: 0, kind: input, shape index: {}]   ;;  %s9116_s1 = inlined_call_operand.vmem [shape: f32[32,96], index: 1, kind: input, shape index: {}]   ;;  %s9117_s2 = inlined_call_operand.vmem [shape: f32[32,32], index: 2, kind: input, shape index: {}]   ;;  %s9118_s3 = inlined_call_operand.vmem [shape: f32[32,64], index: 3, kind: input, shape index: {}]   ;;  %s9119_s4 = inlined_call_operand.vmem [shape: f32[64,32], index: 4, kind: input, shape index: {}]   ;;  %s9120_s5 = inlined_call_operand.hbm [shape: f32[32,32], index: 5, kind: input, shape index: {}]   ;;  %s9121_s6 = inlined_call_operand.hbm [shape: f32[8,96], index: 6, kind: input, shape index: {}]   ;;  %s9122_s7 = inlined_call_operand.hbm [shape: f32[16,32], index: 7, kind: output, shape index: {}]  }
   0x1   :  { %13 = vsyncpa [#allocation6], 0 }
   0x2   :  { %14 = vsyncpa [#allocation4], 0  ;;  %s7312_s24 = smov [#allocation5]   ;;  %s7313_s26 = smov [#allocation2]  }
   0x3   :  { %s40_s25 = sshll.u32 %s7312_s24, 4  ;;  %s20_s27 = sshll.u32 %s7313_s26, 4  ;;  %s41_s25 = int_to_ptr.vmem [resolvable:$true] %s40_s25  ;;  %s7360_s27 = int_to_ptr.vmem [resolvable:$true] %s20_s27 }
   0x4   :  { %s7218_s30 = scalar_lea.hbm %s9120_s5, 512 }
   0x5   :  { %p7219_p0 = scmp.ne.s32.totalorder %s9120_s5, %s7218_s30  ;;  %p7222_p1 = scmp.lt.u32.totalorder %s7218_s30, %s9120_s5 }
   0x7   :  { %p7224_p2 = pnand %p7222_p1, %p7219_p0 }
   0x9   :  { %7227 = shalt.err (!%p7224_p2)
}
   0xa   :  { %s7228_s12 = scalar_lea.vmem %s41_s25, 512  ;;  %p7233_p4 = scmp.lt.s32.totalorder %s41_s25, %s41_s25 }
   0xb   :  { %p7229_p3 = scmp.ne.s32.totalorder %s41_s25, %s7228_s12  ;;  %p7234_p5 = scmp.lt.s32.totalorder %s7228_s12, %s7228_s12 }
   0xd   :  { %p7235_p6 = por %p7234_p5, %p7233_p4 }
   0xf   :  { %p7236_p7 = pnand %p7235_p6, %p7229_p3 }
  0x11   :  { %7239 = shalt.err (!%p7236_p7)
}
  0x12   :  { %s7314_s13 = smov 128   ;;  %s7315_s14 = smov 8  }
  0x13   :  { %46 = dma.hbm_to_vmem [thread:$0]  %s9120_s5, 512, %s41_s25, [#allocation6], %s7314_s13, %s7314_s13, %s7315_s14  }
  0x14   :  { %s7240_s19 = scalar_lea.hbm %s9115_s0, 2048 }
  0x15   :  { %p7241_p8 = scmp.ne.s32.totalorder %s9115_s0, %s7240_s19  ;;  %p7244_p9 = scmp.lt.u32.totalorder %s7240_s19, %s9115_s0 }
  0x17   :  { %p7246_p10 = pnand %p7244_p9, %p7241_p8 }
  0x19   :  { %7249 = shalt.err (!%p7246_p10)
}
  0x1a   :  { %s7250_s24 = scalar_lea.vmem %s7360_s27, 2048  ;;  %p7255_p12 = scmp.lt.s32.totalorder %s7360_s27, %s7360_s27 }
  0x1b   :  { %p7251_p11 = scmp.ne.s32.totalorder %s7360_s27, %s7250_s24  ;;  %p7256_p13 = scmp.lt.s32.totalorder %s7250_s24, %s7250_s24 }
  0x1d   :  { %p7257_p0 = por %p7256_p13, %p7255_p12 }
  0x1f   :  { %p7258_p1 = pnand %p7257_p0, %p7251_p11 }
  0x21   :  { %7261 = shalt.err (!%p7258_p1)
}
  0x22   :  { %26 = dma.hbm_to_vmem [thread:$0]  %s9115_s0, 2048, %s7360_s27, [#allocation3], %s7314_s13, %s7314_s13, %s7315_s14  }
  0x23   :  { %s7316_s26 = smov [#allocation7]   ;;  %s7262_s8 = scalar_lea.hbm %s9121_s6, 128 }
  0x24   :  { %s53_s28 = sshll.u32 %s7316_s26, 4  ;;  %p7263_p2 = scmp.ne.s32.totalorder %s9121_s6, %s7262_s8  ;;  %s54_s28 = int_to_ptr.vmem [resolvable:$true] %s53_s28 }
  0x25   :  { %p7266_p3 = scmp.lt.u32.totalorder %s7262_s8, %s9121_s6 }
  0x27   :  { %p7268_p4 = pnand %p7266_p3, %p7263_p2 }
  0x29   :  { %7271 = shalt.err (!%p7268_p4)
}
  0x2a   :  { %s7272_s15 = scalar_lea.vmem %s54_s28, 128  ;;  %p7277_p6 = scmp.lt.s32.totalorder %s54_s28, %s54_s28 }
  0x2b   :  { %p7273_p5 = scmp.ne.s32.totalorder %s54_s28, %s7272_s15  ;;  %p7278_p7 = scmp.lt.s32.totalorder %s7272_s15, %s7272_s15 }
  0x2d   :  { %p7279_p8 = por %p7278_p7, %p7277_p6 }
  0x2f   :  { %p7280_p9 = pnand %p7279_p8, %p7273_p5 }
  0x31   :  { %7283 = shalt.err (!%p7280_p9)
}
  0x32   :  { %56 = dma.hbm_to_vmem [thread:$0]  %s9121_s6, 128, %s54_s28, [#allocation6]  }
  0x33   :  { %7306 = dma.done.wait [#allocation3], 2048  }
  0x34   :  { %7307 = vsyncadd [#allocation3], 4294965248 }
  0x35   :  { %7308 = dma.done.wait [#allocation6], 640  }
  0x36   :  { %7309 = vsyncadd [#allocation6], 4294966656  ;;  %vm90_vm0 = vcmask 261120   ;;  %v66_v0 = vld [vmem:[#allocation2] sm:$0xff]  ;;  %v68_v1 = vld [vmem:[#allocation2 + $0x10] sm:$0xff]  ;;  %s7318_s23 = smov 96  }
  0x37   :  { %v67_v2 = vld [vmem:[#allocation2 + $0x8] sm:$0xff]  ;;  %v91_v3 = vsel %vm90_vm0, %v66_v0, 0.0  ;;  %v97_v4 = vsel %vm90_vm0, %v68_v1, 0.0  ;;  %v69_v5 = vld [vmem:[#allocation2 + $0x18] sm:$0xff]  ;;  %v70_v8 = vld [vmem:[#allocation2 + $0x20] sm:$0xff]  ;;  %vm3384_vm1 = vcmask 1041409  }
  0x38   :  { %92 = vadd.xlane.f32.xlu0 %v91_v3  ;;  %98 = vadd.xlane.f32.xlu1 %v97_v4  ;;  %v94_v6 = vsel %vm90_vm0, %v67_v2, 0.0  ;;  %v100_v7 = vsel %vm90_vm0, %v69_v5, 0.0  ;;  %v71_v9 = vld [vmem:[#allocation2 + $0x28] sm:$0xff]  ;;  %v103_v10 = vsel %vm90_vm0, %v70_v8, 0.0  ;;  %v7415_v12 = vld [vmem:[#allocation2 + $0x30] sm:$0xff]  ;;  %v7417_v13 = vld [vmem:[#allocation2 + $0x38] sm:$0xff] }
  0x39   :  { %v106_v11 = vsel %vm90_vm0, %v71_v9, 0.0  ;;  %v109_v14 = vsel %vm90_vm0, %v7415_v12, 0.0  ;;  %v112_v15 = vsel %vm90_vm0, %v7417_v13, 0.0  ;;  %v7423_v16 = vld [vmem:[#allocation2 + $0x40] sm:$0xff]  ;;  %v7425_v17 = vld [vmem:[#allocation2 + $0x48] sm:$0xff]  ;;  %v7431_v20 = vld [vmem:[#allocation2 + $0x50] sm:$0xff] }
  0x3a   :  { %v115_v18 = vsel %vm90_vm0, %v7423_v16, 0.0  ;;  %v118_v19 = vsel %vm90_vm0, %v7425_v17, 0.0  ;;  %v7433_v21 = vld [vmem:[#allocation2 + $0x58] sm:$0xff]  ;;  %v121_v22 = vsel %vm90_vm0, %v7431_v20, 0.0  ;;  %v7439_v24 = vld [vmem:[#allocation2 + $0x60] sm:$0xff]  ;;  %v7441_v25 = vld [vmem:[#allocation2 + $0x68] sm:$0xff] }
  0x3b   :  { %v124_v23 = vsel %vm90_vm0, %v7433_v21, 0.0  ;;  %v127_v26 = vsel %vm90_vm0, %v7439_v24, 0.0  ;;  %v130_v27 = vsel %vm90_vm0, %v7441_v25, 0.0  ;;  %v7447_v28 = vld [vmem:[#allocation2 + $0x70] sm:$0xff]  ;;  %v7449_v29 = vld [vmem:[#allocation2 + $0x78] sm:$0xff]  ;;  %vm3386_vm2 = vcmask 1042434  }
  0x3c   :  { %95 = vadd.xlane.f32.xlu0 %v94_v6  ;;  %101 = vadd.xlane.f32.xlu1 %v100_v7  ;;  %v133_v30 = vsel %vm90_vm0, %v7447_v28, 0.0  ;;  %v136_v31 = vsel %vm90_vm0, %v7449_v29, 0.0  ;;  %vm3388_vm3 = vcmask 1043459   ;;  %vm3390_vm4 = vcmask 1044484  }
  0x3d   :  { %vm3392_vm5 = vcmask 1045509   ;;  %vm3394_vm6 = vcmask 1046534   ;;  %vm3396_vm7 = vcmask 1047559   ;;  %vm4863_vm8 = vcmask 523264  }
  0x40   :  { %104 = vadd.xlane.f32.xlu0 %v103_v10  ;;  %107 = vadd.xlane.f32.xlu1 %v106_v11 }
  0x44   :  { %110 = vadd.xlane.f32.xlu0 %v109_v14  ;;  %113 = vadd.xlane.f32.xlu1 %v112_v15 }
  0x48   :  { %116 = vadd.xlane.f32.xlu0 %v115_v18  ;;  %119 = vadd.xlane.f32.xlu1 %v118_v19 }
  0x4c   :  { %122 = vadd.xlane.f32.xlu0 %v121_v22  ;;  %125 = vadd.xlane.f32.xlu1 %v124_v23 }
  0x50   :  { %128 = vadd.xlane.f32.xlu0 %v127_v26  ;;  %131 = vadd.xlane.f32.xlu1 %v130_v27 }
  0x54   :  { %134 = vadd.xlane.f32.xlu0 %v133_v30  ;;  %137 = vadd.xlane.f32.xlu1 %v136_v31 }
  0xc5   :  { %v93_v32 = vpop.xlane.xlu0 %92  ;;  %v99_v33 = vpop.xlane.xlu1 %98 }
  0xc6   :  { %v140_v34 = vmul.f32 0.03125, %v93_v32  ;;  %v142_v35 = vmul.f32 0.03125, %v99_v33 }
  0xc8   :  { %v7455_v36 = vsub.f32 %v66_v0, %v140_v34  ;;  %v7457_v37 = vsub.f32 %v68_v1, %v142_v35 }
  0xc9   :  { %v96_v38 = vpop.xlane.xlu0 %95  ;;  %v102_v39 = vpop.xlane.xlu1 %101 }
  0xca   :  { %v141_v40 = vmul.f32 0.03125, %v96_v38  ;;  %v143_v41 = vmul.f32 0.03125, %v102_v39  ;;  %v172_v42 = vmul.f32 %v7455_v36, %v7455_v36  ;;  %v174_v43 = vmul.f32 %v7457_v37, %v7457_v37 }
  0xcc   :  { %v7463_v44 = vsub.f32 %v67_v2, %v141_v40  ;;  %v7465_v45 = vsub.f32 %v69_v5, %v143_v41  ;;  %v188_v46 = vsel %vm90_vm0, %v172_v42, 0.0  ;;  %v194_v49 = vsel %vm90_vm0, %v174_v43, 0.0 }
  0xcd   :  { %189 = vadd.xlane.f32.xlu0 %v188_v46  ;;  %v105_v47 = vpop.xlane.xlu0 %104  ;;  %v108_v48 = vpop.xlane.xlu1 %107 }
  0xce   :  { %v144_v50 = vmul.f32 0.03125, %v105_v47  ;;  %v145_v51 = vmul.f32 0.03125, %v108_v48  ;;  %v173_v52 = vmul.f32 %v7463_v44, %v7463_v44  ;;  %v175_v53 = vmul.f32 %v7465_v45, %v7465_v45  ;;  %v341_v47 = vld [vmem:[%s9116_s1 + $0x8] sm:$0xff] }
  0xd0   :  { %v7473_v54 = vsub.f32 %v70_v8, %v144_v50  ;;  %v7475_v55 = vsub.f32 %v71_v9, %v145_v51  ;;  %v191_v56 = vsel %vm90_vm0, %v173_v52, 0.0  ;;  %v197_v59 = vsel %vm90_vm0, %v175_v53, 0.0 }
  0xd1   :  { %195 = vadd.xlane.f32.xlu0 %v194_v49  ;;  %192 = vadd.xlane.f32.xlu1 %v191_v56  ;;  %v111_v57 = vpop.xlane.xlu0 %110  ;;  %v114_v58 = vpop.xlane.xlu1 %113  ;;  %v400_v52 = vand.u32 4294901760, %v341_v47 }
  0xd2   :  { %v146_v60 = vmul.f32 0.03125, %v111_v57  ;;  %v147_v61 = vmul.f32 0.03125, %v114_v58  ;;  %v176_v62 = vmul.f32 %v7473_v54, %v7473_v54  ;;  %v177_v63 = vmul.f32 %v7475_v55, %v7475_v55 }
  0xd4   :  { %v7484_v0 = vsub.f32 %v7415_v12, %v146_v60  ;;  %v7487_v1 = vsub.f32 %v7417_v13, %v147_v61  ;;  %v200_v2 = vsel %vm90_vm0, %v176_v62, 0.0  ;;  %v203_v5 = vsel %vm90_vm0, %v177_v63, 0.0 }
  0xd5   :  { %198 = vadd.xlane.f32.xlu1 %v197_v59  ;;  %201 = vadd.xlane.f32.xlu0 %v200_v2  ;;  %v117_v3 = vpop.xlane.xlu0 %116  ;;  %v120_v4 = vpop.xlane.xlu1 %119  ;;  %v343_v59 = vld [vmem:[%s9116_s1 + $0x18] sm:$0xff] }
  0xd6   :  { %v148_v6 = vmul.f32 0.03125, %v117_v3  ;;  %v149_v7 = vmul.f32 0.03125, %v120_v4  ;;  %v178_v8 = vmul.f32 %v7484_v0, %v7484_v0  ;;  %v179_v9 = vmul.f32 %v7487_v1, %v7487_v1 }
  0xd7   :  { %v406_v62 = vand.u32 4294901760, %v343_v59 }
  0xd8   :  { %v7496_v10 = vsub.f32 %v7423_v16, %v148_v6  ;;  %v7499_v11 = vsub.f32 %v7425_v17, %v149_v7  ;;  %v206_v12 = vsel %vm90_vm0, %v178_v8, 0.0  ;;  %v209_v15 = vsel %vm90_vm0, %v179_v9, 0.0 }
  0xd9   :  { %204 = vadd.xlane.f32.xlu1 %v203_v5  ;;  %207 = vadd.xlane.f32.xlu0 %v206_v12  ;;  %v123_v13 = vpop.xlane.xlu0 %122  ;;  %v126_v14 = vpop.xlane.xlu1 %125  ;;  %v7559_v5 = vsub.f32 %v343_v59, %v406_v62  ;;  %v7595_v59 = vld [vmem:[#allocation7 + $0x2] ss:$0 sm:$0xff] }
  0xda   :  { %v150_v18 = vmul.f32 0.03125, %v123_v13  ;;  %v151_v19 = vmul.f32 0.03125, %v126_v14  ;;  %v180_v22 = vmul.f32 %v7496_v10, %v7496_v10  ;;  %v181_v16 = vmul.f32 %v7499_v11, %v7499_v11 }
  0xdb   :  { %v649_v9 = vand.u32 4294901760, %v7559_v5 }
  0xdc   :  { %v7508_v23 = vsub.f32 %v7431_v20, %v150_v18  ;;  %v7511_v17 = vsub.f32 %v7433_v21, %v151_v19  ;;  %v212_v26 = vsel %vm90_vm0, %v180_v22, 0.0  ;;  %v215_v31 = vsel %vm90_vm0, %v181_v16, 0.0 }
  0xdd   :  { %210 = vadd.xlane.f32.xlu1 %v209_v15  ;;  %213 = vadd.xlane.f32.xlu0 %v212_v26  ;;  %v129_v27 = vpop.xlane.xlu0 %128  ;;  %v132_v30 = vpop.xlane.xlu1 %131  ;;  %v650_v15 = vsub.f32 %v7559_v5, %v649_v9 }
  0xde   :  { %v152_v32 = vmul.f32 0.03125, %v129_v27  ;;  %v153_v33 = vmul.f32 0.03125, %v132_v30  ;;  %v182_v34 = vmul.f32 %v7508_v23, %v7508_v23  ;;  %v183_v20 = vmul.f32 %v7511_v17, %v7511_v17 }
  0xdf   :  { %v651_v22 = vand.u32 4294901760, %v650_v15 }
  0xe0   :  { %v7520_v35 = vsub.f32 %v7439_v24, %v152_v32  ;;  %v7523_v21 = vsub.f32 %v7441_v25, %v153_v33  ;;  %v218_v38 = vsel %vm90_vm0, %v182_v34, 0.0  ;;  %v221_v41 = vsel %vm90_vm0, %v183_v20, 0.0  ;;  %v340_v25 = vld [vmem:[%s9116_s1] sm:$0xff] }
  0xe1   :  { %216 = vadd.xlane.f32.xlu1 %v215_v31  ;;  %219 = vadd.xlane.f32.xlu0 %v218_v38  ;;  %v135_v39 = vpop.xlane.xlu0 %134  ;;  %v138_v40 = vpop.xlane.xlu1 %137  ;;  %v397_v51 = vand.u32 4294901760, %v340_v25 }
  0xe2   :  { %v154_v42 = vmul.f32 0.03125, %v135_v39  ;;  %v155_v43 = vmul.f32 0.03125, %v138_v40  ;;  %v184_v46 = vmul.f32 %v7520_v35, %v7520_v35  ;;  %v185_v24 = vmul.f32 %v7523_v21, %v7523_v21 }
  0xe3   :  { %v627_v58 = vsub.f32 %v340_v25, %v397_v51  ;;  %v7577_v26 = vpack.c.bf16 %v400_v52, %v397_v51 }
  0xe4   :  { %v7538_v48 = vsub.f32 %v7447_v28, %v154_v42  ;;  %v7541_v49 = vsub.f32 %v7449_v29, %v155_v43  ;;  %v224_v50 = vsel %vm90_vm0, %v184_v46, 0.0  ;;  %v227_v53 = vsel %vm90_vm0, %v185_v24, 0.0  ;;  %v342_v29 = vld [vmem:[%s9116_s1 + $0x10] sm:$0xff]  ;;  %s7317_s1 = smov 64  }
  0xe5   :  { %222 = vadd.xlane.f32.xlu1 %v221_v41  ;;  %225 = vadd.xlane.f32.xlu0 %v224_v50  ;;  %v634_v28 = vsub.f32 %v341_v47, %v400_v52  ;;  %v403_v61 = vand.u32 4294901760, %v342_v29  ;;  %v628_v63 = vand.u32 4294901760, %v627_v58 }
  0xe6   :  { %v186_v56 = vmul.f32 %v7538_v48, %v7538_v48  ;;  %v187_v57 = vmul.f32 %v7541_v49, %v7541_v49  ;;  %6595 = vmatprep.subr.bf16.mxu1 %v7577_v26 }
  0xe7   :  { %v635_v2 = vand.u32 4294901760, %v634_v28  ;;  %v7557_v4 = vsub.f32 %v342_v29, %v403_v61  ;;  %v629_v6 = vsub.f32 %v627_v58, %v628_v63  ;;  %6597 = vmatpush3.bf16.msra.mxu1 %v7577_v26  ;;  %v7581_v27 = vpack.c.bf16 %v406_v62, %v403_v61 }
  0xe8   :  { %v230_v60 = vsel %vm90_vm0, %v186_v56, 0.0  ;;  %v233_v3 = vsel %vm90_vm0, %v187_v57, 0.0  ;;  %v7583_v30 = vpack.c.bf16 %v634_v28, %v627_v58 }
  0xe9   :  { %228 = vadd.xlane.f32.xlu1 %v227_v53  ;;  %231 = vadd.xlane.f32.xlu0 %v230_v60  ;;  %v636_v7 = vsub.f32 %v634_v28, %v635_v2  ;;  %v642_v8 = vand.u32 4294901760, %v7557_v4  ;;  %v630_v12 = vand.u32 4294901760, %v629_v6  ;;  %v7591_v31 = vpack.c.bf16 %v7559_v5, %v7557_v4 }
  0xea   :  { %6599 = vmatprep.subr.bf16.mxu1 %v7581_v27  ;;  %v7593_v32 = vpack.c.bf16 %v635_v2, %v628_v63 }
  0xeb   :  { %v637_v13 = vand.u32 4294901760, %v636_v7  ;;  %v643_v14 = vsub.f32 %v7557_v4, %v642_v8  ;;  %6601 = vmatpush3.bf16.msra.mxu1 %v7581_v27 }
  0xed   :  { %234 = vadd.xlane.f32.xlu1 %v233_v3  ;;  %v7569_v18 = vpack.c.bf16 %v637_v13, %v630_v12  ;;  %v644_v19 = vand.u32 4294901760, %v643_v14  ;;  %v7598_v3 = vld [vmem:[#allocation7 + $0x3] ss:$0 sm:$0xff] }
  0xef   :  { %6603 = vmatprep.subr.bf16.mxu0 %v7569_v18  ;;  %v7573_v16 = vpack.c.bf16 %v651_v22, %v644_v19  ;;  %6882 = vmatprep.subr.bf16.mxu1 %v7569_v18 }
  0xf0   :  { %6605 = vmatpush3.bf16.msra.mxu0 %v7569_v18 }
  0xf1   :  { %6607 = vmatprep.subr.bf16.mxu0 %v7573_v16 }
  0xf4   :  { %6609 = vmatpush3.bf16.msra.mxu0 %v7573_v16 }
  0xf5   :  { %6611 = vmatprep.subr.bf16.mxu0 %v7583_v30 }
 0x15a   :  { %v190_v33 = vpop.xlane.xlu0 %189 }
 0x15b   :  { %v236_v34 = vmul.f32 0.03125, %v190_v33 }
 0x15d   :  { %v252_v20 = vadd.f32 1e-05, %v236_v34 }
 0x15e   :  { %v193_v38 = vpop.xlane.xlu1 %192  ;;  %v196_v39 = vpop.xlane.xlu0 %195 }
 0x15f   :  { %7102 = vrsqrt.f32 %v252_v20  ;;  %v237_v40 = vmul.f32 0.03125, %v193_v38  ;;  %v238_v41 = vmul.f32 0.03125, %v196_v39 }
 0x161   :  { %v253_v42 = vadd.f32 1e-05, %v237_v40  ;;  %v254_v43 = vadd.f32 1e-05, %v238_v41 }
 0x162   :  { %v199_v46 = vpop.xlane.xlu1 %198  ;;  %v202_v24 = vpop.xlane.xlu0 %201 }
 0x163   :  { %7104 = vrsqrt.f32 %v253_v42  ;;  %v239_v25 = vmul.f32 0.03125, %v199_v46  ;;  %v240_v47 = vmul.f32 0.03125, %v202_v24 }
 0x164   :  { %7106 = vrsqrt.f32 %v254_v43 }
 0x165   :  { %v255_v50 = vadd.f32 1e-05, %v239_v25  ;;  %v256_v51 = vadd.f32 1e-05, %v240_v47 }
 0x166   :  { %v205_v52 = vpop.xlane.xlu1 %204  ;;  %v208_v53 = vpop.xlane.xlu0 %207 }
 0x167   :  { %7108 = vrsqrt.f32 %v255_v50  ;;  %v241_v56 = vmul.f32 0.03125, %v205_v52  ;;  %v242_v57 = vmul.f32 0.03125, %v208_v53 }
 0x168   :  { %7110 = vrsqrt.f32 %v256_v51 }
 0x169   :  { %v7103_v58 = vpop.eup %7102  ;;  %v257_v28 = vadd.f32 1e-05, %v241_v56  ;;  %v258_v29 = vadd.f32 1e-05, %v242_v57 }
 0x16a   :  { %v284_v60 = vmul.f32 %v7103_v58, %v7455_v36  ;;  %v211_v61 = vpop.xlane.xlu1 %210  ;;  %v214_v62 = vpop.xlane.xlu0 %213 }
 0x16b   :  { %7112 = vrsqrt.f32 %v257_v28  ;;  %v243_v63 = vmul.f32 0.03125, %v211_v61  ;;  %v244_v2 = vmul.f32 0.03125, %v214_v62 }
 0x16c   :  { %7114 = vrsqrt.f32 %v258_v29  ;;  %v304_v6 = vmul.f32 %v7595_v59, %v284_v60 }
 0x16d   :  { %v7105_v7 = vpop.eup %7104  ;;  %v259_v12 = vadd.f32 1e-05, %v243_v63  ;;  %v260_v13 = vadd.f32 1e-05, %v244_v2 }
 0x16e   :  { %v7107_v14 = vpop.eup %7106  ;;  %v285_v15 = vmul.f32 %v7105_v7, %v7463_v44  ;;  %v217_v19 = vpop.xlane.xlu1 %216  ;;  %v324_v36 = vadd.f32 %v7598_v3, %v304_v6 }
 0x16f   :  { %v220_v22 = vpop.xlane.xlu0 %219  ;;  %v286_v33 = vmul.f32 %v7107_v14, %v7457_v37  ;;  %7116 = vrsqrt.f32 %v259_v12  ;;  %v245_v34 = vmul.f32 0.03125, %v217_v19 }
 0x170   :  { %v246_v20 = vmul.f32 0.03125, %v220_v22  ;;  %7118 = vrsqrt.f32 %v260_v13  ;;  %v349_v38 = vsel %vm90_vm0, %v324_v36, 0  ;;  %v305_v39 = vmul.f32 %v7595_v59, %v285_v15 }
 0x171   :  { %v7109_v40 = vpop.eup %7108  ;;  %v261_v41 = vadd.f32 1e-05, %v245_v34  ;;  %v7606_v43 = vand.u32 4294901760, %v349_v38  ;;  %v306_v44 = vmul.f32 %v7595_v59, %v286_v33 }
 0x172   :  { %v262_v42 = vadd.f32 1e-05, %v246_v20  ;;  %v7111_v46 = vpop.eup %7110  ;;  %v287_v24 = vmul.f32 %v7109_v40, %v7465_v45  ;;  %v223_v25 = vpop.xlane.xlu1 %222  ;;  %v325_v47 = vadd.f32 %v7598_v3, %v305_v39 }
 0x173   :  { %v226_v37 = vpop.xlane.xlu0 %225  ;;  %v288_v50 = vmul.f32 %v7111_v46, %v7473_v54  ;;  %7120 = vrsqrt.f32 %v261_v41  ;;  %v247_v51 = vmul.f32 0.03125, %v223_v25  ;;  %6004 = vmatprep.mubr.f32.mxu0 %v7606_v43  ;;  %v326_v56 = vadd.f32 %v7598_v3, %v306_v44 }
 0x174   :  { %v248_v52 = vmul.f32 0.03125, %v226_v37  ;;  %7122 = vrsqrt.f32 %v262_v42  ;;  %v352_v53 = vsel %vm90_vm0, %v325_v47, 0  ;;  %v7616_v57 = vsub.f32 %v349_v38, %v7606_v43 }
 0x175   :  { %v7113_v45 = vpop.eup %7112  ;;  %v263_v58 = vadd.f32 1e-05, %v247_v51  ;;  %v7618_v29 = vand.u32 4294901760, %v352_v53  ;;  %v307_v54 = vmul.f32 %v7595_v59, %v287_v24  ;;  %v355_v2 = vsel %vm90_vm0, %v326_v56, 0 }
 0x176   :  { %v264_v28 = vadd.f32 1e-05, %v248_v52  ;;  %v7115_v60 = vpop.eup %7114  ;;  %v289_v61 = vmul.f32 %v7113_v45, %v7475_v55  ;;  %v229_v62 = vpop.xlane.xlu1 %228  ;;  %v467_v6 = vand.u32 4294901760, %v7616_v57  ;;  %v308_v7 = vmul.f32 %v7595_v59, %v288_v50 }
 0x177   :  { %v232_v63 = vpop.xlane.xlu0 %231  ;;  %v290_v12 = vmul.f32 %v7115_v60, %v7484_v0  ;;  %7124 = vrsqrt.f32 %v263_v58  ;;  %v249_v13 = vmul.f32 0.03125, %v229_v62  ;;  %6005 = vmatmul.mubr.f32.vlgmr.msra.gmra.mrb[0].mxu0 %v7618_v29  ;;  %v7628_v15 = vand.u32 4294901760, %v355_v2 }
 0x178   :  { %v250_v14 = vmul.f32 0.03125, %v232_v63  ;;  %7126 = vrsqrt.f32 %v264_v28  ;;  %6613 = vmatpush3.bf16.msra.mxu0 %v7583_v30  ;;  %v468_v55 = vsub.f32 %v7616_v57, %v467_v6  ;;  %v327_v19 = vadd.f32 %v7598_v3, %v307_v54 }
 0x179   :  { %v7117_v22 = vpop.eup %7116  ;;  %v265_v36 = vadd.f32 1e-05, %v249_v13  ;;  %v328_v0 = vadd.f32 %v7598_v3, %v308_v7  ;;  %6615 = vmatprep.subr.bf16.mxu0 %v7591_v31  ;;  %v7637_v34 = vsub.f32 %v352_v53, %v7618_v29  ;;  %6007 = vmatprep.mubr.f32.mxu0 %v7628_v15  ;;  %v309_v41 = vmul.f32 %v7595_v59, %v289_v61 }
 0x17a   :  { %v266_v33 = vadd.f32 1e-05, %v250_v14  ;;  %v7119_v20 = vpop.eup %7118  ;;  %v291_v30 = vmul.f32 %v7117_v22, %v7487_v1  ;;  %v235_v38 = vpop.xlane.xlu1 %234  ;;  %v469_v39 = vand.u32 4294901760, %v468_v55  ;;  %v358_v40 = vsel %vm90_vm0, %v327_v19, 0 }
 0x17b   :  { %v292_v42 = vmul.f32 %v7119_v20, %v7496_v10  ;;  %7128 = vrsqrt.f32 %v265_v36  ;;  %v251_v44 = vmul.f32 0.03125, %v235_v38  ;;  %v7644_v46 = vand.u32 4294901760, %v358_v40 }
 0x17c   :  { %7130 = vrsqrt.f32 %v266_v33  ;;  %5972 = vmatprep.mubr.f32.mxu1 %v469_v39  ;;  %v361_v24 = vsel %vm90_vm0, %v328_v0, 0  ;;  %v477_v1 = vand.u32 4294901760, %v7637_v34  ;;  %v329_v25 = vadd.f32 %v7598_v3, %v309_v41  ;;  %6617 = vmatpush3.bf16.msra.mxu0 %v7591_v31 }
 0x17d   :  { %v7121_v37 = vpop.eup %7120  ;;  %v267_v47 = vadd.f32 1e-05, %v251_v44  ;;  %6008 = vmatmul.mubr.f32.gmra.mrb[2].mxu0 %v7644_v46  ;;  %v7651_v50 = vand.u32 4294901760, %v361_v24  ;;  %v7654_v10 = vsub.f32 %v355_v2, %v7628_v15  ;;  %v310_v51 = vmul.f32 %v7595_v59, %v290_v12  ;;  %6619 = vmatprep.subr.bf16.mxu0 %v7577_v26 }
 0x17e   :  { %v7123_v52 = vpop.eup %7122  ;;  %v293_v53 = vmul.f32 %v7121_v37, %v7499_v11  ;;  %v478_v31 = vsub.f32 %v7637_v34, %v477_v1  ;;  %v364_v56 = vsel %vm90_vm0, %v329_v25, 0  ;;  %v7664_v45 = vsub.f32 %v358_v40, %v7644_v46 }
 0x17f   :  { %v294_v58 = vmul.f32 %v7123_v52, %v7508_v23  ;;  %7132 = vrsqrt.f32 %v267_v47  ;;  %6010 = vmatprep.mubr.f32.mxu0 %v7651_v50  ;;  %v7668_v28 = vand.u32 4294901760, %v364_v56  ;;  %v487_v54 = vand.u32 4294901760, %v7654_v10 }
 0x180   :  { %v479_v60 = vand.u32 4294901760, %v478_v31  ;;  %v330_v11 = vadd.f32 %v7598_v3, %v310_v51  ;;  %v497_v61 = vand.u32 4294901760, %v7664_v45  ;;  %v311_v62 = vmul.f32 %v7595_v59, %v291_v30 }
 0x181   :  { %v7125_v63 = vpop.eup %7124  ;;  %6011 = vmatmul.mubr.f32.gmra.mrb[4].mxu0 %v7668_v28  ;;  %v488_v23 = vsub.f32 %v7654_v10, %v487_v54  ;;  %v7679_v2 = vsub.f32 %v361_v24, %v7651_v50  ;;  %v7682_v7 = vsub.f32 %v364_v56, %v7668_v28  ;;  %v312_v12 = vmul.f32 %v7595_v59, %v292_v42 }
 0x182   :  { %v7127_v13 = vpop.eup %7126  ;;  %v295_v14 = vmul.f32 %v7125_v63, %v7511_v17  ;;  %5973 = vmatmul.mubr.f32.vlgmr.msra.gmra.mrb[0].mxu1 %v479_v60  ;;  %v367_v55 = vsel %vm90_vm0, %v330_v11, 0  ;;  %v498_v19 = vsub.f32 %v7664_v45, %v497_v61  ;;  %v331_v22 = vadd.f32 %v7598_v3, %v311_v62 }
 0x183   :  { %v296_v36 = vmul.f32 %v7127_v13, %v7520_v35  ;;  %v489_v33 = vand.u32 4294901760, %v488_v23  ;;  %v7692_v0 = vand.u32 4294901760, %v367_v55  ;;  %v507_v20 = vand.u32 4294901760, %v7679_v2  ;;  %6884 = vmatpush3.bf16.msra.mxu1 %v7569_v18 }
 0x184   :  { %v499_v30 = vand.u32 4294901760, %v498_v19  ;;  %v370_v17 = vsel %vm90_vm0, %v331_v22, 0  ;;  %v517_v38 = vand.u32 4294901760, %v7682_v7  ;;  %v332_v39 = vadd.f32 %v7598_v3, %v312_v12  ;;  %6883 = vmatprep.subr.bf16.mxu1 %v7573_v16 }
 0x185   :  { %v7129_v40 = vpop.eup %7128  ;;  %5975 = vmatprep.mubr.f32.mxu1 %v489_v33  ;;  %6013 = vmatprep.mubr.f32.mxu0 %v7692_v0  ;;  %v7701_v35 = vand.u32 4294901760, %v370_v17  ;;  %v508_v41 = vsub.f32 %v7679_v2, %v507_v20  ;;  %v7707_v18 = vsub.f32 %v367_v55, %v7692_v0  ;;  %v313_v42 = vmul.f32 %v7595_v59, %v293_v53 }
 0x186   :  { %v7131_v44 = vpop.eup %7130  ;;  %v297_v24 = vmul.f32 %v7129_v40, %v7523_v21  ;;  %5976 = vmatmul.mubr.f32.gmra.mrb[2].mxu1 %v499_v30  ;;  %v518_v25 = vsub.f32 %v7682_v7, %v517_v38  ;;  %v373_v37 = vsel %vm90_vm0, %v332_v39, 0  ;;  %v314_v47 = vmul.f32 %v7595_v59, %v294_v58 }
 0x187   :  { %v298_v51 = vmul.f32 %v7131_v44, %v7538_v48  ;;  %6014 = vmatmul.mubr.f32.gmra.mrb[6].mxu0 %v7701_v35  ;;  %v509_v52 = vand.u32 4294901760, %v508_v41  ;;  %v527_v31 = vand.u32 4294901760, %v7707_v18  ;;  %v7720_v53 = vsub.f32 %v370_v17, %v7701_v35  ;;  %6885 = vmatpush3.bf16.msra.mxu1 %v7573_v16 }
 0x188   :  { %6036 = vmatprep.mubr.f32.mxu0 %v7616_v57  ;;  %v519_v21 = vand.u32 4294901760, %v518_v25  ;;  %v7724_v56 = vand.u32 4294901760, %v373_v37  ;;  %v333_v60 = vadd.f32 %v7598_v3, %v313_v42  ;;  %v334_v58 = vadd.f32 %v7598_v3, %v314_v47 }
 0x189   :  { %v7133_v48 = vpop.eup %7132  ;;  %5978 = vmatprep.mubr.f32.mxu1 %v509_v52  ;;  %v528_v11 = vsub.f32 %v7707_v18, %v527_v31  ;;  %v537_v62 = vand.u32 4294901760, %v7720_v53  ;;  %v315_v63 = vmul.f32 %v7595_v59, %v295_v14  ;;  %v316_v16 = vmul.f32 %v7595_v59, %v296_v36 }
 0x18a   :  { %v299_v23 = vmul.f32 %v7133_v48, %v7541_v49  ;;  %5979 = vmatmul.mubr.f32.gmra.mrb[4].mxu1 %v519_v21  ;;  %v7736_v12 = vsub.f32 %v373_v37, %v7724_v56  ;;  %v376_v13 = vsel %vm90_vm0, %v333_v60, 0  ;;  %v379_v55 = vsel %vm90_vm0, %v334_v58, 0 }
 0x18b   :  { %6037 = vmatmul.mubr.f32.vlgmr.msra.gmra.mrb[0].mxu0 %v7637_v34  ;;  %v529_v19 = vand.u32 4294901760, %v528_v11  ;;  %v538_v22 = vsub.f32 %v7720_v53, %v537_v62  ;;  %v7744_v14 = vand.u32 4294901760, %v376_v13  ;;  %v7746_v36 = vand.u32 4294901760, %v379_v55 }
 0x18c   :  { %6621 = vmatpush3.bf16.msra.mxu0 %v7577_v26  ;;  %6039 = vmatprep.mubr.f32.mxu0 %v7654_v10  ;;  %v547_v49 = vand.u32 4294901760, %v7736_v12  ;;  %v335_v33 = vadd.f32 %v7598_v3, %v315_v63  ;;  %v336_v30 = vadd.f32 %v7598_v3, %v316_v16  ;;  %v317_v17 = vmul.f32 %v7595_v59, %v297_v24 }
 0x18d   :  { %5981 = vmatprep.mubr.f32.mxu1 %v529_v19  ;;  %v539_v39 = vand.u32 4294901760, %v538_v22  ;;  %v7755_v40 = vsub.f32 %v376_v13, %v7744_v14  ;;  %v7758_v41 = vsub.f32 %v379_v55, %v7746_v36  ;;  %6623 = vmatprep.subr.bf16.mxu0 %v7581_v27  ;;  %v318_v42 = vmul.f32 %v7595_v59, %v298_v51 }
 0x18e   :  { %v548_v44 = vsub.f32 %v7736_v12, %v547_v49  ;;  %v382_v25 = vsel %vm90_vm0, %v335_v33, 0  ;;  %v385_v24 = vsel %vm90_vm0, %v336_v30, 0  ;;  %v337_v37 = vadd.f32 %v7598_v3, %v317_v17 }
 0x18f   :  { %5982 = vmatmul.mubr.f32.gmra.mrb[6].mxu1 %v539_v39  ;;  %6040 = vmatmul.mubr.f32.gmra.mrb[2].mxu0 %v7664_v45  ;;  %v9124_v47 = vand.u32 4294901760, %v7755_v40  ;;  %v9123_v52 = vand.u32 4294901760, %v7758_v41  ;;  %v7771_v21 = vand.u32 4294901760, %v382_v25  ;;  %v7773_v51 = vand.u32 4294901760, %v385_v24 }
 0x190   :  { %v549_v60 = vand.u32 4294901760, %v548_v44  ;;  %6042 = vmatprep.mubr.f32.mxu0 %v7679_v2  ;;  %v388_v58 = vsel %vm90_vm0, %v337_v37, 0  ;;  %6625 = vmatpush3.bf16.msra.mxu0 %v7581_v27  ;;  %v338_v48 = vadd.f32 %v7598_v3, %v318_v42  ;;  %v319_v11 = vmul.f32 %v7595_v59, %v299_v23 }
 0x191   :  { %v558_v63 = vsub.f32 %v7755_v40, %v9124_v47  ;;  %v568_v16 = vsub.f32 %v7758_v41, %v9123_v52  ;;  %v7787_v13 = vsub.f32 %v382_v25, %v7771_v21  ;;  %v7790_v55 = vsub.f32 %v385_v24, %v7773_v51  ;;  %6627 = vmatprep.subr.bf16.mxu0 %v7593_v32 }
 0x192   :  { %5984 = vmatprep.mubr.f32.mxu1 %v549_v60  ;;  %v7793_v19 = vand.u32 4294901760, %v388_v58  ;;  %v391_v59 = vsel %vm90_vm0, %v338_v48, 0  ;;  %v339_v23 = vadd.f32 %v7598_v3, %v319_v11  ;;  %v9131_v4 = vand.u32 4294901760, %v7755_v40 }
 0x193   :  { %v559_v22 = vand.u32 4294901760, %v558_v63  ;;  %6043 = vmatmul.mubr.f32.gmra.mrb[4].mxu0 %v7682_v7  ;;  %v569_v33 = vand.u32 4294901760, %v568_v16  ;;  %v577_v30 = vand.u32 4294901760, %v7787_v13  ;;  %v587_v17 = vand.u32 4294901760, %v7790_v55 }
 0x194   :  { %6045 = vmatprep.mubr.f32.mxu0 %v7707_v18  ;;  %v596_v39 = vsub.f32 %v388_v58, %v7793_v19  ;;  %v7802_v42 = vand.u32 4294901760, %v391_v59  ;;  %v394_v44 = vsel %vm90_vm0, %v339_v23, 0  ;;  %v9132_v5 = vand.u32 4294901760, %v7758_v41 }
 0x195   :  { %5985 = vmatmul.mubr.f32.gmra.mrb[8].mxu1 %v559_v22  ;;  %v578_v25 = vsub.f32 %v7787_v13, %v577_v30  ;;  %v588_v3 = vsub.f32 %v7790_v55, %v587_v17  ;;  %v7807_v24 = vand.u32 4294901760, %v394_v44 }
 0x196   :  { %5987 = vmatprep.mubr.f32.mxu1 %v569_v33  ;;  %v597_v37 = vand.u32 4294901760, %v596_v39  ;;  %v606_v60 = vsub.f32 %v391_v59, %v7802_v42 }
 0x197   :  { %v579_v48 = vand.u32 4294901760, %v578_v25  ;;  %6046 = vmatmul.mubr.f32.gmra.mrb[6].mxu0 %v7720_v53  ;;  %v589_v11 = vand.u32 4294901760, %v588_v3  ;;  %v616_v58 = vsub.f32 %v394_v44, %v7807_v24 }
 0x198   :  { %6048 = vmatprep.mubr.f32.mxu0 %v7736_v12  ;;  %v598_v63 = vsub.f32 %v596_v39, %v597_v37  ;;  %v607_v16 = vand.u32 4294901760, %v606_v60 }
 0x199   :  { %5988 = vmatmul.mubr.f32.gmra.mrb[10].mxu1 %v579_v48  ;;  %v617_v23 = vand.u32 4294901760, %v616_v58 }
 0x19a   :  { %5990 = vmatprep.mubr.f32.mxu1 %v589_v11  ;;  %v599_v22 = vand.u32 4294901760, %v598_v63  ;;  %v608_v52 = vsub.f32 %v606_v60, %v607_v16 }
 0x19b   :  { %6049 = vmatmul.mubr.f32.gmra.mrb[8].mxu0 %v7755_v40  ;;  %v618_v33 = vsub.f32 %v616_v58, %v617_v23 }
 0x19c   :  { %v609_v47 = vand.u32 4294901760, %v608_v52  ;;  %6051 = vmatprep.mubr.f32.mxu0 %v7758_v41 }
 0x19d   :  { %5991 = vmatmul.mubr.f32.gmra.mrb[12].mxu1 %v599_v22  ;;  %v619_v59 = vand.u32 4294901760, %v618_v33 }
 0x19e   :  { %5993 = vmatprep.mubr.f32.mxu1 %v609_v47  ;;  %v6630_v47 = vpack.c.bf16 %v649_v9, %v642_v8 }
 0x19f   :  { %6052 = vmatmul.mubr.f32.gmra.mrb[10].mxu0 %v7787_v13 }
 0x1a0   :  { %6054 = vmatprep.mubr.f32.mxu0 %v7790_v55 }
 0x1a1   :  { %5994 = vmatmul.mubr.f32.gmra.mrb[14].mxu1 %v619_v59 }
 0x1a2   :  { %6016 = vmatprep.mubr.f32.mxu1 %v7724_v56 }
 0x1a3   :  { %6055 = vmatmul.mubr.f32.gmra.mrb[12].mxu0 %v596_v39 }
 0x1a4   :  { %6057 = vmatprep.mubr.f32.mxu0 %v606_v60 }
 0x1a5   :  { %6017 = vmatmul.mubr.f32.vlgmr.msra.gmra.mrb[8].mxu1 %v7744_v14 }
 0x1a6   :  { %6019 = vmatprep.mubr.f32.mxu1 %v7746_v36 }
 0x1a7   :  { %6058 = vmatmul.mubr.f32.gmra.mrb[14].mxu0 %v616_v58 }
 0x1a8   :  { %6068 = vmatprep.mubr.f32.mxu0 %v467_v6 }
 0x1a9   :  { %6020 = vmatmul.mubr.f32.gmra.mrb[10].mxu1 %v7771_v21 }
 0x1aa   :  { %6022 = vmatprep.mubr.f32.mxu1 %v7773_v51 }
 0x1ab   :  { %6069 = vmatmul.mubr.f32.vlgmr.msra.gmra.mrb[0].mxu0 %v477_v1 }
 0x1ac   :  { %6629 = vmatpush3.bf16.msra.mxu0 %v7593_v32  ;;  %6071 = vmatprep.mubr.f32.mxu0 %v487_v54 }
 0x1ad   :  { %6023 = vmatmul.mubr.f32.gmra.mrb[12].mxu1 %v7793_v19  ;;  %6631 = vmatprep.subr.bf16.mxu0 %v6630_v47 }
 0x1ae   :  { %6025 = vmatprep.mubr.f32.mxu1 %v7802_v42 }
 0x1af   :  { %6072 = vmatmul.mubr.f32.gmra.mrb[2].mxu0 %v497_v61 }
 0x1b0   :  { %6074 = vmatprep.mubr.f32.mxu0 %v507_v20  ;;  %6633 = vmatpush3.bf16.msra.mxu0 %v6630_v47 }
 0x1b1   :  { %6026 = vmatmul.mubr.f32.gmra.mrb[14].mxu1 %v7807_v24  ;;  %6635 = vmatprep.subr.bf16.mxu0 %v7577_v26 }
 0x1b3   :  { %6075 = vmatmul.mubr.f32.gmra.mrb[4].mxu0 %v517_v38 }
 0x1b4   :  { %6077 = vmatprep.mubr.f32.mxu0 %v527_v31 }
 0x1b7   :  { %6078 = vmatmul.mubr.f32.gmra.mrb[6].mxu0 %v537_v62 }
 0x1b8   :  { %6080 = vmatprep.mubr.f32.mxu0 %v547_v49 }
 0x1bb   :  { %6081 = vmatmul.mubr.f32.gmra.mrb[8].mxu0 %v9131_v4 }
 0x1bc   :  { %6083 = vmatprep.mubr.f32.mxu0 %v9132_v5 }
 0x1bf   :  { %6084 = vmatmul.mubr.f32.gmra.mrb[10].mxu0 %v577_v30 }
 0x1c0   :  { %6086 = vmatprep.mubr.f32.mxu0 %v587_v17 }
 0x1c3   :  { %6087 = vmatmul.mubr.f32.gmra.mrb[12].mxu0 %v597_v37 }
 0x1c4   :  { %6089 = vmatprep.mubr.f32.mxu0 %v607_v16 }
 0x1c7   :  { %6090 = vmatmul.mubr.f32.gmra.mrb[14].mxu0 %v617_v23 }
 0x1c8   :  { %6100 = vmatprep.mubr.f32.mxu0 %v7606_v43 }
 0x1cb   :  { %6101 = vmatmul.mubr.f32.vlgmr.msra.gmra.mrb[0].mxu0 %v7618_v29 }
 0x1cc   :  { %6637 = vmatpush3.bf16.msra.mxu0 %v7577_v26  ;;  %6103 = vmatprep.mubr.f32.mxu0 %v7628_v15 }
 0x1cd   :  { %6639 = vmatprep.subr.bf16.mxu0 %v7581_v27 }
 0x1cf   :  { %6104 = vmatmul.mubr.f32.gmra.mrb[2].mxu0 %v7644_v46 }
 0x1d0   :  { %6106 = vmatprep.mubr.f32.mxu0 %v7651_v50  ;;  %6641 = vmatpush3.bf16.msra.mxu0 %v7581_v27 }
 0x1d3   :  { %6107 = vmatmul.mubr.f32.gmra.mrb[4].mxu0 %v7668_v28 }
 0x1d4   :  { %6109 = vmatprep.mubr.f32.mxu0 %v7692_v0 }
 0x1d7   :  { %6110 = vmatmul.mubr.f32.gmra.mrb[6].mxu0 %v7701_v35 }
 0x1d8   :  { %6112 = vmatprep.mubr.f32.mxu0 %v7724_v56 }
 0x1db   :  { %6113 = vmatmul.mubr.f32.gmra.mrb[8].mxu0 %v7744_v14 }
 0x1dc   :  { %6115 = vmatprep.mubr.f32.mxu0 %v7746_v36 }
 0x1df   :  { %6116 = vmatmul.mubr.f32.gmra.mrb[10].mxu0 %v7771_v21 }
 0x1e0   :  { %6118 = vmatprep.mubr.f32.mxu0 %v7773_v51 }
 0x1e3   :  { %6119 = vmatmul.mubr.f32.gmra.mrb[12].mxu0 %v7793_v19 }
 0x1e4   :  { %6121 = vmatprep.mubr.f32.mxu0 %v7802_v42 }
 0x1e7   :  { %6122 = vmatmul.mubr.f32.gmra.mrb[14].mxu0 %v7807_v24 }
 0x1e8   :  { %6132 = vmatprep.mubr.f32.mxu0 %v7606_v43 }
 0x1eb   :  { %6133 = vmatmul.mubr.f32.vlgmr.msra.gmra.mrb[0].mxu0 %v7618_v29 }
 0x1ec   :  { %6135 = vmatprep.mubr.f32.mxu0 %v7628_v15 }
 0x1ef   :  { %6136 = vmatmul.mubr.f32.gmra.mrb[2].mxu0 %v7644_v46 }
 0x1f0   :  { %6138 = vmatprep.mubr.f32.mxu0 %v7651_v50 }
 0x1f3   :  { %6139 = vmatmul.mubr.f32.gmra.mrb[4].mxu0 %v7668_v28  ;;  %v5586_v28 = vld [vmem:[#allocation7] ss:$0 sm:$0xff] }
 0x1f4   :  { %6141 = vmatprep.mubr.f32.mxu0 %v7692_v0 }
 0x1f7   :  { %6142 = vmatmul.mubr.f32.gmra.mrb[6].mxu0 %v7701_v35 }
 0x1f8   :  { %6144 = vmatprep.mubr.f32.mxu0 %v7724_v56 }
 0x1fb   :  { %6145 = vmatmul.mubr.f32.gmra.mrb[8].mxu0 %v7744_v14 }
 0x1fc   :  { %6147 = vmatprep.mubr.f32.mxu0 %v7746_v36 }
 0x1ff   :  { %6148 = vmatmul.mubr.f32.gmra.mrb[10].mxu0 %v7771_v21 }
 0x200   :  { %6150 = vmatprep.mubr.f32.mxu0 %v7773_v51 }
 0x203   :  { %6151 = vmatmul.mubr.f32.gmra.mrb[12].mxu0 %v7793_v19 }
 0x204   :  { %6153 = vmatprep.mubr.f32.mxu0 %v7802_v42 }
 0x207   :  { %6154 = vmatmul.mubr.f32.gmra.mrb[14].mxu0 %v7807_v24 }
 0x255   :  { %v5974_v8 = vpop.f32.mrb[0].mxu1 }
 0x256   :  { %v471_v9 = vpop.f32.mrb[1].mxu1  ;;  %v482_v54 = vadd.f32 %v5974_v8, %v5586_v28 }
 0x257   :  { %v472_v61 = vadd.f32 %v5586_v28, %v471_v9  ;;  %v1670_v9 = vld [vmem:[#allocation5] sm:$0xff] }
 0x259   :  { %v5977_v26 = vpop.f32.mrb[2].mxu1 }
 0x25a   :  { %v491_v27 = vpop.f32.mrb[3].mxu1  ;;  %v502_v38 = vadd.f32 %v5977_v26, %v5586_v28  ;;  %v1671_v26 = vld [vmem:[#allocation5 + $0x8] sm:$0xff] }
 0x25b   :  { %v492_v35 = vadd.f32 %v5586_v28, %v491_v27  ;;  %v1755_v27 = vand.u32 4294901760, %v1670_v9 }
 0x25d   :  { %v5980_v32 = vpop.f32.mrb[4].mxu1 }
 0x25e   :  { %v511_v43 = vpop.f32.mrb[5].mxu1  ;;  %v522_v62 = vadd.f32 %v5980_v32, %v5586_v28  ;;  %v1758_v32 = vand.u32 4294901760, %v1671_v26 }
 0x25f   :  { %v512_v12 = vadd.f32 %v5586_v28, %v511_v43 }
 0x260   :  { %v7952_v43 = vpack.c.bf16 %v1758_v32, %v1755_v27 }
 0x262   :  { %v5983_v57 = vpop.f32.mrb[6].mxu1  ;;  %6643 = vmatprep.subr.bf16.mxu1 %v7952_v43 }
 0x263   :  { %v531_v29 = vpop.f32.mrb[7].mxu1  ;;  %v542_v41 = vadd.f32 %v5983_v57, %v5586_v28  ;;  %6645 = vmatpush3.bf16.msra.mxu1 %v7952_v43  ;;  %v1526_v57 = vlaneseq }
 0x264   :  { %v532_v52 = vadd.f32 %v5586_v28, %v531_v29 }
 0x265   :  { %v1527_v29 = vshrl.u32 %v1526_v57, 7 }
 0x278   :  { %v6018_v6 = vpop.f32.mrb[8].mxu1 }
 0x279   :  { %v760_v15 = vpop.f32.mrb[9].mxu1  ;;  %v6902_v19 = vadd.f32 %v6018_v6, %v5586_v28  ;;  %v7956_v6 = vsub.s32 0, %v1527_v29 }
 0x27a   :  { %v6904_v30 = vadd.f32 %v5586_v28, %v760_v15  ;;  %v7958_v15 = vld [vmem:[#allocation5 + $0x10] sm:$0xff] }
 0x27c   :  { %v6021_v34 = vpop.f32.mrb[10].mxu1 }
 0x27d   :  { %v772_v46 = vpop.f32.mrb[11].mxu1  ;;  %v6906_v25 = vadd.f32 %v6021_v34, %v5586_v28  ;;  %v7960_v34 = vld [vmem:[#allocation5 + $0x18] sm:$0xff] }
 0x27e   :  { %v6908_v3 = vadd.f32 %v5586_v28, %v772_v46  ;;  %v1761_v46 = vand.u32 4294901760, %v7958_v15 }
 0x280   :  { %v6024_v1 = vpop.f32.mrb[12].mxu1 }
 0x281   :  { %v784_v50 = vpop.f32.mrb[13].mxu1  ;;  %v6910_v11 = vadd.f32 %v6024_v1, %v5586_v28  ;;  %v1764_v1 = vand.u32 4294901760, %v7960_v34 }
 0x282   :  { %v6912_v58 = vadd.f32 %v5586_v28, %v784_v50 }
 0x284   :  { %v6027_v10 = vpop.f32.mrb[14].mxu1 }
 0x285   :  { %v796_v45 = vpop.f32.mrb[15].mxu1  ;;  %v6914_v33 = vadd.f32 %v6027_v10, %v5586_v28 }
 0x286   :  { %v6916_v59 = vadd.f32 %v5586_v28, %v796_v45  ;;  %v7968_v28 = vpack.c.bf16 %v1764_v1, %v1761_v46 }
 0x288   :  { %6647 = vmatprep.subr.bf16.mxu1 %v7968_v28 }
 0x289   :  { %6649 = vmatpush3.bf16.msra.mxu1 %v7968_v28 }
 0x2be   :  { %v6134_v2 = vpop.f32.mrb[0].mxu0 }
 0x2bf   :  { %v7888_v7 = vadd.f32 %v6134_v2, %v482_v54  ;;  %v1432_v0 = vpop.f32.mrb[1].mxu0 }
 0x2c0   :  { %v7890_v20 = vadd.f32 %v1432_v0, %v472_v61 }
 0x2c1   :  { %1608 = vrot.lane.b32.xlu1 %v7888_v7, %s7317_s1  ;;  %v1533_v50 = vrot.slane %v7888_v7, %v7956_v6 }
 0x2c2   :  { %v6137_v18 = vpop.f32.mrb[2].mxu0  ;;  %1606 = vrot.lane.b32.xlu0 %v7890_v20, %s7317_s1  ;;  %v1529_v45 = vrot.slane %v7890_v20, %v7956_v6 }
 0x2c3   :  { %v7896_v31 = vadd.f32 %v6137_v18, %v502_v38  ;;  %v1444_v53 = vpop.f32.mrb[3].mxu0 }
 0x2c4   :  { %v7898_v56 = vadd.f32 %v1444_v53, %v492_v35 }
 0x2c5   :  { %v1541_v18 = vrot.slane %v7896_v31, %v7956_v6 }
 0x2c6   :  { %v6140_v14 = vpop.f32.mrb[4].mxu0  ;;  %1610 = vrot.lane.b32.xlu1 %v7898_v56, %s7317_s1  ;;  %v1537_v0 = vrot.slane %v7898_v56, %v7956_v6 }
 0x2c7   :  { %v7902_v36 = vadd.f32 %v6140_v14, %v522_v62  ;;  %v1456_v49 = vpop.f32.mrb[5].mxu0  ;;  %v7981_v62 = vsub.f32 %v1670_v9, %v1755_v27 }
 0x2c8   :  { %v7904_v40 = vadd.f32 %v1456_v49, %v512_v12  ;;  %v7983_v12 = vsub.f32 %v1671_v26, %v1758_v32 }
 0x2ca   :  { %v6143_v21 = vpop.f32.mrb[6].mxu0  ;;  %1612 = vrot.lane.b32.xlu1 %v7896_v31, %s7317_s1  ;;  %1614 = vrot.lane.b32.xlu0 %v7904_v40, %s7317_s1  ;;  %v1545_v53 = vrot.slane %v7904_v40, %v7956_v6 }
 0x2cb   :  { %v7910_v51 = vadd.f32 %v6143_v21, %v542_v41  ;;  %v1468_v13 = vpop.f32.mrb[7].mxu0  ;;  %v1986_v21 = vand.u32 4294901760, %v7981_v62 }
 0x2cc   :  { %v7912_v55 = vadd.f32 %v1468_v13, %v532_v52  ;;  %v1993_v13 = vand.u32 4294901760, %v7983_v12 }
 0x2ce   :  { %v6146_v17 = vpop.f32.mrb[8].mxu0  ;;  %1616 = vrot.lane.b32.xlu1 %v7902_v36, %s7317_s1  ;;  %1618 = vrot.lane.b32.xlu0 %v7912_v55, %s7317_s1 }
 0x2cf   :  { %v7918_v39 = vadd.f32 %v6902_v19, %v6146_v17  ;;  %v1480_v42 = vpop.f32.mrb[9].mxu0  ;;  %v1549_v19 = vrot.slane %v7902_v36, %v7956_v6  ;;  %v1987_v17 = vsub.f32 %v7981_v62, %v1986_v21 }
 0x2d0   :  { %v7920_v44 = vadd.f32 %v6904_v30, %v1480_v42  ;;  %v1553_v30 = vrot.slane %v7912_v55, %v7956_v6  ;;  %v1994_v42 = vsub.f32 %v7983_v12, %v1993_v13 }
 0x2d1   :  { %v1565_v26 = vrot.slane %v7918_v39, %v7956_v6 }
 0x2d2   :  { %v6149_v24 = vpop.f32.mrb[10].mxu0  ;;  %1620 = vrot.lane.b32.xlu1 %v7910_v51, %s7317_s1  ;;  %1622 = vrot.lane.b32.xlu0 %v7920_v44, %s7317_s1 }
 0x2d3   :  { %v7926_v37 = vadd.f32 %v6906_v25, %v6149_v24  ;;  %v1492_v60 = vpop.f32.mrb[11].mxu0 }
 0x2d4   :  { %v7928_v48 = vadd.f32 %v6908_v3, %v1492_v60 }
 0x2d6   :  { %v6152_v63 = vpop.f32.mrb[12].mxu0  ;;  %1624 = vrot.lane.b32.xlu1 %v7918_v39, %s7317_s1  ;;  %1626 = vrot.lane.b32.xlu0 %v7928_v48, %s7317_s1  ;;  %v1569_v27 = vrot.slane %v7928_v48, %v7956_v6 }
 0x2d7   :  { %v7934_v16 = vadd.f32 %v6910_v11, %v6152_v63  ;;  %v1504_v23 = vpop.f32.mrb[13].mxu0  ;;  %v1988_v11 = vand.u32 4294901760, %v1987_v17  ;;  %v1557_v63 = vrot.slane %v7910_v51, %v7956_v6 }
 0x2d8   :  { %v7936_v22 = vadd.f32 %v6912_v58, %v1504_v23  ;;  %v1995_v58 = vand.u32 4294901760, %v1994_v42  ;;  %v1561_v23 = vrot.slane %v7920_v44, %v7956_v6 }
 0x2da   :  { %v6155_v47 = vpop.f32.mrb[14].mxu0  ;;  %1628 = vrot.lane.b32.xlu1 %v7926_v37, %s7317_s1  ;;  %1630 = vrot.lane.b32.xlu0 %v7936_v22, %s7317_s1 }
 0x2db   :  { %v7942_v4 = vadd.f32 %v6914_v33, %v6155_v47  ;;  %v1516_v5 = vpop.f32.mrb[15].mxu0  ;;  %v8005_v33 = vpack.c.bf16 %v1995_v58, %v1988_v11 }
 0x2dc   :  { %v7944_v8 = vadd.f32 %v6916_v59, %v1516_v5 }
 0x2dd   :  { %6651 = vmatprep.subr.bf16.mxu1 %v8005_v33  ;;  %v1589_v17 = vrot.slane %v7942_v4, %v7956_v6 }
 0x2de   :  { %1632 = vrot.lane.b32.xlu1 %v7934_v16, %s7317_s1  ;;  %1634 = vrot.lane.b32.xlu0 %v7944_v8, %s7317_s1 }
 0x2e2   :  { %1636 = vrot.lane.b32.xlu1 %v7942_v4, %s7317_s1 }
 0x333   :  { %v1609_v10 = vpop.permute.xlu1 %1608 }
 0x334   :  { %v1655_v54 = vmul.f32 %v1609_v10, %v1533_v50  ;;  %v1607_v61 = vpop.permute.xlu0 %1606  ;;  %v1573_v10 = vrot.slane %v7926_v37, %v7956_v6 }
 0x335   :  { %v1654_v2 = vmul.f32 %v1607_v61, %v1529_v45  ;;  %v1577_v45 = vrot.slane %v7936_v22, %v7956_v6  ;;  %v8024_v61 = vsub.f32 %v7960_v34, %v1764_v1 }
 0x336   :  { %1692 = vrot.lane.b32.xlu1 %v1655_v54, %s7317_s1  ;;  %v8021_v54 = vsub.f32 %v7958_v15, %v1761_v46  ;;  %v1585_v15 = vrot.slane %v7944_v8, %v7956_v6 }
 0x337   :  { %1690 = vrot.lane.b32.xlu0 %v1654_v2, %s7317_s1 }
 0x338   :  { %v1611_v38 = vpop.permute.xlu1 %1610 }
 0x339   :  { %v1656_v35 = vmul.f32 %v1611_v38, %v1537_v0 }
 0x33b   :  { %1694 = vrot.lane.b32.xlu0 %v1656_v35, %s7317_s1 }
 0x33c   :  { %v1613_v14 = vpop.permute.xlu1 %1612  ;;  %v1615_v49 = vpop.permute.xlu0 %1614 }
 0x33d   :  { %v1657_v41 = vmul.f32 %v1613_v14, %v1541_v18  ;;  %v1658_v52 = vmul.f32 %v1615_v49, %v1545_v53  ;;  %v2000_v18 = vand.u32 4294901760, %v8021_v54  ;;  %v2007_v53 = vand.u32 4294901760, %v8024_v61 }
 0x33e   :  { %v1581_v14 = vrot.slane %v7934_v16, %v7956_v6 }
 0x33f   :  { %1696 = vrot.lane.b32.xlu1 %v1657_v41, %s7317_s1  ;;  %1698 = vrot.lane.b32.xlu0 %v1658_v52, %s7317_s1  ;;  %v2001_v34 = vsub.f32 %v8021_v54, %v2000_v18  ;;  %v2008_v46 = vsub.f32 %v8024_v61, %v2007_v53 }
 0x340   :  { %v1617_v25 = vpop.permute.xlu1 %1616  ;;  %v1619_v3 = vpop.permute.xlu0 %1618 }
 0x341   :  { %v1659_v24 = vmul.f32 %v1617_v25, %v1549_v19  ;;  %v1660_v60 = vmul.f32 %v1619_v3, %v1553_v30  ;;  %v2002_v19 = vand.u32 4294901760, %v2001_v34  ;;  %v2009_v30 = vand.u32 4294901760, %v2008_v46 }
 0x343   :  { %1700 = vrot.lane.b32.xlu1 %v1659_v24, %s7317_s1  ;;  %1702 = vrot.lane.b32.xlu0 %v1660_v60, %s7317_s1  ;;  %v8044_v42 = vpack.c.bf16 %v2009_v30, %v2002_v19  ;;  %v8050_v24 = vpack.c.bf16 %v7983_v12, %v7981_v62  ;;  %v6678_v62 = vpack.c.bf16 %v2007_v53, %v2000_v18 }
 0x344   :  { %v1621_v59 = vpop.permute.xlu1 %1620  ;;  %v1623_v47 = vpop.permute.xlu0 %1622 }
 0x345   :  { %v1661_v5 = vmul.f32 %v1621_v59, %v1557_v63  ;;  %v1662_v9 = vmul.f32 %v1623_v47, %v1561_v23 }
 0x347   :  { %1704 = vrot.lane.b32.xlu1 %v1661_v5, %s7317_s1  ;;  %1706 = vrot.lane.b32.xlu0 %v1662_v9, %s7317_s1 }
 0x348   :  { %v1625_v32 = vpop.permute.xlu1 %1624  ;;  %v1627_v57 = vpop.permute.xlu0 %1626 }
 0x349   :  { %v1663_v29 = vmul.f32 %v1625_v32, %v1565_v26  ;;  %v1664_v50 = vmul.f32 %v1627_v57, %v1569_v27 }
 0x34b   :  { %1708 = vrot.lane.b32.xlu1 %v1663_v29, %s7317_s1  ;;  %1710 = vrot.lane.b32.xlu0 %v1664_v50, %s7317_s1 }
 0x34c   :  { %v1629_v2 = vpop.permute.xlu1 %1628  ;;  %v1631_v0 = vpop.permute.xlu0 %1630 }
 0x34d   :  { %v1665_v38 = vmul.f32 %v1629_v2, %v1573_v10  ;;  %v1666_v35 = vmul.f32 %v1631_v0, %v1577_v45 }
 0x34f   :  { %1712 = vrot.lane.b32.xlu1 %v1665_v38, %s7317_s1  ;;  %1714 = vrot.lane.b32.xlu0 %v1666_v35, %s7317_s1 }
 0x350   :  { %v1633_v1 = vpop.permute.xlu1 %1632  ;;  %v1635_v49 = vpop.permute.xlu0 %1634 }
 0x351   :  { %v1667_v41 = vmul.f32 %v1633_v1, %v1581_v14  ;;  %v1668_v52 = vmul.f32 %v1635_v49, %v1585_v15 }
 0x353   :  { %1716 = vrot.lane.b32.xlu1 %v1667_v41, %s7317_s1  ;;  %1718 = vrot.lane.b32.xlu0 %v1668_v52, %s7317_s1 }
 0x354   :  { %v1637_v25 = vpop.permute.xlu1 %1636 }
 0x355   :  { %v1669_v3 = vmul.f32 %v1637_v25, %v1589_v17 }
 0x357   :  { %1720 = vrot.lane.b32.xlu1 %v1669_v3, %s7317_s1  ;;  %3188 = vrot.lane.b32.xlu0 %v7890_v20, %s7318_s23  ;;  %v8062_v20 = vpack.c.bf16 %v8024_v61, %v8021_v54 }
 0x35b   :  { %3190 = vrot.lane.b32.xlu1 %v7888_v7, %s7318_s23  ;;  %3192 = vrot.lane.b32.xlu0 %v7898_v56, %s7318_s23 }
 0x35f   :  { %3204 = vrot.lane.b32.xlu1 %v7920_v44, %s7318_s23  ;;  %3206 = vrot.lane.b32.xlu0 %v7918_v39, %s7318_s23 }
 0x363   :  { %3194 = vrot.lane.b32.xlu1 %v7896_v31, %s7318_s23  ;;  %3208 = vrot.lane.b32.xlu0 %v7928_v48, %s7318_s23 }
 0x367   :  { %3196 = vrot.lane.b32.xlu1 %v7904_v40, %s7318_s23  ;;  %3210 = vrot.lane.b32.xlu0 %v7926_v37, %s7318_s23 }
 0x36b   :  { %3198 = vrot.lane.b32.xlu1 %v7902_v36, %s7318_s23  ;;  %3212 = vrot.lane.b32.xlu0 %v7936_v22, %s7318_s23 }
 0x36f   :  { %3200 = vrot.lane.b32.xlu1 %v7912_v55, %s7318_s23  ;;  %3214 = vrot.lane.b32.xlu0 %v7934_v16, %s7318_s23 }
 0x373   :  { %3202 = vrot.lane.b32.xlu1 %v7910_v51, %s7318_s23  ;;  %3216 = vrot.lane.b32.xlu0 %v7944_v8, %s7318_s23 }
 0x377   :  { %3218 = vrot.lane.b32.xlu1 %v7942_v4, %s7318_s23 }
 0x3a8   :  { %v1693_v7 = vpop.permute.xlu1 %1692 }
 0x3a9   :  { %v1724_v31 = vsel %vm90_vm0, %v1693_v7, 0  ;;  %v1691_v56 = vpop.permute.xlu0 %1690 }
 0x3aa   :  { %v8072_v40 = vand.u32 4294901760, %v1724_v31  ;;  %v1722_v36 = vsel %vm90_vm0, %v1691_v56, 0 }
 0x3ab   :  { %v8075_v39 = vand.u32 4294901760, %v1722_v36 }
 0x3ac   :  { %v8078_v55 = vsub.f32 %v1724_v31, %v8072_v40 }
 0x3ad   :  { %v8081_v44 = vsub.f32 %v1722_v36, %v8075_v39  ;;  %v1695_v51 = vpop.permute.xlu0 %1694 }
 0x3ae   :  { %v1835_v37 = vand.u32 4294901760, %v8078_v55  ;;  %v1726_v48 = vsel %vm90_vm0, %v1695_v51, 0 }
 0x3af   :  { %v1825_v16 = vand.u32 4294901760, %v8081_v44  ;;  %v8086_v22 = vand.u32 4294901760, %v1726_v48 }
 0x3b0   :  { %v1836_v4 = vsub.f32 %v8078_v55, %v1835_v37 }
 0x3b1   :  { %v8092_v8 = vsub.f32 %v1726_v48, %v8086_v22  ;;  %v1697_v6 = vpop.permute.xlu1 %1696  ;;  %v1699_v60 = vpop.permute.xlu0 %1698  ;;  %v1826_v11 = vsub.f32 %v8081_v44, %v1825_v16 }
 0x3b2   :  { %v1728_v58 = vsel %vm90_vm0, %v1697_v6, 0  ;;  %v1730_v63 = vsel %vm90_vm0, %v1699_v60, 0  ;;  %v1837_v9 = vand.u32 4294901760, %v1836_v4 }
 0x3b3   :  { %v1845_v23 = vand.u32 4294901760, %v8092_v8  ;;  %v8100_v59 = vand.u32 4294901760, %v1728_v58  ;;  %v8102_v47 = vand.u32 4294901760, %v1730_v63  ;;  %v1827_v5 = vand.u32 4294901760, %v1826_v11 }
 0x3b5   :  { %v8105_v26 = vsub.f32 %v1728_v58, %v8100_v59  ;;  %v8108_v27 = vsub.f32 %v1730_v63, %v8102_v47  ;;  %v1701_v32 = vpop.permute.xlu1 %1700  ;;  %6164 = vmatprep.mubr.f32.mxu1 %v1827_v5  ;;  %v1703_v57 = vpop.permute.xlu0 %1702  ;;  %v1846_v29 = vsub.f32 %v8092_v8, %v1845_v23 }
 0x3b6   :  { %v1732_v50 = vsel %vm90_vm0, %v1701_v32, 0  ;;  %v1734_v10 = vsel %vm90_vm0, %v1703_v57, 0  ;;  %6165 = vmatmul.mubr.f32.vlgmr.msra.gmra.mrb[16].mxu1 %v1837_v9 }
 0x3b7   :  { %v1855_v45 = vand.u32 4294901760, %v8105_v26  ;;  %v1865_v2 = vand.u32 4294901760, %v8108_v27  ;;  %v8117_v0 = vand.u32 4294901760, %v1732_v50  ;;  %v8119_v38 = vand.u32 4294901760, %v1734_v10  ;;  %6653 = vmatpush3.bf16.msra.mxu1 %v8005_v33 }
 0x3b8   :  { %v1847_v35 = vand.u32 4294901760, %v1846_v29  ;;  %6655 = vmatprep.subr.bf16.mxu1 %v8044_v42 }
 0x3b9   :  { %v8124_v14 = vsub.f32 %v1732_v50, %v8117_v0  ;;  %v8127_v15 = vsub.f32 %v1734_v10, %v8119_v38  ;;  %v1705_v34 = vpop.permute.xlu1 %1704  ;;  %v1707_v46 = vpop.permute.xlu0 %1706  ;;  %v1856_v1 = vsub.f32 %v8105_v26, %v1855_v45  ;;  %v1866_v49 = vsub.f32 %v8108_v27, %v1865_v2 }
 0x3ba   :  { %v1736_v33 = vsel %vm90_vm0, %v1705_v34, 0  ;;  %6167 = vmatprep.mubr.f32.mxu1 %v1847_v35  ;;  %v1738_v41 = vsel %vm90_vm0, %v1707_v46, 0 }
 0x3bb   :  { %v1875_v52 = vand.u32 4294901760, %v8124_v14  ;;  %v1885_v19 = vand.u32 4294901760, %v8127_v15  ;;  %v8139_v30 = vand.u32 4294901760, %v1736_v33  ;;  %v8141_v17 = vand.u32 4294901760, %v1738_v41  ;;  %6657 = vmatpush3.bf16.msra.mxu1 %v8044_v42 }
 0x3bc   :  { %v1857_v25 = vand.u32 4294901760, %v1856_v1  ;;  %v1867_v3 = vand.u32 4294901760, %v1866_v49  ;;  %6659 = vmatprep.subr.bf16.mxu1 %v8050_v24 }
 0x3bd   :  { %v8146_v7 = vsub.f32 %v1736_v33, %v8139_v30  ;;  %v8149_v31 = vsub.f32 %v1738_v41, %v8141_v17  ;;  %v1709_v56 = vpop.permute.xlu1 %1708  ;;  %v1711_v36 = vpop.permute.xlu0 %1710  ;;  %v1876_v51 = vsub.f32 %v8124_v14, %v1875_v52  ;;  %v1886_v42 = vsub.f32 %v8127_v15, %v1885_v19 }
 0x3be   :  { %v1740_v48 = vsel %vm90_vm0, %v1709_v56, 0  ;;  %6168 = vmatmul.mubr.f32.gmra.mrb[18].mxu1 %v1857_v25  ;;  %v1742_v4 = vsel %vm90_vm0, %v1711_v36, 0 }
 0x3bf   :  { %v9130_v6 = vand.u32 4294901760, %v8146_v7  ;;  %v9127_v60 = vand.u32 4294901760, %v8149_v31  ;;  %v8161_v11 = vand.u32 4294901760, %v1740_v48  ;;  %v8163_v58 = vand.u32 4294901760, %v1742_v4  ;;  %6170 = vmatprep.mubr.f32.mxu1 %v1867_v3 }
 0x3c0   :  { %v1877_v63 = vand.u32 4294901760, %v1876_v51  ;;  %v1887_v5 = vand.u32 4294901760, %v1886_v42  ;;  %v9133_v12 = vand.u32 4294901760, %v8146_v7 }
 0x3c1   :  { %v8166_v9 = vsub.f32 %v1740_v48, %v8161_v11  ;;  %v8169_v32 = vsub.f32 %v1742_v4, %v8163_v58  ;;  %v1713_v57 = vpop.permute.xlu1 %1712  ;;  %v1715_v29 = vpop.permute.xlu0 %1714  ;;  %v1896_v50 = vsub.f32 %v8146_v7, %v9130_v6  ;;  %v1906_v10 = vsub.f32 %v8149_v31, %v9127_v60 }
 0x3c2   :  { %v1744_v35 = vsel %vm90_vm0, %v1713_v57, 0  ;;  %6171 = vmatmul.mubr.f32.gmra.mrb[20].mxu1 %v1877_v63  ;;  %v1746_v34 = vsel %vm90_vm0, %v1715_v29, 0 }
 0x3c3   :  { %v9126_v46 = vand.u32 4294901760, %v8166_v9  ;;  %v9125_v1 = vand.u32 4294901760, %v8169_v32  ;;  %v8181_v49 = vand.u32 4294901760, %v1744_v35  ;;  %v8183_v33 = vand.u32 4294901760, %v1746_v34  ;;  %6173 = vmatprep.mubr.f32.mxu1 %v1887_v5 }
 0x3c4   :  { %v1897_v41 = vand.u32 4294901760, %v1896_v50  ;;  %v1907_v25 = vand.u32 4294901760, %v1906_v10  ;;  %v9136_v54 = vand.u32 4294901760, %v8169_v32 }
 0x3c5   :  { %v8186_v3 = vsub.f32 %v1744_v35, %v8181_v49  ;;  %v8189_v56 = vsub.f32 %v1746_v34, %v8183_v33  ;;  %v1717_v36 = vpop.permute.xlu1 %1716  ;;  %v1719_v51 = vpop.permute.xlu0 %1718  ;;  %v1916_v42 = vsub.f32 %v8166_v9, %v9126_v46  ;;  %v1926_v48 = vsub.f32 %v8169_v32, %v9125_v1 }
 0x3c6   :  { %v1748_v4 = vsel %vm90_vm0, %v1717_v36, 0  ;;  %6174 = vmatmul.mubr.f32.gmra.mrb[22].mxu1 %v1897_v41  ;;  %v1750_v63 = vsel %vm90_vm0, %v1719_v51, 0 }
 0x3c7   :  { %v9128_v5 = vand.u32 4294901760, %v8186_v3  ;;  %v9129_v57 = vand.u32 4294901760, %v8189_v56  ;;  %v8201_v29 = vand.u32 4294901760, %v1748_v4  ;;  %v8203_v50 = vand.u32 4294901760, %v1750_v63  ;;  %6176 = vmatprep.mubr.f32.mxu1 %v1907_v25 }
 0x3c8   :  { %v1917_v10 = vand.u32 4294901760, %v1916_v42  ;;  %v1927_v35 = vand.u32 4294901760, %v1926_v48  ;;  %v9137_v61 = vand.u32 4294901760, %v8186_v3  ;;  %v9138_v18 = vand.u32 4294901760, %v8189_v56 }
 0x3c9   :  { %v8206_v34 = vsub.f32 %v1748_v4, %v8201_v29  ;;  %v8209_v1 = vsub.f32 %v1750_v63, %v8203_v50  ;;  %v1721_v41 = vpop.permute.xlu1 %1720  ;;  %v1936_v36 = vsub.f32 %v8186_v3, %v9128_v5  ;;  %v1946_v51 = vsub.f32 %v8189_v56, %v9129_v57 }
 0x3ca   :  { %v1752_v46 = vsel %vm90_vm0, %v1721_v41, 0  ;;  %6177 = vmatmul.mubr.f32.gmra.mrb[24].mxu1 %v1917_v10 }
 0x3cb   :  { %v1955_v25 = vand.u32 4294901760, %v8206_v34  ;;  %v1965_v42 = vand.u32 4294901760, %v8209_v1  ;;  %v8220_v48 = vand.u32 4294901760, %v1752_v46  ;;  %6179 = vmatprep.mubr.f32.mxu1 %v1927_v35  ;;  %v1937_v4 = vand.u32 4294901760, %v1936_v36 }
 0x3cc   :  { %v1947_v63 = vand.u32 4294901760, %v1946_v51 }
 0x3cd   :  { %v8223_v60 = vsub.f32 %v1752_v46, %v8220_v48  ;;  %v1956_v5 = vsub.f32 %v8206_v34, %v1955_v25  ;;  %v1966_v10 = vsub.f32 %v8209_v1, %v1965_v42 }
 0x3ce   :  { %6180 = vmatmul.mubr.f32.gmra.mrb[26].mxu1 %v1937_v4 }
 0x3cf   :  { %v1975_v41 = vand.u32 4294901760, %v8223_v60  ;;  %6182 = vmatprep.mubr.f32.mxu1 %v1947_v63  ;;  %v1957_v57 = vand.u32 4294901760, %v1956_v5  ;;  %v1967_v6 = vand.u32 4294901760, %v1966_v10 }
 0x3d1   :  { %v1976_v35 = vsub.f32 %v8223_v60, %v1975_v41 }
 0x3d2   :  { %6183 = vmatmul.mubr.f32.gmra.mrb[28].mxu1 %v1957_v57 }
 0x3d3   :  { %6185 = vmatprep.mubr.f32.mxu1 %v1967_v6  ;;  %v1977_v46 = vand.u32 4294901760, %v1976_v35 }
 0x3d6   :  { %6186 = vmatmul.mubr.f32.gmra.mrb[30].mxu1 %v1977_v46 }
 0x3d7   :  { %6196 = vmatprep.mubr.f32.mxu1 %v8075_v39 }
 0x3da   :  { %6197 = vmatmul.mubr.f32.vlgmr.msra.gmra.mrb[16].mxu1 %v8072_v40 }
 0x3db   :  { %6661 = vmatpush3.bf16.msra.mxu1 %v8050_v24  ;;  %6199 = vmatprep.mubr.f32.mxu1 %v8086_v22  ;;  %v6674_v24 = vpack.c.bf16 %v1993_v13, %v1986_v21  ;;  %v9134_v21 = vand.u32 4294901760, %v8149_v31  ;;  %v9135_v13 = vand.u32 4294901760, %v8166_v9 }
 0x3dc   :  { %6663 = vmatprep.subr.bf16.mxu1 %v8062_v20 }
 0x3de   :  { %6200 = vmatmul.mubr.f32.gmra.mrb[18].mxu1 %v8100_v59 }
 0x3df   :  { %6202 = vmatprep.mubr.f32.mxu1 %v8102_v47  ;;  %6665 = vmatpush3.bf16.msra.mxu1 %v8062_v20 }
 0x3e0   :  { %6667 = vmatprep.subr.bf16.mxu1 %v7952_v43 }
 0x3e2   :  { %6203 = vmatmul.mubr.f32.gmra.mrb[20].mxu1 %v8117_v0 }
 0x3e3   :  { %6205 = vmatprep.mubr.f32.mxu1 %v8119_v38 }
 0x3e6   :  { %6206 = vmatmul.mubr.f32.gmra.mrb[22].mxu1 %v8139_v30 }
 0x3e7   :  { %6208 = vmatprep.mubr.f32.mxu1 %v8141_v17 }
 0x3ea   :  { %6209 = vmatmul.mubr.f32.gmra.mrb[24].mxu1 %v8161_v11 }
 0x3eb   :  { %6211 = vmatprep.mubr.f32.mxu1 %v8163_v58 }
 0x3ee   :  { %6212 = vmatmul.mubr.f32.gmra.mrb[26].mxu1 %v8181_v49 }
 0x3ef   :  { %6214 = vmatprep.mubr.f32.mxu1 %v8183_v33 }
 0x3f2   :  { %6215 = vmatmul.mubr.f32.gmra.mrb[28].mxu1 %v8201_v29 }
 0x3f3   :  { %6217 = vmatprep.mubr.f32.mxu1 %v8203_v50 }
 0x3f6   :  { %6218 = vmatmul.mubr.f32.gmra.mrb[30].mxu1 %v8220_v48 }
 0x3f7   :  { %6228 = vmatprep.mubr.f32.mxu1 %v8081_v44 }
 0x3fa   :  { %6229 = vmatmul.mubr.f32.vlgmr.msra.gmra.mrb[16].mxu1 %v8078_v55 }
 0x3fb   :  { %6669 = vmatpush3.bf16.msra.mxu1 %v7952_v43  ;;  %6231 = vmatprep.mubr.f32.mxu1 %v8092_v8 }
 0x3fc   :  { %6671 = vmatprep.subr.bf16.mxu1 %v7968_v28 }
 0x3fe   :  { %6232 = vmatmul.mubr.f32.gmra.mrb[18].mxu1 %v8105_v26 }
 0x3ff   :  { %6234 = vmatprep.mubr.f32.mxu1 %v8108_v27  ;;  %6673 = vmatpush3.bf16.msra.mxu1 %v7968_v28 }
 0x400   :  { %6675 = vmatprep.subr.bf16.mxu1 %v6674_v24 }
 0x402   :  { %6235 = vmatmul.mubr.f32.gmra.mrb[20].mxu1 %v8124_v14 }
 0x403   :  { %6237 = vmatprep.mubr.f32.mxu1 %v8127_v15 }
 0x406   :  { %6238 = vmatmul.mubr.f32.gmra.mrb[22].mxu1 %v8146_v7 }
 0x407   :  { %6240 = vmatprep.mubr.f32.mxu1 %v8149_v31 }
 0x40a   :  { %6241 = vmatmul.mubr.f32.gmra.mrb[24].mxu1 %v8166_v9 }
 0x40b   :  { %6243 = vmatprep.mubr.f32.mxu1 %v8169_v32 }
 0x40e   :  { %6244 = vmatmul.mubr.f32.gmra.mrb[26].mxu1 %v8186_v3 }
 0x40f   :  { %6246 = vmatprep.mubr.f32.mxu1 %v8189_v56 }
 0x412   :  { %6247 = vmatmul.mubr.f32.gmra.mrb[28].mxu1 %v8206_v34 }
 0x413   :  { %6249 = vmatprep.mubr.f32.mxu1 %v8209_v1 }
 0x416   :  { %6250 = vmatmul.mubr.f32.gmra.mrb[30].mxu1 %v8223_v60 }
 0x417   :  { %6260 = vmatprep.mubr.f32.mxu1 %v1825_v16 }
 0x41a   :  { %6261 = vmatmul.mubr.f32.vlgmr.msra.gmra.mrb[16].mxu1 %v1835_v37 }
 0x41b   :  { %6677 = vmatpush3.bf16.msra.mxu1 %v6674_v24  ;;  %6263 = vmatprep.mubr.f32.mxu1 %v1845_v23 }
 0x41c   :  { %6679 = vmatprep.subr.bf16.mxu1 %v6678_v62 }
 0x41e   :  { %6264 = vmatmul.mubr.f32.gmra.mrb[18].mxu1 %v1855_v45 }
 0x41f   :  { %6266 = vmatprep.mubr.f32.mxu1 %v1865_v2  ;;  %6681 = vmatpush3.bf16.msra.mxu1 %v6678_v62 }
 0x420   :  { %6683 = vmatprep.subr.bf16.mxu1 %v7952_v43 }
 0x422   :  { %6267 = vmatmul.mubr.f32.gmra.mrb[20].mxu1 %v1875_v52 }
 0x423   :  { %6269 = vmatprep.mubr.f32.mxu1 %v1885_v19 }
 0x426   :  { %6270 = vmatmul.mubr.f32.gmra.mrb[22].mxu1 %v9133_v12 }
 0x427   :  { %6272 = vmatprep.mubr.f32.mxu1 %v9134_v21 }
 0x42a   :  { %6273 = vmatmul.mubr.f32.gmra.mrb[24].mxu1 %v9135_v13 }
 0x42b   :  { %6275 = vmatprep.mubr.f32.mxu1 %v9136_v54 }
 0x42e   :  { %6276 = vmatmul.mubr.f32.gmra.mrb[26].mxu1 %v9137_v61 }
 0x42f   :  { %6278 = vmatprep.mubr.f32.mxu1 %v9138_v18 }
 0x432   :  { %6279 = vmatmul.mubr.f32.gmra.mrb[28].mxu1 %v1955_v25 }
 0x433   :  { %6281 = vmatprep.mubr.f32.mxu1 %v1965_v42 }
 0x436   :  { %6282 = vmatmul.mubr.f32.gmra.mrb[30].mxu1 %v1975_v41 }
 0x437   :  { %6292 = vmatprep.mubr.f32.mxu1 %v8075_v39 }
 0x43a   :  { %6293 = vmatmul.mubr.f32.vlgmr.msra.gmra.mrb[16].mxu1 %v8072_v40 }
 0x43b   :  { %6685 = vmatpush3.bf16.msra.mxu1 %v7952_v43  ;;  %6295 = vmatprep.mubr.f32.mxu1 %v8086_v22 }
 0x43c   :  { %6687 = vmatprep.subr.bf16.mxu1 %v7968_v28 }
 0x43e   :  { %6296 = vmatmul.mubr.f32.gmra.mrb[18].mxu1 %v8100_v59 }
 0x43f   :  { %6298 = vmatprep.mubr.f32.mxu1 %v8102_v47  ;;  %6689 = vmatpush3.bf16.msra.mxu1 %v7968_v28 }
 0x442   :  { %6299 = vmatmul.mubr.f32.gmra.mrb[20].mxu1 %v8117_v0 }
 0x443   :  { %6301 = vmatprep.mubr.f32.mxu1 %v8119_v38 }
 0x446   :  { %6302 = vmatmul.mubr.f32.gmra.mrb[22].mxu1 %v8139_v30 }
 0x447   :  { %6304 = vmatprep.mubr.f32.mxu1 %v8141_v17 }
 0x44a   :  { %6305 = vmatmul.mubr.f32.gmra.mrb[24].mxu1 %v8161_v11 }
 0x44b   :  { %6307 = vmatprep.mubr.f32.mxu1 %v8163_v58 }
 0x44e   :  { %6308 = vmatmul.mubr.f32.gmra.mrb[26].mxu1 %v8181_v49 }
 0x44f   :  { %6310 = vmatprep.mubr.f32.mxu1 %v8183_v33 }
 0x452   :  { %6311 = vmatmul.mubr.f32.gmra.mrb[28].mxu1 %v8201_v29 }
 0x453   :  { %6313 = vmatprep.mubr.f32.mxu1 %v8203_v50 }
 0x456   :  { %6314 = vmatmul.mubr.f32.gmra.mrb[30].mxu1 %v8220_v48 }
 0x457   :  { %6324 = vmatprep.mubr.f32.mxu1 %v8075_v39 }
 0x45a   :  { %6325 = vmatmul.mubr.f32.vlgmr.msra.gmra.mrb[16].mxu1 %v8072_v40 }
 0x45b   :  { %6327 = vmatprep.mubr.f32.mxu1 %v8086_v22 }
 0x45e   :  { %6328 = vmatmul.mubr.f32.gmra.mrb[18].mxu1 %v8100_v59 }
 0x45f   :  { %6330 = vmatprep.mubr.f32.mxu1 %v8102_v47 }
 0x462   :  { %6331 = vmatmul.mubr.f32.gmra.mrb[20].mxu1 %v8117_v0 }
 0x463   :  { %6333 = vmatprep.mubr.f32.mxu1 %v8119_v38 }
 0x466   :  { %6334 = vmatmul.mubr.f32.gmra.mrb[22].mxu1 %v8139_v30 }
 0x467   :  { %6336 = vmatprep.mubr.f32.mxu1 %v8141_v17 }
 0x46a   :  { %6337 = vmatmul.mubr.f32.gmra.mrb[24].mxu1 %v8161_v11 }
 0x46b   :  { %6339 = vmatprep.mubr.f32.mxu1 %v8163_v58 }
 0x46e   :  { %6340 = vmatmul.mubr.f32.gmra.mrb[26].mxu1 %v8181_v49 }
 0x46f   :  { %6342 = vmatprep.mubr.f32.mxu1 %v8183_v33 }
 0x472   :  { %6343 = vmatmul.mubr.f32.gmra.mrb[28].mxu1 %v8201_v29 }
 0x473   :  { %6345 = vmatprep.mubr.f32.mxu1 %v8203_v50 }
 0x476   :  { %6346 = vmatmul.mubr.f32.gmra.mrb[30].mxu1 %v8220_v48 }
 0x52d   :  { %v6326_v43 = vpop.f32.mrb[16].mxu1 }
 0x52e   :  { %v2891_v28 = vsel %vm90_vm0, %v6326_v43, -inf  ;;  %v2790_v53 = vpop.f32.mrb[17].mxu1 }
 0x52f   :  { %v2892_v20 = vrot.slane %v2891_v28, 4  ;;  %v2884_v40 = vsel %vm90_vm0, %v2790_v53, -inf }
 0x530   :  { %v2885_v39 = vrot.slane %v2884_v40, 4 }
 0x531   :  { %v2893_v55 = vmax.f32 %v2891_v28, %v2892_v20  ;;  %v6329_v44 = vpop.f32.mrb[18].mxu1 }
 0x532   :  { %v2886_v37 = vmax.f32 %v2884_v40, %v2885_v39  ;;  %v2905_v16 = vsel %vm90_vm0, %v6329_v44, -inf  ;;  %v2802_v22 = vpop.f32.mrb[19].mxu1 }
 0x533   :  { %v2894_v8 = vrot.slane %v2893_v55, 2  ;;  %v2906_v23 = vrot.slane %v2905_v16, 4  ;;  %v2898_v59 = vsel %vm90_vm0, %v2802_v22, -inf }
 0x534   :  { %v2887_v47 = vrot.slane %v2886_v37, 2  ;;  %v2899_v26 = vrot.slane %v2898_v59, 4 }
 0x535   :  { %v2895_v27 = vmax.f32 %v2893_v55, %v2894_v8  ;;  %v2907_v45 = vmax.f32 %v2905_v16, %v2906_v23  ;;  %v8354_v2 = vpop.f32.mrb[20].mxu1 }
 0x536   :  { %v2888_v0 = vmax.f32 %v2886_v37, %v2887_v47  ;;  %v2900_v38 = vmax.f32 %v2898_v59, %v2899_v26  ;;  %v2919_v14 = vsel %vm90_vm0, %v8354_v2, -inf  ;;  %v8358_v15 = vpop.f32.mrb[21].mxu1 }
 0x537   :  { %v2896_v52 = vrot.slane %v2895_v27, 1  ;;  %v2908_v19 = vrot.slane %v2907_v45, 2  ;;  %v2920_v30 = vrot.slane %v2919_v14, 4  ;;  %v2912_v17 = vsel %vm90_vm0, %v8358_v15, -inf }
 0x538   :  { %v2889_v7 = vrot.slane %v2888_v0, 1  ;;  %v2901_v31 = vrot.slane %v2900_v38, 2  ;;  %v2913_v6 = vrot.slane %v2912_v17, 4 }
 0x539   :  { %v2897_v60 = vmax.f32 %v2895_v27, %v2896_v52  ;;  %v2909_v11 = vmax.f32 %v2907_v45, %v2908_v19  ;;  %v2921_v58 = vmax.f32 %v2919_v14, %v2920_v30  ;;  %v8362_v9 = vpop.f32.mrb[22].mxu1 }
 0x53a   :  { %v2890_v32 = vmax.f32 %v2888_v0, %v2889_v7  ;;  %v2902_v1 = vmax.f32 %v2900_v38, %v2901_v31  ;;  %v2914_v49 = vmax.f32 %v2912_v17, %v2913_v6  ;;  %v2933_v33 = vsel %vm90_vm0, %v8362_v9, -inf  ;;  %v8366_v3 = vpop.f32.mrb[23].mxu1 }
 0x53b   :  { %v2997_v56 = vsub.f32 %v6326_v43, %v2897_v60  ;;  %v2910_v5 = vrot.slane %v2909_v11, 1  ;;  %v2922_v57 = vrot.slane %v2921_v58, 2  ;;  %v2934_v29 = vrot.slane %v2933_v33, 4 }
 0x53c   :  { %v2996_v50 = vsub.f32 %v2790_v53, %v2890_v32  ;;  %v2903_v34 = vrot.slane %v2902_v1, 1  ;;  %v2915_v36 = vrot.slane %v2914_v49, 2  ;;  %v2926_v51 = vsel %vm90_vm0, %v8366_v3, -inf }
 0x53d   :  { %v3014_v25 = vmul.f32 1.442695, %v2997_v56  ;;  %v2911_v42 = vmax.f32 %v2909_v11, %v2910_v5  ;;  %v2923_v48 = vmax.f32 %v2921_v58, %v2922_v57  ;;  %v2935_v4 = vmax.f32 %v2933_v33, %v2934_v29  ;;  %v8370_v63 = vpop.f32.mrb[24].mxu1 }
 0x53e   :  { %v3012_v10 = vmul.f32 1.442695, %v2996_v50  ;;  %v2904_v41 = vmax.f32 %v2902_v1, %v2903_v34  ;;  %v2916_v35 = vmax.f32 %v2914_v49, %v2915_v36  ;;  %v2927_v46 = vrot.slane %v2926_v51, 4  ;;  %v8372_v24 = vpop.f32.mrb[25].mxu1  ;;  %v8408_v34 = vpop.permute.xlu1 %3190 }
 0x53f   :  { %7134 = vpow2.f32 %v3014_v25  ;;  %v2999_v62 = vsub.f32 %v6329_v44, %v2911_v42  ;;  %v2924_v12 = vrot.slane %v2923_v48, 1  ;;  %v2936_v21 = vrot.slane %v2935_v4, 2 }
 0x540   :  { %7136 = vpow2.f32 %v3012_v10  ;;  %v2998_v13 = vsub.f32 %v2802_v22, %v2904_v41  ;;  %v2917_v54 = vrot.slane %v2916_v35, 1  ;;  %v2928_v61 = vmax.f32 %v2926_v51, %v2927_v46 }
 0x541   :  { %v3018_v18 = vmul.f32 1.442695, %v2999_v62  ;;  %v2925_v43 = vmax.f32 %v2923_v48, %v2924_v12  ;;  %v2937_v28 = vmax.f32 %v2935_v4, %v2936_v21  ;;  %v2947_v53 = vsel %vm90_vm0, %v8370_v63, -inf  ;;  %v8376_v20 = vpop.f32.mrb[26].mxu1 }
 0x542   :  { %v3016_v40 = vmul.f32 1.442695, %v2998_v13  ;;  %v2918_v39 = vmax.f32 %v2916_v35, %v2917_v54  ;;  %v2929_v55 = vrot.slane %v2928_v61, 2  ;;  %v2948_v37 = vrot.slane %v2947_v53, 4  ;;  %v8378_v16 = vpop.f32.mrb[27].mxu1 }
 0x543   :  { %7138 = vpow2.f32 %v3018_v18  ;;  %v3001_v44 = vsub.f32 %v8354_v2, %v2925_v43  ;;  %v2938_v22 = vrot.slane %v2937_v28, 1  ;;  %v2940_v8 = vsel %vm90_vm0, %v8372_v24, -inf }
 0x544   :  { %7140 = vpow2.f32 %v3016_v40  ;;  %v3000_v23 = vsub.f32 %v8358_v15, %v2918_v39  ;;  %v2930_v59 = vmax.f32 %v2928_v61, %v2929_v55  ;;  %v2949_v47 = vmax.f32 %v2947_v53, %v2948_v37 }
 0x545   :  { %v3022_v26 = vmul.f32 1.442695, %v3001_v44  ;;  %v2939_v27 = vmax.f32 %v2937_v28, %v2938_v22  ;;  %v2941_v45 = vrot.slane %v2940_v8, 4  ;;  %v2961_v0 = vsel %vm90_vm0, %v8376_v20, -inf  ;;  %v8386_v38 = vpop.f32.mrb[28].mxu1  ;;  %v8426_v44 = vpop.permute.xlu1 %3204 }
 0x546   :  { %v3020_v14 = vmul.f32 1.442695, %v3000_v23  ;;  %v2931_v52 = vrot.slane %v2930_v59, 1  ;;  %v2950_v2 = vrot.slane %v2949_v47, 2  ;;  %v2962_v19 = vrot.slane %v2961_v0, 4  ;;  %v8388_v30 = vpop.f32.mrb[29].mxu1 }
 0x547   :  { %7142 = vpow2.f32 %v3022_v26  ;;  %v3003_v17 = vsub.f32 %v8362_v9, %v2939_v27  ;;  %v2942_v15 = vmax.f32 %v2940_v8, %v2941_v45  ;;  %v2954_v7 = vsel %vm90_vm0, %v8378_v16, -inf }
 0x548   :  { %7144 = vpow2.f32 %v3020_v14  ;;  %v2932_v31 = vmax.f32 %v2930_v59, %v2931_v52  ;;  %v2951_v6 = vmax.f32 %v2949_v47, %v2950_v2  ;;  %v2963_v60 = vmax.f32 %v2961_v0, %v2962_v19 }
 0x549   :  { %v8393_v11 = vpop.eup %7134  ;;  %v3026_v58 = vmul.f32 1.442695, %v3003_v17  ;;  %v2943_v32 = vrot.slane %v2942_v15, 2  ;;  %v2955_v1 = vrot.slane %v2954_v7, 4  ;;  %v8397_v49 = vsel %vm90_vm0, %v8386_v38, -inf  ;;  %v8399_v33 = vpop.f32.mrb[30].mxu1 }
 0x54a   :  { %v8401_v9 = vpop.eup %7136  ;;  %v3051_v56 = vsel %vm90_vm0, %v8393_v11, 0.0  ;;  %v3002_v5 = vsub.f32 %v8366_v3, %v2932_v31  ;;  %v2952_v57 = vrot.slane %v2951_v6, 1  ;;  %v2964_v29 = vrot.slane %v2963_v60, 2  ;;  %v8406_v50 = vpop.f32.mrb[31].mxu1 }
 0x54b   :  { %v3052_v36 = vrot.slane %v3051_v56, 4  ;;  %v3044_v51 = vsel %vm90_vm0, %v8401_v9, 0.0  ;;  %7146 = vpow2.f32 %v3026_v58  ;;  %v2944_v25 = vmax.f32 %v2942_v15, %v2943_v32 }
 0x54c   :  { %v3045_v42 = vrot.slane %v3044_v51, 4  ;;  %v3024_v48 = vmul.f32 1.442695, %v3002_v5  ;;  %v2953_v4 = vmax.f32 %v2951_v6, %v2952_v57  ;;  %v2965_v10 = vmax.f32 %v2963_v60, %v2964_v29  ;;  %v8440_v5 = vpop.permute.xlu1 %3194 }
 0x54d   :  { %v8412_v41 = vpop.eup %7138  ;;  %v3053_v35 = vadd.f32 %v3052_v36, %v3051_v56  ;;  %v2945_v3 = vrot.slane %v2944_v25, 1  ;;  %v8414_v46 = vmax.f32 %v2954_v7, %v2955_v1  ;;  %v2976_v62 = vrot.slane %v8397_v49, 4 }
 0x54e   :  { %v8417_v12 = vpop.eup %7140  ;;  %v3046_v21 = vadd.f32 %v3045_v42, %v3044_v51  ;;  %v3065_v13 = vsel %vm90_vm0, %v8412_v41, 0.0  ;;  %7148 = vpow2.f32 %v3024_v48  ;;  %v3005_v54 = vsub.f32 %v8370_v63, %v2953_v4 }
 0x54f   :  { %v3054_v61 = vrot.slane %v3053_v35, 2  ;;  %v3066_v18 = vrot.slane %v3065_v13, 4  ;;  %v3058_v43 = vsel %vm90_vm0, %v8417_v12, 0.0  ;;  %v2946_v28 = vmax.f32 %v2944_v25, %v2945_v3 }
 0x550   :  { %v3047_v53 = vrot.slane %v3046_v21, 2  ;;  %v3059_v40 = vrot.slane %v3058_v43, 4  ;;  %v3030_v39 = vmul.f32 1.442695, %v3005_v54  ;;  %v2966_v55 = vrot.slane %v2965_v10, 1 }
 0x551   :  { %v8424_v37 = vpop.eup %7142  ;;  %v3055_v22 = vadd.f32 %v3054_v61, %v3053_v35  ;;  %v3067_v8 = vadd.f32 %v3066_v18, %v3065_v13  ;;  %v3004_v23 = vsub.f32 %v8372_v24, %v2946_v28  ;;  %v2957_v63 = vrot.slane %v8414_v46, 2 }
 0x552   :  { %v8430_v59 = vpop.eup %7144  ;;  %v3048_v47 = vadd.f32 %v3047_v53, %v3046_v21  ;;  %v3060_v26 = vadd.f32 %v3059_v40, %v3058_v43  ;;  %v3079_v27 = vsel %vm90_vm0, %v8424_v37, 0.0  ;;  %7150 = vpow2.f32 %v3030_v39  ;;  %v8450_v39 = vpop.permute.xlu1 %3196 }
 0x553   :  { %v3056_v45 = vrot.slane %v3055_v22, 1  ;;  %v3068_v0 = vrot.slane %v3067_v8, 2  ;;  %v3080_v14 = vrot.slane %v3079_v27, 4  ;;  %v3072_v52 = vsel %vm90_vm0, %v8430_v59, 0.0 }
 0x554   :  { %v3049_v2 = vrot.slane %v3048_v47, 1  ;;  %v3061_v19 = vrot.slane %v3060_v26, 2  ;;  %v3073_v17 = vrot.slane %v3072_v52, 4  ;;  %v3028_v24 = vmul.f32 1.442695, %v3004_v23 }
 0x555   :  { %v8436_v15 = vpop.eup %7146  ;;  %v3057_v7 = vadd.f32 %v3056_v45, %v3055_v22  ;;  %v3069_v31 = vadd.f32 %v3068_v0, %v3067_v8  ;;  %v3081_v6 = vadd.f32 %v3080_v14, %v3079_v27  ;;  %v2967_v60 = vmax.f32 %v2965_v10, %v2966_v55 }
 0x556   :  { %v3050_v58 = vadd.f32 %v3049_v2, %v3048_v47  ;;  %v3062_v32 = vadd.f32 %v3061_v19, %v3060_v26  ;;  %v3074_v1 = vadd.f32 %v3073_v17, %v3072_v52  ;;  %v3093_v56 = vsel %vm90_vm0, %v8436_v15, 0.0 }
 0x557   :  { %7152 = vrcp.f32 %v3057_v7  ;;  %v3070_v57 = vrot.slane %v3069_v31, 1  ;;  %v3082_v29 = vrot.slane %v3081_v6, 2  ;;  %v3094_v36 = vrot.slane %v3093_v56, 4 }
 0x558   :  { %v8442_v51 = vpop.eup %7148  ;;  %7154 = vrcp.f32 %v3050_v58  ;;  %v3063_v25 = vrot.slane %v3062_v32, 1  ;;  %v3075_v42 = vrot.slane %v3074_v1, 2  ;;  %v3007_v48 = vsub.f32 %v8376_v20, %v2967_v60 }
 0x559   :  { %v3071_v4 = vadd.f32 %v3070_v57, %v3069_v31  ;;  %v3083_v10 = vadd.f32 %v3082_v29, %v3081_v6  ;;  %v3095_v35 = vadd.f32 %v3094_v36, %v3093_v56  ;;  %v3086_v3 = vsel %vm90_vm0, %v8442_v51, 0.0  ;;  %v3189_v31 = vpop.permute.xlu0 %3188 }
 0x55a   :  { %v3064_v21 = vadd.f32 %v3063_v25, %v3062_v32  ;;  %v3076_v13 = vadd.f32 %v3075_v42, %v3074_v1  ;;  %v3087_v54 = vrot.slane %v3086_v3, 4  ;;  %7156 = vpow2.f32 %v3028_v24 }
 0x55b   :  { %7158 = vrcp.f32 %v3071_v4  ;;  %v3084_v61 = vrot.slane %v3083_v10, 1  ;;  %v3096_v18 = vrot.slane %v3095_v35, 2  ;;  %v3034_v43 = vmul.f32 1.442695, %v3007_v48 }
 0x55c   :  { %v8447_v28 = vpop.eup %7150  ;;  %7160 = vrcp.f32 %v3064_v21  ;;  %v3077_v53 = vrot.slane %v3076_v13, 1  ;;  %v3088_v40 = vadd.f32 %v3087_v54, %v3086_v3  ;;  %v2958_v20 = vmax.f32 %v8414_v46, %v2957_v63 }
 0x55d   :  { %v3085_v55 = vadd.f32 %v3084_v61, %v3083_v10  ;;  %v3097_v22 = vadd.f32 %v3096_v18, %v3095_v35  ;;  %v3107_v8 = vsel %vm90_vm0, %v8447_v28, 0.0  ;;  %7162 = vpow2.f32 %v3034_v43  ;;  %v3193_v18 = vpop.permute.xlu0 %3192 }
 0x55e   :  { %v3078_v23 = vadd.f32 %v3077_v53, %v3076_v13  ;;  %v3089_v47 = vrot.slane %v3088_v40, 2  ;;  %v3108_v26 = vrot.slane %v3107_v8, 4  ;;  %v2959_v27 = vrot.slane %v2958_v20, 1 }
 0x55f   :  { %7164 = vrcp.f32 %v3085_v55  ;;  %v3098_v45 = vrot.slane %v3097_v22, 1  ;;  %v2977_v0 = vmax.f32 %v8397_v49, %v2976_v62  ;;  %v2968_v46 = vsel %vm90_vm0, %v8388_v30, -inf  ;;  %v3199_v49 = vpop.permute.xlu1 %3198 }
 0x560   :  { %7166 = vrcp.f32 %v3078_v23  ;;  %v3090_v63 = vadd.f32 %v3089_v47, %v3088_v40  ;;  %v3109_v14 = vadd.f32 %v3108_v26, %v3107_v8  ;;  %v2960_v52 = vmax.f32 %v2958_v20, %v2959_v27 }
 0x561   :  { %v7153_v2 = vpop.eup %7152  ;;  %v3099_v19 = vadd.f32 %v3098_v45, %v3097_v22  ;;  %v2978_v17 = vrot.slane %v2977_v0, 2  ;;  %v2969_v24 = vrot.slane %v2968_v46, 4  ;;  %v8464_v1 = vsel %vm90_vm0, %v8399_v33, -inf }
 0x562   :  { %v7155_v7 = vpop.eup %7154  ;;  %v3159_v6 = vmul.f32 %v7153_v2, %v8393_v11  ;;  %v3091_v60 = vrot.slane %v3090_v63, 1  ;;  %v3110_v58 = vrot.slane %v3109_v14, 2  ;;  %v3006_v32 = vsub.f32 %v8378_v16, %v2960_v52 }
 0x563   :  { %v3157_v62 = vmul.f32 %v7155_v7, %v8401_v9  ;;  %7168 = vrcp.f32 %v3099_v19  ;;  %v8469_v25 = vmax.f32 %v2977_v0, %v2978_v17  ;;  %v8475_v9 = vmax.f32 %v2968_v46, %v2969_v24  ;;  %v3201_v22 = vpop.permute.xlu1 %3200 }
 0x564   :  { %v8466_v56 = vpop.eup %7156  ;;  %v3237_v57 = vmul.f32 %v8408_v34, %v3159_v6  ;;  %v3092_v29 = vadd.f32 %v3091_v60, %v3090_v63  ;;  %v3111_v36 = vadd.f32 %v3110_v58, %v3109_v14  ;;  %v8473_v48 = vmul.f32 1.442695, %v3006_v32 }
 0x565   :  { %v7159_v11 = vpop.eup %7158  ;;  %v3236_v42 = vmul.f32 %v3189_v31, %v3157_v62  ;;  %v3100_v16 = vsel %vm90_vm0, %v8466_v56, 0.0  ;;  %v2980_v20 = vrot.slane %v8469_v25, 1 }
 0x566   :  { %v7161_v4 = vpop.eup %7160  ;;  %v3259_v10 = vsel %vm90_vm0, %v3237_v57, 0.0  ;;  %v3163_v35 = vmul.f32 %v7159_v11, %v8412_v41  ;;  %7170 = vrcp.f32 %v3092_v29  ;;  %v3112_v34 = vrot.slane %v3111_v36, 1 }
 0x567   :  { %v8479_v3 = vpop.eup %7162  ;;  %v3260_v21 = vrot.slane %v3259_v10, 4  ;;  %v3252_v13 = vsel %vm90_vm0, %v3236_v42, 0.0  ;;  %v3161_v54 = vmul.f32 %v7161_v4, %v8417_v12  ;;  %v3101_v61 = vrot.slane %v3100_v16, 4  ;;  %v3203_v62 = vpop.permute.xlu1 %3202 }
 0x568   :  { %v3253_v43 = vrot.slane %v3252_v13, 4  ;;  %v3239_v53 = vmul.f32 %v8440_v5, %v3163_v35  ;;  %v3113_v40 = vadd.f32 %v3112_v34, %v3111_v36  ;;  %v3121_v47 = vsel %vm90_vm0, %v8479_v3, 0.0 }
 0x569   :  { %v7165_v55 = vpop.eup %7164  ;;  %v3261_v41 = vadd.f32 %v3260_v21, %v3259_v10  ;;  %v3238_v8 = vmul.f32 %v3193_v18, %v3161_v54  ;;  %v3102_v23 = vadd.f32 %v3101_v61, %v3100_v16  ;;  %v3122_v19 = vrot.slane %v3121_v47, 4 }
 0x56a   :  { %v7167_v26 = vpop.eup %7166  ;;  %v3254_v27 = vadd.f32 %v3253_v43, %v3252_v13  ;;  %v3273_v12 = vsel %vm90_vm0, %v3239_v53, 0.0  ;;  %v3167_v45 = vmul.f32 %v7165_v55, %v8424_v37  ;;  %7172 = vrcp.f32 %v3113_v40 }
 0x56b   :  { %v3262_v0 = vrot.slane %v3261_v41, 2  ;;  %v3274_v5 = vrot.slane %v3273_v12, 4  ;;  %v3266_v46 = vsel %vm90_vm0, %v3238_v8, 0.0  ;;  %v3165_v63 = vmul.f32 %v7167_v26, %v8430_v59 }
 0x56c   :  { %v3255_v14 = vrot.slane %v3254_v27, 2  ;;  %v3267_v52 = vrot.slane %v3266_v46, 4  ;;  %v3241_v2 = vmul.f32 %v3199_v49, %v3167_v45  ;;  %v3103_v6 = vrot.slane %v3102_v23, 2 }
 0x56d   :  { %v7169_v17 = vpop.eup %7168  ;;  %v3263_v24 = vadd.f32 %v3262_v0, %v3261_v41  ;;  %v3275_v7 = vadd.f32 %v3274_v5, %v3273_v12  ;;  %v3240_v31 = vmul.f32 %v8450_v39, %v3165_v63  ;;  %v3123_v4 = vadd.f32 %v3122_v19, %v3121_v47 }
 0x56e   :  { %v3256_v60 = vadd.f32 %v3255_v14, %v3254_v27  ;;  %v3268_v58 = vadd.f32 %v3267_v52, %v3266_v46  ;;  %v3287_v37 = vsel %vm90_vm0, %v3241_v2, 0.0  ;;  %v3171_v32 = vmul.f32 %v7169_v17, %v8436_v15  ;;  %v3207_v46 = vpop.permute.xlu0 %3206 }
 0x56f   :  { %v3264_v57 = vrot.slane %v3263_v24, 1  ;;  %v3276_v29 = vrot.slane %v3275_v7, 2  ;;  %v3288_v59 = vrot.slane %v3287_v37, 4  ;;  %v3280_v36 = vsel %vm90_vm0, %v3240_v31, 0.0 }
 0x570   :  { %v7171_v49 = vpop.eup %7170  ;;  %v3269_v11 = vrot.slane %v3268_v58, 2  ;;  %v3281_v42 = vrot.slane %v3280_v36, 4  ;;  %v3243_v16 = vmul.f32 %v3203_v62, %v3171_v32  ;;  %v3257_v10 = vrot.slane %v3256_v60, 1 }
 0x571   :  { %v8495_v39 = vadd.f32 %v3276_v29, %v3275_v7  ;;  %v3289_v35 = vadd.f32 %v3288_v59, %v3287_v37  ;;  %v3169_v34 = vmul.f32 %v7171_v49, %v8442_v51  ;;  %v2971_v54 = vrot.slane %v8475_v9, 2 }
 0x572   :  { %v3270_v21 = vadd.f32 %v3269_v11, %v3268_v58  ;;  %v3282_v13 = vadd.f32 %v3281_v42, %v3280_v36  ;;  %v3301_v15 = vsel %vm90_vm0, %v3243_v16, 0.0  ;;  %v8500_v61 = vadd.f32 %v3264_v57, %v3263_v24  ;;  %v8545_v36 = vld [vmem:[%s9117_s2 + $0x18] sm:$0xff] }
 0x573   :  { %v3290_v18 = vrot.slane %v3289_v35, 2  ;;  %v3302_v43 = vrot.slane %v3301_v15, 4  ;;  %v3242_v53 = vmul.f32 %v3201_v22, %v3169_v34  ;;  %v3104_v8 = vadd.f32 %v3103_v6, %v3102_v23 }
 0x574   :  { %v7173_v40 = vpop.eup %7172  ;;  %v3271_v55 = vrot.slane %v3270_v21, 1  ;;  %v3283_v41 = vrot.slane %v3282_v13, 2  ;;  %v3124_v47 = vrot.slane %v3123_v4, 2  ;;  %v8502_v26 = vadd.f32 %v3257_v10, %v3256_v60  ;;  %v8533_v60 = vld [vmem:[%s9117_s2 + $0x8] sm:$0xff] }
 0x575   :  { %v3278_v51 = vrot.slane %v8495_v39, 1  ;;  %v8505_v27 = vadd.f32 %v3290_v18, %v3289_v35  ;;  %v3294_v12 = vsel %vm90_vm0, %v3242_v53, 0.0  ;;  %v8510_v0 = vadd.f32 %v3302_v43, %v3301_v15 }
 0x576   :  { %v8508_v45 = vadd.f32 %v3271_v55, %v3270_v21  ;;  %v3295_v5 = vrot.slane %v3294_v12, 4  ;;  %v3175_v22 = vmul.f32 %v7173_v40, %v8447_v28  ;;  %v3105_v63 = vrot.slane %v3104_v8, 1 }
 0x577   :  { %v3125_v14 = vadd.f32 %v3124_v47, %v3123_v4  ;;  %7174 = vpow2.f32 %v8473_v48  ;;  %v2981_v23 = vmax.f32 %v8469_v25, %v2980_v20  ;;  %v8517_v52 = vadd.f32 %v3283_v41, %v3282_v13  ;;  %v8525_v48 = vld [vmem:[%s9117_s2] sm:$0xff] }
 0x578   :  { %v3296_v2 = vadd.f32 %v3295_v5, %v3294_v12  ;;  %v3245_v19 = vmul.f32 %v3207_v46, %v3175_v22  ;;  %v2972_v17 = vmax.f32 %v8475_v9, %v2971_v54  ;;  %v3106_v24 = vadd.f32 %v3105_v63, %v3104_v8 }
 0x579   :  { %v3126_v7 = vrot.slane %v3125_v14, 1  ;;  %v3009_v28 = vsub.f32 %v8386_v38, %v2981_v23  ;;  %v2990_v31 = vrot.slane %v8464_v1, 4  ;;  %v2982_v9 = vsel %vm90_vm0, %v8406_v50, -inf  ;;  %v8538_v38 = vld [vmem:[%s9117_s2 + $0x10] sm:$0xff] }
 0x57a   :  { %v3297_v6 = vrot.slane %v3296_v2, 2  ;;  %v3315_v25 = vsel %vm90_vm0, %v3245_v19, 0.0  ;;  %v2973_v20 = vrot.slane %v2972_v17, 1  ;;  %7176 = vrcp.f32 %v3106_v24 }
 0x57b   :  { %v3316_v58 = vrot.slane %v3315_v25, 4  ;;  %v3127_v37 = vadd.f32 %v3126_v7, %v3125_v14  ;;  %v3038_v32 = vmul.f32 1.442695, %v3009_v28  ;;  %v2991_v57 = vmax.f32 %v8464_v1, %v2990_v31 }
 0x57c   :  { %v2974_v62 = vmax.f32 %v2972_v17, %v2973_v20  ;;  %v2983_v29 = vrot.slane %v2982_v9, 4  ;;  %v3410_v59 = vand.u32 4294901760, %v8525_v48  ;;  %v3413_v11 = vand.u32 4294901760, %v8533_v60 }
 0x57d   :  { %v3317_v49 = vadd.f32 %v3316_v58, %v3315_v25  ;;  %7178 = vrcp.f32 %v3127_v37  ;;  %v3416_v42 = vand.u32 4294901760, %v8538_v38  ;;  %v2992_v4 = vrot.slane %v2991_v57, 2 }
 0x57e   :  { %7180 = vpow2.f32 %v3038_v32  ;;  %v3008_v16 = vsub.f32 %v8388_v30, %v2974_v62  ;;  %v2984_v1 = vmax.f32 %v2982_v9, %v2983_v29  ;;  %v3285_v10 = vrot.slane %v8517_v52, 1 }
 0x57f   :  { %v3318_v35 = vrot.slane %v3317_v49, 2  ;;  %v8553_v34 = vpack.c.bf16 %v3413_v11, %v3410_v59  ;;  %v3419_v21 = vand.u32 4294901760, %v8545_v36  ;;  %v2993_v15 = vmax.f32 %v2991_v57, %v2992_v4 }
 0x580   :  { %v3036_v13 = vmul.f32 1.442695, %v3008_v16  ;;  %v2985_v54 = vrot.slane %v2984_v1, 2  ;;  %v3292_v18 = vrot.slane %v8505_v27, 1  ;;  %v3298_v40 = vadd.f32 %v3297_v6, %v3296_v2 }
 0x581   :  { %v8557_v43 = vpop.eup %7174  ;;  %v8559_v30 = vadd.f32 %v3318_v35, %v3317_v49  ;;  %6691 = vmatprep.subr.bf16.mxu0 %v8553_v34  ;;  %v8566_v53 = vpack.c.bf16 %v3419_v21, %v3416_v42  ;;  %v3304_v55 = vrot.slane %v8510_v0, 2  ;;  %v2994_v8 = vrot.slane %v2993_v15, 1 }
 0x582   :  { %v3114_v41 = vsel %vm90_vm0, %v8557_v43, 0.0  ;;  %7182 = vpow2.f32 %v3036_v13  ;;  %v2986_v47 = vmax.f32 %v2984_v1, %v2985_v54  ;;  %6693 = vmatpush3.bf16.msra.mxu0 %v8553_v34  ;;  %v3279_v12 = vadd.f32 %v3278_v51, %v8495_v39  ;;  %v8584_v51 = vpop.permute.xlu0 %3208 }
 0x583   :  { %v3115_v5 = vrot.slane %v3114_v41, 4  ;;  %6695 = vmatprep.subr.bf16.mxu0 %v8566_v53  ;;  %v3299_v22 = vrot.slane %v3298_v40, 1  ;;  %v2995_v46 = vmax.f32 %v2993_v15, %v2994_v8  ;;  %v3305_v14 = vadd.f32 %v3304_v55, %v8510_v0 }
 0x584   :  { %v2987_v63 = vrot.slane %v2986_v47, 1  ;;  %v3385_v23 = vsel %vm3384_vm1, %v8500_v61, %v8502_v26  ;;  %v7177_v2 = vpop.eup %7176  ;;  %v3320_v19 = vrot.slane %v8559_v30, 1  ;;  %v3286_v24 = vadd.f32 %v3285_v10, %v8517_v52 }
 0x585   :  { %v3116_v17 = vadd.f32 %v3115_v5, %v3114_v41  ;;  %v3387_v39 = vsel %vm3386_vm2, %v8508_v45, %v3385_v23  ;;  %v3173_v7 = vmul.f32 %v7177_v2, %v8466_v56  ;;  %v3011_v28 = vsub.f32 %v8399_v33, %v2995_v46 }
 0x586   :  { %v2988_v0 = vmax.f32 %v2986_v47, %v2987_v63  ;;  %6697 = vmatpush3.bf16.msra.mxu0 %v8566_v53  ;;  %v3293_v61 = vadd.f32 %v3292_v18, %v8505_v27  ;;  %v3300_v6 = vadd.f32 %v3299_v22, %v3298_v40  ;;  %v3306_v25 = vrot.slane %v3305_v14, 1  ;;  %v3211_v49 = vpop.permute.xlu0 %3210 }
 0x587   :  { %v7179_v26 = vpop.eup %7178  ;;  %v3117_v31 = vrot.slane %v3116_v17, 2  ;;  %v3389_v52 = vsel %vm3388_vm3, %v3279_v12, %v3387_v39  ;;  %v3244_v45 = vmul.f32 %v8426_v44, %v3173_v7  ;;  %v3042_v9 = vmul.f32 1.442695, %v3011_v28 }
 0x588   :  { %v8591_v20 = vpop.eup %7180  ;;  %v3010_v56 = vsub.f32 %v8406_v50, %v2988_v0  ;;  %v8596_v33 = vsub.f32 %v8525_v48, %v3410_v59  ;;  %v3179_v58 = vmul.f32 %v7179_v26, %v8479_v3  ;;  %v3391_v32 = vsel %vm3390_vm4, %v3286_v24, %v3389_v52 }
 0x589   :  { %v3118_v37 = vadd.f32 %v3117_v31, %v3116_v17  ;;  %v3135_v27 = vsel %vm90_vm0, %v8591_v20, 0.0  ;;  %v3308_v62 = vsel %vm90_vm0, %v3244_v45, 0.0  ;;  %7184 = vpow2.f32 %v3042_v9 }
 0x58a   :  { %v3136_v57 = vrot.slane %v3135_v27, 4  ;;  %v8606_v44 = vsub.f32 %v8533_v60, %v3413_v11  ;;  %v3309_v50 = vrot.slane %v3308_v62, 4  ;;  %v3040_v29 = vmul.f32 1.442695, %v3010_v56 }
 0x58b   :  { %v3119_v48 = vrot.slane %v3118_v37, 1  ;;  %v3393_v3 = vsel %vm3392_vm5, %v3293_v61, %v3391_v32  ;;  %v3307_v4 = vadd.f32 %v3306_v25, %v3305_v14  ;;  %v3501_v10 = vand.u32 4294901760, %v8596_v33 }
 0x58c   :  { %v8609_v59 = vpop.eup %7182  ;;  %v3137_v16 = vadd.f32 %v3136_v57, %v3135_v27  ;;  %v3395_v1 = vsel %vm3394_vm6, %v3300_v6, %v3393_v3  ;;  %v3310_v35 = vadd.f32 %v3309_v50, %v3308_v62  ;;  %v3247_v13 = vmul.f32 %v3211_v49, %v3179_v58 }
 0x58d   :  { %v3120_v15 = vadd.f32 %v3119_v48, %v3118_v37  ;;  %v3128_v60 = vsel %vm90_vm0, %v8609_v59, 0.0  ;;  %7186 = vpow2.f32 %v3040_v29  ;;  %v3397_v18 = vsel %vm3396_vm7, %v3307_v4, %v3395_v1 }
 0x58e   :  { %v3138_v11 = vrot.slane %v3137_v16, 2  ;;  %v3129_v54 = vrot.slane %v3128_v60, 4  ;;  %v3311_v40 = vrot.slane %v3310_v35, 2  ;;  %v3405_v55 = vsel %vm90_vm0, %v3397_v18, 0 }
 0x58f   :  { %7188 = vrcp.f32 %v3120_v15  ;;  %v8617_v47 = vand.u32 4294901760, %v3405_v55  ;;  %v3502_v12 = vsub.f32 %v8596_v33, %v3501_v10  ;;  %v3321_v5 = vadd.f32 %v3320_v19, %v8559_v30  ;;  %v3213_v15 = vpop.permute.xlu0 %3212 }
 0x590   :  { %v3139_v41 = vadd.f32 %v3138_v11, %v3137_v16  ;;  %v3130_v8 = vadd.f32 %v3129_v54, %v3128_v60  ;;  %v3312_v22 = vadd.f32 %v3311_v40, %v3310_v35  ;;  %v3508_v46 = vand.u32 4294901760, %v8606_v44 }
 0x591   :  { %v3514_v63 = vsub.f32 %v8538_v38, %v3416_v42  ;;  %v3329_v14 = vsel %vm90_vm0, %v3247_v13, 0.0  ;;  %v8627_v17 = vsub.f32 %v3405_v55, %v8617_v47  ;;  %v3503_v39 = vand.u32 4294901760, %v3502_v12 }
 0x592   :  { %v3140_v23 = vrot.slane %v3139_v41, 1  ;;  %v3131_v2 = vrot.slane %v3130_v8, 2  ;;  %v3313_v24 = vrot.slane %v3312_v22, 1  ;;  %v3509_v7 = vsub.f32 %v8606_v44, %v3508_v46 }
 0x593   :  { %v3515_v28 = vand.u32 4294901760, %v3514_v63  ;;  %v8630_v30 = vpop.eup %7184  ;;  %v3480_v61 = vand.u32 4294901760, %v8627_v17  ;;  %v3521_v38 = vsub.f32 %v8545_v36, %v3419_v21  ;;  %v3330_v26 = vrot.slane %v3329_v14, 4 }
 0x594   :  { %v3141_v19 = vadd.f32 %v3140_v23, %v3139_v41  ;;  %v3132_v0 = vadd.f32 %v3131_v2, %v3130_v8  ;;  %v3314_v42 = vadd.f32 %v3313_v24, %v3312_v22  ;;  %v3149_v31 = vsel %vm90_vm0, %v8630_v30, 0.0 }
 0x595   :  { %v3510_v6 = vand.u32 4294901760, %v3509_v7  ;;  %v3150_v52 = vrot.slane %v3149_v31, 4  ;;  %v3481_v45 = vsub.f32 %v8627_v17, %v3480_v61  ;;  %v3516_v58 = vsub.f32 %v3514_v63, %v3515_v28 }
 0x596   :  { %7190 = vrcp.f32 %v3141_v19  ;;  %v3133_v25 = vrot.slane %v3132_v0, 1  ;;  %v3398_v9 = vsel %vm3384_vm1, %v3321_v5, %v3314_v42  ;;  %v3522_v32 = vand.u32 4294901760, %v3521_v38 }
 0x597   :  { %v8642_v56 = vpack.c.bf16 %v3510_v6, %v3503_v39  ;;  %v8644_v37 = vpop.eup %7186  ;;  %v3151_v21 = vadd.f32 %v3150_v52, %v3149_v31  ;;  %v3482_v27 = vand.u32 4294901760, %v3481_v45  ;;  %v3331_v57 = vadd.f32 %v3330_v26, %v3329_v14 }
 0x598   :  { %v3134_v36 = vadd.f32 %v3133_v25, %v3132_v0  ;;  %v3142_v50 = vsel %vm90_vm0, %v8644_v37, 0.0  ;;  %v8651_v48 = vpack.c.bf16 %v8606_v44, %v8596_v33  ;;  %v8653_v29 = vpack.c.bf16 %v3521_v38, %v3514_v63 }
 0x599   :  { %v7189_v62 = vpop.eup %7188  ;;  %6699 = vmatprep.subr.bf16.mxu0 %v8642_v56  ;;  %v3152_v49 = vrot.slane %v3151_v21, 2  ;;  %v3143_v16 = vrot.slane %v3142_v50, 4  ;;  %6356 = vmatprep.mubr.f32.mxu0 %v3482_v27  ;;  %v3517_v4 = vand.u32 4294901760, %v3516_v58  ;;  %v3523_v1 = vsub.f32 %v3521_v38, %v3522_v32 }
 0x59a   :  { %v3177_v3 = vmul.f32 %v7189_v62, %v8557_v43  ;;  %7192 = vrcp.f32 %v3134_v36  ;;  %v8656_v35 = vpack.c.bf16 %v3508_v46, %v3501_v10  ;;  %v8658_v13 = vpack.c.bf16 %v3522_v32, %v3515_v28  ;;  %v3215_v46 = vpop.permute.xlu0 %3214  ;;  %v3219_v32 = vpop.permute.xlu1 %3218 }
 0x59b   :  { %v3153_v11 = vadd.f32 %v3152_v49, %v3151_v21  ;;  %v3144_v33 = vadd.f32 %v3143_v16, %v3142_v50  ;;  %v3524_v44 = vand.u32 4294901760, %v3523_v1  ;;  %v3332_v54 = vrot.slane %v3331_v57, 2 }
 0x59c   :  { %v3246_v60 = vmul.f32 %v8584_v51, %v3177_v3 }
 0x59d   :  { %v3154_v43 = vrot.slane %v3153_v11, 1  ;;  %v3145_v40 = vrot.slane %v3144_v33, 2  ;;  %v8662_v41 = vpack.c.bf16 %v3524_v44, %v3517_v4  ;;  %v3333_v63 = vadd.f32 %v3332_v54, %v3331_v57 }
 0x59e   :  { %v3322_v18 = vsel %vm90_vm0, %v3246_v60, 0.0  ;;  %v3217_v1 = vpop.permute.xlu0 %3216 }
 0x59f   :  { %v3323_v55 = vrot.slane %v3322_v18, 4  ;;  %v3155_v12 = vadd.f32 %v3154_v43, %v3153_v11  ;;  %v3146_v10 = vadd.f32 %v3145_v40, %v3144_v33  ;;  %v3334_v19 = vrot.slane %v3333_v63, 1 }
 0x5a0   :  { %v7191_v8 = vpop.eup %7190 }
 0x5a1   :  { %v3324_v5 = vadd.f32 %v3323_v55, %v3322_v18  ;;  %v3183_v22 = vmul.f32 %v7191_v8, %v8591_v20  ;;  %7194 = vrcp.f32 %v3155_v12  ;;  %v3147_v51 = vrot.slane %v3146_v10, 1 }
 0x5a2   :  { %v3335_v6 = vadd.f32 %v3334_v19, %v3333_v63  ;;  %v7203_v19 = vld [vmem:[#allocation2 + $0x48] sm:$0xff] }
 0x5a3   :  { %v3325_v14 = vrot.slane %v3324_v5, 2  ;;  %v3249_v23 = vmul.f32 %v3215_v46, %v3183_v22  ;;  %v3148_v24 = vadd.f32 %v3147_v51, %v3146_v10 }
 0x5a4   :  { %v7193_v2 = vpop.eup %7192 }
 0x5a5   :  { %v3326_v39 = vadd.f32 %v3325_v14, %v3324_v5  ;;  %v3343_v7 = vsel %vm90_vm0, %v3249_v23, 0.0  ;;  %v3181_v28 = vmul.f32 %v7193_v2, %v8609_v59  ;;  %7196 = vrcp.f32 %v3148_v24 }
 0x5a6   :  { %v3344_v0 = vrot.slane %v3343_v7, 4 }
 0x5a7   :  { %v3327_v38 = vrot.slane %v3326_v39, 1  ;;  %v3248_v42 = vmul.f32 %v3213_v15, %v3181_v28  ;;  %v7202_v28 = vld [vmem:[#allocation2 + $0x40] sm:$0xff] }
 0x5a8   :  { %v3345_v26 = vadd.f32 %v3344_v0, %v3343_v7  ;;  %v7204_v0 = vld [vmem:[#allocation2 + $0x50] sm:$0xff] }
 0x5a9   :  { %v3328_v20 = vadd.f32 %v3327_v38, %v3326_v39  ;;  %v3336_v31 = vsel %vm90_vm0, %v3248_v42, 0.0  ;;  %v8709_v42 = vld [vmem:[#allocation7 + $0x1] ss:$0 sm:$0xff] }
 0x5aa   :  { %v3346_v25 = vrot.slane %v3345_v26, 2  ;;  %v3337_v52 = vrot.slane %v3336_v31, 4 }
 0x5ab   :  { %v3399_v45 = vsel %vm3386_vm2, %v3328_v20, %v3398_v9  ;;  %v7195_v58 = vpop.eup %7194  ;;  %v7205_v20 = vld [vmem:[#allocation2 + $0x8] sm:$0xff] }
 0x5ac   :  { %v3338_v36 = vadd.f32 %v3337_v52, %v3336_v31  ;;  %v3400_v21 = vsel %vm3388_vm3, %v3335_v6, %v3399_v45  ;;  %v3347_v27 = vadd.f32 %v3346_v25, %v3345_v26  ;;  %v3187_v59 = vmul.f32 %v7195_v58, %v8630_v30  ;;  %v7206_v58 = vld [vmem:[#allocation2 + $0x58] sm:$0xff] }
 0x5ae   :  { %v3339_v62 = vrot.slane %v3338_v36, 2  ;;  %v3251_v57 = vmul.f32 %v3219_v32, %v3187_v59  ;;  %v3348_v49 = vrot.slane %v3347_v27, 1  ;;  %v7208_v59 = vld [vmem:[#allocation2] sm:$0xff] }
 0x5af   :  { %v7197_v50 = vpop.eup %7196 }
 0x5b0   :  { %v3340_v3 = vadd.f32 %v3339_v62, %v3338_v36  ;;  %v3357_v16 = vsel %vm90_vm0, %v3251_v57, 0.0  ;;  %v3185_v4 = vmul.f32 %v7197_v50, %v8644_v37  ;;  %v3349_v44 = vadd.f32 %v3348_v49, %v3347_v27  ;;  %v7209_v62 = vld [vmem:[#allocation2 + $0x10] sm:$0xff]  ;;  %v7210_v50 = vld [vmem:[#allocation2 + $0x68] sm:$0xff] }
 0x5b1   :  { %v3358_v9 = vrot.slane %v3357_v16, 4  ;;  %v7211_v49 = vld [vmem:[#allocation2 + $0x70] sm:$0xff] }
 0x5b2   :  { %v3341_v15 = vrot.slane %v3340_v3, 1  ;;  %v3250_v60 = vmul.f32 %v3217_v1, %v3185_v4  ;;  %v7212_v4 = vld [vmem:[#allocation2 + $0x78] sm:$0xff] }
 0x5b3   :  { %v3359_v33 = vadd.f32 %v3358_v9, %v3357_v16 }
 0x5b4   :  { %v3342_v11 = vadd.f32 %v3341_v15, %v3340_v3  ;;  %v3350_v54 = vsel %vm90_vm0, %v3250_v60, 0.0 }
 0x5b5   :  { %v3360_v30 = vrot.slane %v3359_v33, 2  ;;  %v3351_v18 = vrot.slane %v3350_v54, 4 }
 0x5b6   :  { %v3401_v43 = vsel %vm3390_vm4, %v3342_v11, %v3400_v21  ;;  %v7207_v21 = vld [vmem:[#allocation2 + $0x60] sm:$0xff] }
 0x5b7   :  { %v3402_v40 = vsel %vm3392_vm5, %v3349_v44, %v3401_v43  ;;  %v3352_v55 = vadd.f32 %v3351_v18, %v3350_v54  ;;  %v3361_v8 = vadd.f32 %v3360_v30, %v3359_v33 }
 0x5b9   :  { %v3353_v12 = vrot.slane %v3352_v55, 2  ;;  %v3362_v37 = vrot.slane %v3361_v8, 1 }
 0x5bb   :  { %v3354_v10 = vadd.f32 %v3353_v12, %v3352_v55  ;;  %v3363_v46 = vadd.f32 %v3362_v37, %v3361_v8 }
 0x5bd   :  { %v3355_v5 = vrot.slane %v3354_v10, 1 }
 0x5bf   :  { %v3356_v22 = vadd.f32 %v3355_v5, %v3354_v10 }
 0x5c1   :  { %v3403_v63 = vsel %vm3394_vm6, %v3356_v22, %v3402_v40 }
 0x5c2   :  { %v3404_v51 = vsel %vm3396_vm7, %v3363_v46, %v3403_v63  ;;  %v7213_v46 = vld [vmem:[#allocation2 + $0x18] sm:$0xff] }
 0x5c3   :  { %v3407_v14 = vsel %vm90_vm0, %v3404_v51, 0 }
 0x5c4   :  { %v3488_v23 = vand.u32 4294901760, %v3407_v14 }
 0x5c6   :  { %v3489_v2 = vsub.f32 %v3407_v14, %v3488_v23  ;;  %v7214_v14 = vld [vmem:[#allocation2 + $0x20] sm:$0xff] }
 0x5c8   :  { %v3490_v24 = vand.u32 4294901760, %v3489_v2 }
 0x5ca   :  { %v3491_v39 = vsub.f32 %v3489_v2, %v3490_v24 }
 0x5cc   :  { %v3492_v7 = vand.u32 4294901760, %v3491_v39  ;;  %v7216_v39 = vld [vmem:[#allocation2 + $0x30] sm:$0xff] }
 0x5ce   :  { %6357 = vmatmul.mubr.f32.vlgmr.msra.gmra.mrb[16].mxu0 %v3492_v7 }
 0x5cf   :  { %6701 = vmatpush3.bf16.msra.mxu0 %v8642_v56  ;;  %6367 = vmatprep.mubr.f32.mxu0 %v8617_v47 }
 0x5d0   :  { %6703 = vmatprep.subr.bf16.mxu0 %v8662_v41 }
 0x5d3   :  { %6705 = vmatpush3.bf16.msra.mxu0 %v8662_v41 }
 0x5d4   :  { %6707 = vmatprep.subr.bf16.mxu0 %v8651_v48 }
 0x5d6   :  { %6368 = vmatmul.mubr.f32.vlgmr.msra.gmra.mrb[16].mxu0 %v3488_v23 }
 0x5d7   :  { %6709 = vmatpush3.bf16.msra.mxu0 %v8651_v48  ;;  %6378 = vmatprep.mubr.f32.mxu0 %v8627_v17 }
 0x5d8   :  { %6711 = vmatprep.subr.bf16.mxu0 %v8653_v29 }
 0x5db   :  { %6713 = vmatpush3.bf16.msra.mxu0 %v8653_v29 }
 0x5dc   :  { %6715 = vmatprep.subr.bf16.mxu0 %v8553_v34 }
 0x5de   :  { %6379 = vmatmul.mubr.f32.vlgmr.msra.gmra.mrb[16].mxu0 %v3489_v2  ;;  %v7215_v2 = vld [vmem:[#allocation2 + $0x28] sm:$0xff] }
 0x5df   :  { %6717 = vmatpush3.bf16.msra.mxu0 %v8553_v34  ;;  %6389 = vmatprep.mubr.f32.mxu0 %v3480_v61 }
 0x5e0   :  { %6719 = vmatprep.subr.bf16.mxu0 %v8566_v53 }
 0x5e3   :  { %6721 = vmatpush3.bf16.msra.mxu0 %v8566_v53 }
 0x5e4   :  { %6723 = vmatprep.subr.bf16.mxu0 %v8656_v35 }
 0x5e6   :  { %6390 = vmatmul.mubr.f32.vlgmr.msra.gmra.mrb[16].mxu0 %v3490_v24 }
 0x5e7   :  { %6725 = vmatpush3.bf16.msra.mxu0 %v8656_v35  ;;  %6400 = vmatprep.mubr.f32.mxu0 %v8617_v47 }
 0x5e8   :  { %6727 = vmatprep.subr.bf16.mxu0 %v8658_v13 }
 0x5eb   :  { %6729 = vmatpush3.bf16.msra.mxu0 %v8658_v13 }
 0x5ec   :  { %6731 = vmatprep.subr.bf16.mxu0 %v8553_v34 }
 0x5ee   :  { %6401 = vmatmul.mubr.f32.vlgmr.msra.gmra.mrb[16].mxu0 %v3488_v23 }
 0x5ef   :  { %6733 = vmatpush3.bf16.msra.mxu0 %v8553_v34  ;;  %6411 = vmatprep.mubr.f32.mxu0 %v8617_v47 }
 0x5f0   :  { %6735 = vmatprep.subr.bf16.mxu0 %v8566_v53 }
 0x5f3   :  { %6737 = vmatpush3.bf16.msra.mxu0 %v8566_v53 }
 0x5f6   :  { %6412 = vmatmul.mubr.f32.vlgmr.msra.gmra.mrb[16].mxu0 %v3488_v23 }
 0x6c9   :  { %v6413_v17 = vpop.f32.mrb[16].mxu0 }
 0x6ca   :  { %v3946_v61 = vrot.slane %v6413_v17, 1  ;;  %v3947_v56 = vrot.slane %v6413_v17, 2  ;;  %v3948_v48 = vrot.slane %v6413_v17, 3  ;;  %v3949_v29 = vrot.slane %v6413_v17, 4  ;;  %v8704_v35 = vpop.f32.mrb[17].mxu0 }
 0x6cb   :  { %v3939_v13 = vrot.slane %v8704_v35, 1  ;;  %v3940_v41 = vrot.slane %v8704_v35, 2  ;;  %v3977_v34 = vadd.f32 %v7202_v28, %v6413_v17  ;;  %v3941_v53 = vrot.slane %v8704_v35, 3 }
 0x6cc   :  { %v3978_v47 = vadd.f32 %v7203_v19, %v3946_v61  ;;  %v3979_v38 = vadd.f32 %v7204_v0, %v3947_v56  ;;  %v3942_v26 = vrot.slane %v8704_v35, 4  ;;  %v3950_v6 = vrot.slane %v6413_v17, 5  ;;  %v7217_v56 = vld [vmem:[#allocation2 + $0x38] sm:$0xff] }
 0x6cd   :  { %v3970_v31 = vadd.f32 %v7205_v20, %v3939_v13  ;;  %v3951_v25 = vrot.slane %v6413_v17, 6  ;;  %v3952_v45 = vrot.slane %v6413_v17, 7  ;;  %v3980_v36 = vadd.f32 %v7206_v58, %v3948_v48 }
 0x6ce   :  { %v8713_v52 = vadd.f32 %v8709_v42, %v3978_v47  ;;  %v3981_v27 = vadd.f32 %v7207_v21, %v3949_v29  ;;  %v3969_v32 = vadd.f32 %v7208_v59, %v8704_v35  ;;  %v3971_v57 = vadd.f32 %v7209_v62, %v3940_v41 }
 0x6cf   :  { %v3982_v3 = vadd.f32 %v7210_v50, %v3950_v6  ;;  %v3983_v16 = vadd.f32 %v7211_v49, %v3951_v25  ;;  %v3984_v1 = vadd.f32 %v7212_v4, %v3952_v45  ;;  %v8717_v15 = vadd.f32 %v8709_v42, %v3979_v38 }
 0x6d0   :  { %v8720_v9 = vadd.f32 %v8709_v42, %v3980_v36  ;;  %v8723_v60 = vadd.f32 %v8709_v42, %v3981_v27  ;;  %v8726_v11 = vadd.f32 %v8709_v42, %v3977_v34  ;;  %v4035_v44 = vrot.slane %v8713_v52, 7 }
 0x6d1   :  { %v8729_v33 = vadd.f32 %v8709_v42, %v3982_v3  ;;  %v3943_v54 = vrot.slane %v8704_v35, 5  ;;  %v8734_v30 = vadd.f32 %v8709_v42, %v3970_v31  ;;  %v8737_v18 = vadd.f32 %v8709_v42, %v3983_v16 }
 0x6d2   :  { %v8740_v43 = vadd.f32 %v8709_v42, %v3984_v1  ;;  %v4037_v40 = vrot.slane %v8717_v15, 6  ;;  %v4036_v55 = vsel %vm3384_vm1, %v4035_v44, %v8726_v11  ;;  %v4039_v8 = vrot.slane %v8720_v9, 5 }
 0x6d3   :  { %v4041_v12 = vrot.slane %v8723_v60, 4  ;;  %v3944_v10 = vrot.slane %v8704_v35, 6  ;;  %v4043_v5 = vrot.slane %v8729_v33, 3  ;;  %v3945_v22 = vrot.slane %v8704_v35, 7 }
 0x6d4   :  { %v4038_v37 = vsel %vm3386_vm2, %v4037_v40, %v4036_v55  ;;  %v3972_v63 = vadd.f32 %v7213_v46, %v3941_v53  ;;  %v3973_v23 = vadd.f32 %v7214_v14, %v3942_v26  ;;  %v3974_v24 = vadd.f32 %v7215_v2, %v3943_v54 }
 0x6d5   :  { %v4040_v51 = vsel %vm3388_vm3, %v4039_v8, %v4038_v37  ;;  %v3975_v7 = vadd.f32 %v7216_v39, %v3944_v10  ;;  %v4045_v61 = vrot.slane %v8737_v18, 2  ;;  %v3976_v48 = vadd.f32 %v7217_v56, %v3945_v22 }
 0x6d6   :  { %v4042_v17 = vsel %vm3390_vm4, %v4041_v12, %v4040_v51  ;;  %v8755_v29 = vadd.f32 %v8709_v42, %v3971_v57  ;;  %v4047_v13 = vrot.slane %v8740_v43, 1  ;;  %v8760_v41 = vadd.f32 %v8709_v42, %v3972_v63 }
 0x6d7   :  { %v4044_v35 = vsel %vm3392_vm5, %v4043_v5, %v4042_v17  ;;  %v8763_v28 = vadd.f32 %v8709_v42, %v3973_v23  ;;  %v8767_v19 = vadd.f32 %v8709_v42, %v3969_v32  ;;  %v8770_v47 = vadd.f32 %v8709_v42, %v3974_v24 }
 0x6d8   :  { %v4046_v34 = vsel %vm3394_vm6, %v4045_v61, %v4044_v35  ;;  %v4021_v0 = vrot.slane %v8734_v30, 7  ;;  %v8775_v53 = vadd.f32 %v8709_v42, %v3975_v7  ;;  %v4023_v26 = vrot.slane %v8755_v29, 6 }
 0x6d9   :  { %v4048_v38 = vsel %vm3396_vm7, %v4047_v13, %v4046_v34  ;;  %v8780_v31 = vadd.f32 %v8709_v42, %v3976_v48  ;;  %v4025_v25 = vrot.slane %v8760_v41, 5  ;;  %v4027_v58 = vrot.slane %v8763_v28, 4 }
 0x6da   :  { %v4054_v20 = vsel %vm90_vm0, %v4048_v38, 0.0  ;;  %v4022_v6 = vsel %vm3384_vm1, %v4021_v0, %v8767_v19  ;;  %v4029_v21 = vrot.slane %v8770_v47, 3  ;;  %v4031_v59 = vrot.slane %v8775_v53, 2 }
 0x6db   :  { %4055 = vadd.xlane.f32.xlu1 %v4054_v20  ;;  %v4024_v45 = vsel %vm3386_vm2, %v4023_v26, %v4022_v6  ;;  %v4033_v32 = vrot.slane %v8780_v31, 1 }
 0x6dc   :  { %v4026_v36 = vsel %vm3388_vm3, %v4025_v25, %v4024_v45 }
 0x6dd   :  { %v4028_v27 = vsel %vm3390_vm4, %v4027_v58, %v4026_v36 }
 0x6de   :  { %v4030_v42 = vsel %vm3392_vm5, %v4029_v21, %v4028_v27 }
 0x6df   :  { %v4032_v62 = vsel %vm3394_vm6, %v4031_v59, %v4030_v42 }
 0x6e0   :  { %v4034_v57 = vsel %vm3396_vm7, %v4033_v32, %v4032_v62 }
 0x6e1   :  { %v4051_v50 = vsel %vm90_vm0, %v4034_v57, 0.0 }
 0x6e2   :  { %4052 = vadd.xlane.f32.xlu0 %v4051_v50 }
 0x768   :  { %v4056_v3 = vpop.xlane.xlu1 %4055 }
 0x769   :  { %v4058_v49 = vmul.f32 0.03125, %v4056_v3 }
 0x76b   :  { %v4068_v16 = vrot.slane %v4058_v49, 1  ;;  %v4069_v4 = vrot.slane %v4058_v49, 2  ;;  %v4070_v1 = vrot.slane %v4058_v49, 3  ;;  %v4071_v44 = vrot.slane %v4058_v49, 4 }
 0x76c   :  { %v4072_v54 = vrot.slane %v4058_v49, 5  ;;  %v4073_v40 = vrot.slane %v4058_v49, 6  ;;  %v4074_v55 = vrot.slane %v4058_v49, 7  ;;  %v8797_v8 = vsub.f32 %v8726_v11, %v4058_v49 }
 0x76d   :  { %v8800_v12 = vsub.f32 %v8713_v52, %v4068_v16  ;;  %v8803_v10 = vsub.f32 %v8717_v15, %v4069_v4  ;;  %v8806_v37 = vsub.f32 %v8720_v9, %v4070_v1  ;;  %v8809_v5 = vsub.f32 %v8723_v60, %v4071_v44 }
 0x76e   :  { %v8812_v46 = vsub.f32 %v8729_v33, %v4072_v54  ;;  %v8817_v14 = vsub.f32 %v8737_v18, %v4073_v40  ;;  %v8820_v23 = vsub.f32 %v8740_v43, %v4074_v55  ;;  %v4115_v2 = vmul.f32 %v8797_v8, %v8797_v8 }
 0x76f   :  { %v4053_v22 = vpop.xlane.xlu0 %4052  ;;  %v4116_v63 = vmul.f32 %v8800_v12, %v8800_v12  ;;  %v4117_v24 = vmul.f32 %v8803_v10, %v8803_v10  ;;  %v4118_v39 = vmul.f32 %v8806_v37, %v8806_v37  ;;  %v4119_v7 = vmul.f32 %v8809_v5, %v8809_v5 }
 0x770   :  { %v4057_v51 = vmul.f32 0.03125, %v4053_v22  ;;  %v4120_v32 = vmul.f32 %v8812_v46, %v8812_v46  ;;  %v4121_v57 = vmul.f32 %v8817_v14, %v8817_v14 }
 0x771   :  { %v4153_v17 = vrot.slane %v4116_v63, 7  ;;  %v4155_v21 = vrot.slane %v4117_v24, 6  ;;  %v4157_v3 = vrot.slane %v4118_v39, 5  ;;  %v4159_v55 = vrot.slane %v4119_v7, 4 }
 0x772   :  { %v4061_v61 = vrot.slane %v4057_v51, 1  ;;  %v4062_v56 = vrot.slane %v4057_v51, 2  ;;  %v4063_v48 = vrot.slane %v4057_v51, 3  ;;  %v4064_v35 = vrot.slane %v4057_v51, 4 }
 0x773   :  { %v4065_v13 = vrot.slane %v4057_v51, 5  ;;  %v4066_v34 = vrot.slane %v4057_v51, 6  ;;  %v4067_v0 = vrot.slane %v4057_v51, 7  ;;  %v8831_v38 = vsub.f32 %v8767_v19, %v4057_v51 }
 0x774   :  { %v8834_v26 = vsub.f32 %v8734_v30, %v4061_v61  ;;  %v8837_v20 = vsub.f32 %v8755_v29, %v4062_v56  ;;  %v8840_v6 = vsub.f32 %v8760_v41, %v4063_v48  ;;  %v8843_v25 = vsub.f32 %v8763_v28, %v4064_v35 }
 0x775   :  { %v8846_v45 = vsub.f32 %v8770_v47, %v4065_v13  ;;  %v8849_v58 = vsub.f32 %v8775_v53, %v4066_v34  ;;  %v8852_v36 = vsub.f32 %v8780_v31, %v4067_v0  ;;  %v4154_v50 = vsel %vm3384_vm1, %v4153_v17, %v4115_v2 }
 0x776   :  { %v4108_v27 = vmul.f32 %v8834_v26, %v8834_v26  ;;  %v4109_v59 = vmul.f32 %v8837_v20, %v8837_v20  ;;  %v4110_v42 = vmul.f32 %v8840_v6, %v8840_v6  ;;  %v4111_v62 = vmul.f32 %v8843_v25, %v8843_v25 }
 0x777   :  { %v4107_v49 = vmul.f32 %v8831_v38, %v8831_v38  ;;  %v4112_v16 = vmul.f32 %v8846_v45, %v8846_v45  ;;  %v4113_v44 = vmul.f32 %v8849_v58, %v8849_v58  ;;  %v4114_v54 = vmul.f32 %v8852_v36, %v8852_v36 }
 0x778   :  { %v4139_v4 = vrot.slane %v4108_v27, 7  ;;  %v4141_v1 = vrot.slane %v4109_v59, 6  ;;  %v4156_v40 = vsel %vm3386_vm2, %v4155_v21, %v4154_v50  ;;  %v4143_v63 = vrot.slane %v4110_v42, 5 }
 0x779   :  { %v4158_v51 = vsel %vm3388_vm3, %v4157_v3, %v4156_v40  ;;  %v4161_v2 = vrot.slane %v4120_v32, 3  ;;  %v4145_v39 = vrot.slane %v4111_v62, 4  ;;  %v4147_v56 = vrot.slane %v4112_v16, 3  ;;  %v4271_v16 = vld [vmem:[%s9118_s3 + $0x10] sm:$0xff] }
 0x77a   :  { %v4140_v22 = vsel %vm3384_vm1, %v4139_v4, %v4107_v49  ;;  %v4160_v17 = vsel %vm3390_vm4, %v4159_v55, %v4158_v51  ;;  %v4122_v48 = vmul.f32 %v8820_v23, %v8820_v23  ;;  %v4149_v13 = vrot.slane %v4113_v44, 2  ;;  %v4270_v49 = vld [vmem:[%s9118_s3 + $0x8] sm:$0xff]  ;;  %v4272_v44 = vld [vmem:[%s9118_s3 + $0x18] sm:$0xff] }
 0x77b   :  { %v4142_v24 = vsel %vm3386_vm2, %v4141_v1, %v4140_v22  ;;  %v4162_v35 = vsel %vm3392_vm5, %v4161_v2, %v4160_v17  ;;  %v4163_v34 = vrot.slane %v4121_v57, 2  ;;  %v4151_v21 = vrot.slane %v4114_v54, 1  ;;  %v4269_v57 = vld [vmem:[%s9118_s3] sm:$0xff] }
 0x77c   :  { %v4144_v61 = vsel %vm3388_vm3, %v4143_v63, %v4142_v24  ;;  %v4165_v32 = vrot.slane %v4122_v48, 1  ;;  %v4326_v4 = vand.u32 4294901760, %v4269_v57  ;;  %v4329_v1 = vand.u32 4294901760, %v4270_v49 }
 0x77d   :  { %v4146_v7 = vsel %vm3390_vm4, %v4145_v39, %v4144_v61  ;;  %v4164_v59 = vsel %vm3394_vm6, %v4163_v34, %v4162_v35  ;;  %v4332_v54 = vand.u32 4294901760, %v4271_v16  ;;  %v4335_v40 = vand.u32 4294901760, %v4272_v44 }
 0x77e   :  { %v4148_v0 = vsel %vm3392_vm5, %v4147_v56, %v4146_v7  ;;  %v4166_v50 = vsel %vm3396_vm7, %v4165_v32, %v4164_v59  ;;  %v8904_v55 = vpack.c.bf16 %v4329_v1, %v4326_v4  ;;  %v4416_v63 = vsub.f32 %v4269_v57, %v4326_v4 }
 0x77f   :  { %v4150_v27 = vsel %vm3394_vm6, %v4149_v13, %v4148_v0  ;;  %v4172_v3 = vsel %vm90_vm0, %v4166_v50, 0.0  ;;  %v8906_v22 = vpack.c.bf16 %v4335_v40, %v4332_v54  ;;  %v4423_v51 = vsub.f32 %v4270_v49, %v4329_v1 }
 0x780   :  { %v4152_v42 = vsel %vm3396_vm7, %v4151_v21, %v4150_v27  ;;  %6739 = vmatprep.subr.bf16.mxu1 %v8904_v55  ;;  %v4417_v2 = vand.u32 4294901760, %v4416_v63  ;;  %v4430_v35 = vsub.f32 %v4271_v16, %v4332_v54  ;;  %v4437_v7 = vsub.f32 %v4272_v44, %v4335_v40  ;;  %v8925_v40 = vld [vmem:[#allocation7 + $0x4] ss:$0 sm:$0xff] }
 0x781   :  { %v4169_v62 = vsel %vm90_vm0, %v4152_v42, 0.0  ;;  %6741 = vmatpush3.bf16.msra.mxu1 %v8904_v55  ;;  %v4424_v24 = vand.u32 4294901760, %v4423_v51  ;;  %v8917_v32 = vpack.c.bf16 %v4423_v51, %v4416_v63 }
 0x782   :  { %4170 = vadd.xlane.f32.xlu0 %v4169_v62  ;;  %6743 = vmatprep.subr.bf16.mxu1 %v8906_v22  ;;  %v4418_v39 = vsub.f32 %v4416_v63, %v4417_v2  ;;  %v4431_v13 = vand.u32 4294901760, %v4430_v35  ;;  %v4438_v34 = vand.u32 4294901760, %v4437_v7  ;;  %v8919_v62 = vpack.c.bf16 %v4437_v7, %v4430_v35 }
 0x783   :  { %v4425_v17 = vsub.f32 %v4423_v51, %v4424_v24  ;;  %v8921_v50 = vpack.c.bf16 %v4424_v24, %v4417_v2 }
 0x784   :  { %v4419_v61 = vand.u32 4294901760, %v4418_v39  ;;  %v4432_v0 = vsub.f32 %v4430_v35, %v4431_v13  ;;  %v4439_v21 = vsub.f32 %v4437_v7, %v4438_v34  ;;  %v8928_v35 = vld [vmem:[#allocation7 + $0x5] ss:$0 sm:$0xff] }
 0x785   :  { %6745 = vmatpush3.bf16.msra.mxu1 %v8906_v22  ;;  %v4426_v56 = vand.u32 4294901760, %v4425_v17 }
 0x786   :  { %4173 = vadd.xlane.f32.xlu0 %v4172_v3  ;;  %v4433_v27 = vand.u32 4294901760, %v4432_v0  ;;  %v4440_v59 = vand.u32 4294901760, %v4439_v21  ;;  %v8923_v3 = vpack.c.bf16 %v4438_v34, %v4431_v13 }
 0x787   :  { %v8912_v48 = vpack.c.bf16 %v4426_v56, %v4419_v61 }
 0x788   :  { %v8915_v42 = vpack.c.bf16 %v4440_v59, %v4433_v27 }
 0x789   :  { %6747 = vmatprep.subr.bf16.mxu1 %v8912_v48 }
 0x80f   :  { %v4171_v57 = vpop.xlane.xlu0 %4170 }
 0x810   :  { %v4175_v49 = vmul.f32 0.03125, %v4171_v57 }
 0x812   :  { %v4177_v16 = vadd.f32 1e-05, %v4175_v49 }
 0x813   :  { %v4174_v4 = vpop.xlane.xlu0 %4173 }
 0x814   :  { %7198 = vrsqrt.f32 %v4177_v16  ;;  %v4176_v1 = vmul.f32 0.03125, %v4174_v4 }
 0x816   :  { %v4178_v44 = vadd.f32 1e-05, %v4176_v1 }
 0x818   :  { %7200 = vrsqrt.f32 %v4178_v44 }
 0x81e   :  { %v7199_v54 = vpop.eup %7198 }
 0x81f   :  { %v4183_v39 = vrot.slane %v7199_v54, 1  ;;  %v4184_v63 = vrot.slane %v7199_v54, 2  ;;  %v4185_v51 = vrot.slane %v7199_v54, 3  ;;  %v4186_v17 = vrot.slane %v7199_v54, 4 }
 0x820   :  { %v4187_v61 = vrot.slane %v7199_v54, 5  ;;  %v4188_v2 = vrot.slane %v7199_v54, 6  ;;  %v4189_v24 = vrot.slane %v7199_v54, 7  ;;  %v4213_v56 = vmul.f32 %v7199_v54, %v8831_v38 }
 0x821   :  { %v4214_v7 = vmul.f32 %v4183_v39, %v8834_v26  ;;  %v4215_v13 = vmul.f32 %v4184_v63, %v8837_v20  ;;  %v4216_v34 = vmul.f32 %v4185_v51, %v8840_v6  ;;  %v4217_v0 = vmul.f32 %v4186_v17, %v8843_v25 }
 0x822   :  { %v4218_v21 = vmul.f32 %v4187_v61, %v8846_v45  ;;  %v4219_v27 = vmul.f32 %v4188_v2, %v8849_v58  ;;  %v4220_v59 = vmul.f32 %v4189_v24, %v8852_v36  ;;  %v4233_v57 = vmul.f32 %v8925_v40, %v4213_v56  ;;  %v7201_v49 = vpop.eup %7200 }
 0x823   :  { %v4234_v38 = vmul.f32 %v8925_v40, %v4214_v7  ;;  %v4235_v16 = vmul.f32 %v8925_v40, %v4215_v13  ;;  %v4236_v26 = vmul.f32 %v8925_v40, %v4216_v34  ;;  %v4237_v20 = vmul.f32 %v8925_v40, %v4217_v0 }
 0x824   :  { %v4238_v6 = vmul.f32 %v8925_v40, %v4218_v21  ;;  %v4239_v25 = vmul.f32 %v8925_v40, %v4219_v27  ;;  %v4240_v45 = vmul.f32 %v8925_v40, %v4220_v59  ;;  %v4253_v58 = vadd.f32 %v8928_v35, %v4233_v57 }
 0x825   :  { %v4254_v36 = vadd.f32 %v8928_v35, %v4234_v38  ;;  %v4255_v4 = vadd.f32 %v8928_v35, %v4235_v16  ;;  %v4256_v1 = vadd.f32 %v8928_v35, %v4236_v26  ;;  %v4257_v44 = vadd.f32 %v8928_v35, %v4237_v20 }
 0x826   :  { %v4258_v54 = vadd.f32 %v8928_v35, %v4238_v6  ;;  %v4259_v39 = vadd.f32 %v8928_v35, %v4239_v25  ;;  %v4260_v63 = vadd.f32 %v8928_v35, %v4240_v45  ;;  %v4190_v51 = vrot.slane %v7201_v49, 1 }
 0x827   :  { %v4293_v17 = vrot.slane %v4254_v36, 7  ;;  %v4295_v61 = vrot.slane %v4255_v4, 6  ;;  %v4297_v2 = vrot.slane %v4256_v1, 5  ;;  %v4299_v24 = vrot.slane %v4257_v44, 4 }
 0x828   :  { %v4301_v56 = vrot.slane %v4258_v54, 3  ;;  %v4303_v7 = vrot.slane %v4259_v39, 2  ;;  %v4305_v13 = vrot.slane %v4260_v63, 1  ;;  %v4191_v34 = vrot.slane %v7201_v49, 2 }
 0x829   :  { %v4294_v0 = vsel %vm3384_vm1, %v4293_v17, %v4253_v58  ;;  %v4192_v21 = vrot.slane %v7201_v49, 3  ;;  %v4193_v27 = vrot.slane %v7201_v49, 4  ;;  %v4194_v59 = vrot.slane %v7201_v49, 5 }
 0x82a   :  { %v4296_v57 = vsel %vm3386_vm2, %v4295_v61, %v4294_v0  ;;  %v4195_v38 = vrot.slane %v7201_v49, 6  ;;  %v4196_v16 = vrot.slane %v7201_v49, 7  ;;  %v4221_v26 = vmul.f32 %v7201_v49, %v8797_v8 }
 0x82b   :  { %v4298_v20 = vsel %vm3388_vm3, %v4297_v2, %v4296_v57  ;;  %v4222_v6 = vmul.f32 %v4190_v51, %v8800_v12  ;;  %v4223_v25 = vmul.f32 %v4191_v34, %v8803_v10  ;;  %v4224_v45 = vmul.f32 %v4192_v21, %v8806_v37 }
 0x82c   :  { %v4300_v36 = vsel %vm3390_vm4, %v4299_v24, %v4298_v20  ;;  %v4225_v58 = vmul.f32 %v4193_v27, %v8809_v5  ;;  %v4226_v4 = vmul.f32 %v4194_v59, %v8812_v46  ;;  %v4227_v1 = vmul.f32 %v4195_v38, %v8817_v14 }
 0x82d   :  { %v4302_v44 = vsel %vm3392_vm5, %v4301_v56, %v4300_v36  ;;  %v4228_v8 = vmul.f32 %v4196_v16, %v8820_v23  ;;  %v4241_v49 = vmul.f32 %v8925_v40, %v4221_v26  ;;  %v4242_v12 = vmul.f32 %v8925_v40, %v4222_v6 }
 0x82e   :  { %v4304_v10 = vsel %vm3394_vm6, %v4303_v7, %v4302_v44  ;;  %v4243_v37 = vmul.f32 %v8925_v40, %v4223_v25  ;;  %v4244_v54 = vmul.f32 %v8925_v40, %v4224_v45  ;;  %v4245_v5 = vmul.f32 %v8925_v40, %v4225_v58 }
 0x82f   :  { %v4306_v46 = vsel %vm3396_vm7, %v4305_v13, %v4304_v10  ;;  %v4246_v14 = vmul.f32 %v8925_v40, %v4226_v4  ;;  %v4247_v39 = vmul.f32 %v8925_v40, %v4227_v1  ;;  %v4248_v63 = vmul.f32 %v8925_v40, %v4228_v8 }
 0x830   :  { %v4321_v23 = vsel %vm90_vm0, %v4306_v46, 0  ;;  %v4262_v51 = vadd.f32 %v8928_v35, %v4242_v12  ;;  %v4263_v17 = vadd.f32 %v8928_v35, %v4243_v37  ;;  %v4264_v2 = vadd.f32 %v8928_v35, %v4244_v54  ;;  %v4859_v46 = vld [vmem:[%s9119_s4 + $0x20] sm:$0xff] }
 0x831   :  { %v4394_v61 = vand.u32 4294901760, %v4321_v23  ;;  %v4265_v24 = vadd.f32 %v8928_v35, %v4245_v5  ;;  %v4261_v56 = vadd.f32 %v8928_v35, %v4241_v49  ;;  %v4266_v7 = vadd.f32 %v8928_v35, %v4246_v14  ;;  %v4860_v14 = vld [vmem:[%s9119_s4 + $0x28] sm:$0xff] }
 0x832   :  { %v4307_v13 = vrot.slane %v4262_v51, 7  ;;  %v4309_v34 = vrot.slane %v4263_v17, 6  ;;  %v4267_v21 = vadd.f32 %v8928_v35, %v4247_v39  ;;  %v4268_v40 = vadd.f32 %v8928_v35, %v4248_v63 }
 0x833   :  { %v4395_v0 = vsub.f32 %v4321_v23, %v4394_v61  ;;  %v4311_v59 = vrot.slane %v4264_v2, 5  ;;  %v4313_v16 = vrot.slane %v4265_v24, 4  ;;  %v4315_v20 = vrot.slane %v4266_v7, 3  ;;  %v4862_v2 = vld [vmem:[%s9119_s4 + $0x38] sm:$0xff] }
 0x834   :  { %v4308_v27 = vsel %vm3384_vm1, %v4307_v13, %v4261_v56  ;;  %v4317_v45 = vrot.slane %v4267_v21, 2  ;;  %v4319_v58 = vrot.slane %v4268_v40, 1  ;;  %v4883_v39 = vand.u32 4294901760, %v4859_v46 }
 0x835   :  { %v4396_v57 = vand.u32 4294901760, %v4395_v0  ;;  %v4310_v38 = vsel %vm3386_vm2, %v4309_v34, %v4308_v27  ;;  %v4886_v23 = vand.u32 4294901760, %v4860_v14  ;;  %v4892_v56 = vand.u32 4294901760, %v4862_v2 }
 0x836   :  { %v4312_v26 = vsel %vm3388_vm3, %v4311_v59, %v4310_v38 }
 0x837   :  { %v4397_v6 = vsub.f32 %v4395_v0, %v4396_v57  ;;  %v4314_v25 = vsel %vm3390_vm4, %v4313_v16, %v4312_v26  ;;  %v9038_v63 = vpack.c.bf16 %v4886_v23, %v4883_v39 }
 0x838   :  { %v4316_v36 = vsel %vm3392_vm5, %v4315_v20, %v4314_v25  ;;  %v5000_v25 = vsub.f32 %v4860_v14, %v4886_v23 }
 0x839   :  { %v4398_v4 = vand.u32 4294901760, %v4397_v6  ;;  %v4318_v35 = vsel %vm3394_vm6, %v4317_v45, %v4316_v36  ;;  %v4993_v6 = vsub.f32 %v4859_v46, %v4883_v39 }
 0x83a   :  { %v4320_v1 = vsel %vm3396_vm7, %v4319_v58, %v4318_v35 }
 0x83b   :  { %6422 = vmatprep.mubr.f32.mxu1 %v4398_v4  ;;  %v4323_v44 = vsel %vm90_vm0, %v4320_v1, 0  ;;  %v4994_v58 = vand.u32 4294901760, %v4993_v6  ;;  %v5001_v4 = vand.u32 4294901760, %v5000_v25  ;;  %v6826_v39 = vpack.c.bf16 %v5000_v25, %v4993_v6 }
 0x83c   :  { %v4404_v8 = vand.u32 4294901760, %v4323_v44 }
 0x83d   :  { %v4995_v1 = vsub.f32 %v4993_v6, %v4994_v58 }
 0x83e   :  { %v4405_v49 = vsub.f32 %v4323_v44, %v4404_v8  ;;  %v5002_v44 = vsub.f32 %v5000_v25, %v5001_v4 }
 0x840   :  { %v4406_v12 = vand.u32 4294901760, %v4405_v49 }
 0x842   :  { %v4407_v10 = vsub.f32 %v4405_v49, %v4406_v12 }
 0x844   :  { %v4408_v37 = vand.u32 4294901760, %v4407_v10  ;;  %v4996_v10 = vand.u32 4294901760, %v4995_v1 }
 0x846   :  { %6423 = vmatmul.mubr.f32.vlgmr.msra.gmra.mrb[32].mxu1 %v4408_v37  ;;  %v5003_v37 = vand.u32 4294901760, %v5002_v44 }
 0x847   :  { %6749 = vmatpush3.bf16.msra.mxu1 %v8912_v48  ;;  %6433 = vmatprep.mubr.f32.mxu1 %v4394_v61  ;;  %v4855_v48 = vld [vmem:[%s9119_s4] sm:$0xff] }
 0x848   :  { %6751 = vmatprep.subr.bf16.mxu1 %v8915_v42 }
 0x84b   :  { %6753 = vmatpush3.bf16.msra.mxu1 %v8915_v42  ;;  %v4856_v42 = vld [vmem:[%s9119_s4 + $0x8] sm:$0xff] }
 0x84c   :  { %6755 = vmatprep.subr.bf16.mxu1 %v8917_v32 }
 0x84e   :  { %6434 = vmatmul.mubr.f32.vlgmr.msra.gmra.mrb[32].mxu1 %v4404_v8 }
 0x84f   :  { %6757 = vmatpush3.bf16.msra.mxu1 %v8917_v32  ;;  %6444 = vmatprep.mubr.f32.mxu1 %v4395_v0  ;;  %v4871_v32 = vand.u32 4294901760, %v4855_v48 }
 0x850   :  { %6759 = vmatprep.subr.bf16.mxu1 %v8919_v62 }
 0x851   :  { %v4965_v51 = vsub.f32 %v4855_v48, %v4871_v32 }
 0x853   :  { %6761 = vmatpush3.bf16.msra.mxu1 %v8919_v62  ;;  %v4874_v62 = vand.u32 4294901760, %v4856_v42  ;;  %v4966_v7 = vand.u32 4294901760, %v4965_v51 }
 0x854   :  { %6763 = vmatprep.subr.bf16.mxu1 %v8904_v55 }
 0x855   :  { %v4972_v17 = vsub.f32 %v4856_v42, %v4874_v62  ;;  %v4967_v0 = vsub.f32 %v4965_v51, %v4966_v7 }
 0x856   :  { %6445 = vmatmul.mubr.f32.vlgmr.msra.gmra.mrb[32].mxu1 %v4405_v49  ;;  %v5014_v49 = vsub.f32 %v4862_v2, %v4892_v56  ;;  %v5590_v2 = vld [vmem:[#allocation7 + $0x6] ss:$0 sm:$0xff] }
 0x857   :  { %6765 = vmatpush3.bf16.msra.mxu1 %v8904_v55  ;;  %6455 = vmatprep.mubr.f32.mxu1 %v4396_v57  ;;  %v4973_v13 = vand.u32 4294901760, %v4972_v17  ;;  %v4968_v59 = vand.u32 4294901760, %v4967_v0  ;;  %v6818_v46 = vpack.c.bf16 %v4972_v17, %v4965_v51 }
 0x858   :  { %6767 = vmatprep.subr.bf16.mxu1 %v8906_v22  ;;  %v5015_v42 = vand.u32 4294901760, %v5014_v49 }
 0x859   :  { %v4974_v21 = vsub.f32 %v4972_v17, %v4973_v13  ;;  %v6850_v0 = vpack.c.bf16 %v4973_v13, %v4966_v7 }
 0x85b   :  { %6769 = vmatpush3.bf16.msra.mxu1 %v8906_v22  ;;  %v4975_v57 = vand.u32 4294901760, %v4974_v21 }
 0x85c   :  { %6771 = vmatprep.subr.bf16.mxu1 %v8921_v50 }
 0x85d   :  { %v6802_v26 = vpack.c.bf16 %v4975_v57, %v4968_v59  ;;  %v6858_v59 = vpack.c.bf16 %v5001_v4, %v4994_v58 }
 0x85e   :  { %6456 = vmatmul.mubr.f32.vlgmr.msra.gmra.mrb[32].mxu1 %v4406_v12 }
 0x85f   :  { %6773 = vmatpush3.bf16.msra.mxu1 %v8921_v50  ;;  %6466 = vmatprep.mubr.f32.mxu1 %v4394_v61  ;;  %v9018_v50 = vpack.c.bf16 %v4874_v62, %v4871_v32  ;;  %v6810_v32 = vpack.c.bf16 %v5003_v37, %v4996_v10 }
 0x860   :  { %6775 = vmatprep.subr.bf16.mxu1 %v8923_v3 }
 0x861   :  { %6787 = vmatprep.subr.bf16.mxu0 %v9018_v50 }
 0x862   :  { %6789 = vmatpush3.bf16.msra.mxu0 %v9018_v50 }
 0x863   :  { %6777 = vmatpush3.bf16.msra.mxu1 %v8923_v3 }
 0x864   :  { %6779 = vmatprep.subr.bf16.mxu1 %v8904_v55 }
 0x866   :  { %6467 = vmatmul.mubr.f32.vlgmr.msra.gmra.mrb[32].mxu1 %v4404_v8 }
 0x867   :  { %6781 = vmatpush3.bf16.msra.mxu1 %v8904_v55  ;;  %6477 = vmatprep.mubr.f32.mxu1 %v4394_v61  ;;  %v4857_v55 = vld [vmem:[%s9119_s4 + $0x10] sm:$0xff] }
 0x868   :  { %6783 = vmatprep.subr.bf16.mxu1 %v8906_v22  ;;  %v4877_v3 = vand.u32 4294901760, %v4857_v55  ;;  %v4861_v61 = vld [vmem:[%s9119_s4 + $0x30] sm:$0xff] }
 0x869   :  { %v4889_v24 = vand.u32 4294901760, %v4861_v61 }
 0x86a   :  { %v4979_v40 = vsub.f32 %v4857_v55, %v4877_v3  ;;  %v5016_v55 = vsub.f32 %v5014_v49, %v5015_v42 }
 0x86b   :  { %6785 = vmatpush3.bf16.msra.mxu1 %v8906_v22  ;;  %v4858_v22 = vld [vmem:[%s9119_s4 + $0x18] sm:$0xff]  ;;  %v9048_v34 = vpack.c.bf16 %v4892_v56, %v4889_v24  ;;  %s7319_s4 = smov [#allocation8]  }
 0x86c   :  { %v4880_v54 = vand.u32 4294901760, %v4858_v22  ;;  %v4980_v38 = vand.u32 4294901760, %v4979_v40  ;;  %s5571_s29 = sshll.u32 %s7319_s4, 4  ;;  %s5572_s29 = int_to_ptr.vmem [resolvable:$true] %s5571_s29 }
 0x86d   :  { %s7284_s30 = scalar_lea.vmem %s5572_s29, 256  ;;  %p7289_p11 = scmp.lt.s32.totalorder %s5572_s29, %s5572_s29 }
 0x86e   :  { %6478 = vmatmul.mubr.f32.vlgmr.msra.gmra.mrb[32].mxu1 %v4404_v8  ;;  %v9028_v5 = vpack.c.bf16 %v4880_v54, %v4877_v3  ;;  %v4986_v27 = vsub.f32 %v4858_v22, %v4880_v54  ;;  %v4981_v20 = vsub.f32 %v4979_v40, %v4980_v38  ;;  %v5007_v8 = vsub.f32 %v4861_v61, %v4889_v24  ;;  %p7285_p10 = scmp.ne.s32.totalorder %s5572_s29, %s7284_s30  ;;  %p7290_p12 = scmp.lt.s32.totalorder %s7284_s30, %s7284_s30 }
 0x86f   :  { %v5017_v3 = vand.u32 4294901760, %v5016_v55 }
 0x870   :  { %6791 = vmatprep.subr.bf16.mxu0 %v9028_v5  ;;  %v4987_v16 = vand.u32 4294901760, %v4986_v27  ;;  %v4982_v36 = vand.u32 4294901760, %v4981_v20  ;;  %v5008_v48 = vand.u32 4294901760, %v5007_v8  ;;  %v6822_v14 = vpack.c.bf16 %v4986_v27, %v4979_v40  ;;  %p7291_p13 = por %p7290_p12, %p7289_p11 }
 0x871   :  { %6793 = vmatpush3.bf16.msra.mxu0 %v9028_v5  ;;  %v6830_v23 = vpack.c.bf16 %v5014_v49, %v5007_v8 }
 0x872   :  { %6795 = vmatprep.subr.bf16.mxu0 %v9038_v63  ;;  %v4988_v45 = vsub.f32 %v4986_v27, %v4987_v16  ;;  %v5009_v62 = vsub.f32 %v5007_v8, %v5008_v48  ;;  %v6854_v21 = vpack.c.bf16 %v4987_v16, %v4980_v38  ;;  %v6862_v61 = vpack.c.bf16 %v5015_v42, %v5008_v48  ;;  %p7292_p0 = pnand %p7291_p13, %p7285_p10 }
 0x874   :  { %v4989_v35 = vand.u32 4294901760, %v4988_v45  ;;  %v5010_v22 = vand.u32 4294901760, %v5009_v62 }
 0x875   :  { %6797 = vmatpush3.bf16.msra.mxu0 %v9038_v63 }
 0x876   :  { %6799 = vmatprep.subr.bf16.mxu0 %v9048_v34  ;;  %v6806_v12 = vpack.c.bf16 %v4989_v35, %v4982_v36  ;;  %v6814_v54 = vpack.c.bf16 %v5017_v3, %v5010_v22 }
 0x879   :  { %6801 = vmatpush3.bf16.msra.mxu0 %v9048_v34 }
 0x87a   :  { %6803 = vmatprep.subr.bf16.mxu0 %v6802_v26 }
 0x941   :  { %v6479_v24 = vpop.f32.mrb[32].mxu1 }
 0x942   :  { %v6918_v56 = vadd.f32 %v6479_v24, %v5590_v2  ;;  %v4843_v57 = vpop.f32.mrb[33].mxu1 }
 0x943   :  { %v6919_v20 = vadd.f32 %v5590_v2, %v4843_v57 }
 0x944   :  { %v4854_v45 = vmax.f32 %v6918_v56, 0.0 }
 0x945   :  { %v4853_v36 = vmax.f32 %v6919_v20, 0.0 }
 0x946   :  { %v4868_v35 = vsel %vm4863_vm8, %v4854_v45, 0 }
 0x947   :  { %v4953_v1 = vand.u32 4294901760, %v4868_v35  ;;  %v4865_v44 = vsel %vm4863_vm8, %v4853_v36, 0 }
 0x948   :  { %v4943_v10 = vand.u32 4294901760, %v4865_v44 }
 0x949   :  { %v4954_v51 = vsub.f32 %v4868_v35, %v4953_v1 }
 0x94a   :  { %v4944_v17 = vsub.f32 %v4865_v44, %v4943_v10 }
 0x94b   :  { %v4955_v40 = vand.u32 4294901760, %v4954_v51 }
 0x94c   :  { %v4945_v27 = vand.u32 4294901760, %v4944_v17 }
 0x94d   :  { %v4956_v7 = vsub.f32 %v4954_v51, %v4955_v40 }
 0x94e   :  { %v4946_v13 = vsub.f32 %v4944_v17, %v4945_v27 }
 0x94f   :  { %v4957_v16 = vand.u32 4294901760, %v4956_v7 }
 0x950   :  { %v4947_v38 = vand.u32 4294901760, %v4946_v13 }
 0x952   :  { %6496 = vmatprep.mubr.f32.mxu0 %v4947_v38 }
 0x953   :  { %6497 = vmatmul.mubr.f32.vlgmr.msra.gmra.mrb[18].mxu0 %v4957_v16 }
 0x954   :  { %6805 = vmatpush3.bf16.msra.mxu0 %v6802_v26  ;;  %6515 = vmatprep.mubr.f32.mxu0 %v4943_v10 }
 0x955   :  { %6807 = vmatprep.subr.bf16.mxu0 %v6806_v12 }
 0x958   :  { %6809 = vmatpush3.bf16.msra.mxu0 %v6806_v12 }
 0x959   :  { %6811 = vmatprep.subr.bf16.mxu0 %v6810_v32 }
 0x95c   :  { %6813 = vmatpush3.bf16.msra.mxu0 %v6810_v32  ;;  %v5591_v32 = vld [vmem:[#allocation7 + $0x7] ss:$0 sm:$0xff] }
 0x95d   :  { %6815 = vmatprep.subr.bf16.mxu0 %v6814_v54 }
 0x960   :  { %6817 = vmatpush3.bf16.msra.mxu0 %v6814_v54 }
 0x961   :  { %6819 = vmatprep.subr.bf16.mxu0 %v6818_v46 }
 0x963   :  { %6516 = vmatmul.mubr.f32.vlgmr.msra.gmra.mrb[18].mxu0 %v4953_v1 }
 0x964   :  { %6821 = vmatpush3.bf16.msra.mxu0 %v6818_v46  ;;  %6534 = vmatprep.mubr.f32.mxu0 %v4944_v17 }
 0x965   :  { %6823 = vmatprep.subr.bf16.mxu0 %v6822_v14 }
 0x968   :  { %6825 = vmatpush3.bf16.msra.mxu0 %v6822_v14 }
 0x969   :  { %6827 = vmatprep.subr.bf16.mxu0 %v6826_v39 }
 0x96c   :  { %6829 = vmatpush3.bf16.msra.mxu0 %v6826_v39 }
 0x96d   :  { %6831 = vmatprep.subr.bf16.mxu0 %v6830_v23 }
 0x970   :  { %6833 = vmatpush3.bf16.msra.mxu0 %v6830_v23 }
 0x971   :  { %6835 = vmatprep.subr.bf16.mxu0 %v9018_v50 }
 0x973   :  { %6535 = vmatmul.mubr.f32.vlgmr.msra.gmra.mrb[18].mxu0 %v4954_v51 }
 0x974   :  { %6837 = vmatpush3.bf16.msra.mxu0 %v9018_v50  ;;  %6553 = vmatprep.mubr.f32.mxu0 %v4945_v27 }
 0x975   :  { %6839 = vmatprep.subr.bf16.mxu0 %v9028_v5 }
 0x978   :  { %6841 = vmatpush3.bf16.msra.mxu0 %v9028_v5 }
 0x979   :  { %6843 = vmatprep.subr.bf16.mxu0 %v9038_v63 }
 0x97c   :  { %6845 = vmatpush3.bf16.msra.mxu0 %v9038_v63 }
 0x97d   :  { %6847 = vmatprep.subr.bf16.mxu0 %v9048_v34 }
 0x980   :  { %6849 = vmatpush3.bf16.msra.mxu0 %v9048_v34 }
 0x981   :  { %6851 = vmatprep.subr.bf16.mxu0 %v6850_v0 }
 0x983   :  { %6554 = vmatmul.mubr.f32.vlgmr.msra.gmra.mrb[18].mxu0 %v4955_v40 }
 0x984   :  { %6853 = vmatpush3.bf16.msra.mxu0 %v6850_v0  ;;  %6572 = vmatprep.mubr.f32.mxu0 %v4943_v10 }
 0x985   :  { %6855 = vmatprep.subr.bf16.mxu0 %v6854_v21 }
 0x988   :  { %6857 = vmatpush3.bf16.msra.mxu0 %v6854_v21 }
 0x989   :  { %6859 = vmatprep.subr.bf16.mxu0 %v6858_v59 }
 0x98c   :  { %6861 = vmatpush3.bf16.msra.mxu0 %v6858_v59 }
 0x98d   :  { %6863 = vmatprep.subr.bf16.mxu0 %v6862_v61 }
 0x990   :  { %6865 = vmatpush3.bf16.msra.mxu0 %v6862_v61 }
 0x991   :  { %6867 = vmatprep.subr.bf16.mxu0 %v9018_v50 }
 0x993   :  { %6573 = vmatmul.mubr.f32.vlgmr.msra.gmra.mrb[18].mxu0 %v4953_v1 }
 0x994   :  { %6869 = vmatpush3.bf16.msra.mxu0 %v9018_v50  ;;  %6591 = vmatprep.mubr.f32.mxu0 %v4943_v10 }
 0x995   :  { %6871 = vmatprep.subr.bf16.mxu0 %v9028_v5 }
 0x998   :  { %6873 = vmatpush3.bf16.msra.mxu0 %v9028_v5 }
 0x999   :  { %6875 = vmatprep.subr.bf16.mxu0 %v9038_v63 }
 0x99c   :  { %6877 = vmatpush3.bf16.msra.mxu0 %v9038_v63 }
 0x99d   :  { %6879 = vmatprep.subr.bf16.mxu0 %v9048_v34 }
 0x9a0   :  { %6881 = vmatpush3.bf16.msra.mxu0 %v9048_v34 }
 0x9a3   :  { %6592 = vmatmul.mubr.f32.vlgmr.msra.gmra.mrb[18].mxu0 %v4953_v1 }
 0xa76   :  { %v6593_v26 = vpop.f32.mrb[18].mxu0 }
 0xa77   :  { %v5459_v6 = vrot.slane %v6593_v26, 1  ;;  %v5460_v25 = vrot.slane %v6593_v26, 2  ;;  %v5440_v58 = vpop.f32.mrb[19].mxu0  ;;  %v5461_v49 = vrot.slane %v6593_v26, 3  ;;  %v5462_v12 = vrot.slane %v6593_v26, 4 }
 0xa78   :  { %v5452_v4 = vrot.slane %v5440_v58, 1  ;;  %v5453_v50 = vrot.slane %v5440_v58, 2  ;;  %v5454_v8 = vrot.slane %v5440_v58, 3  ;;  %v5455_v37 = vrot.slane %v5440_v58, 4 }
 0xa79   :  { %v5490_v5 = vadd.f32 %v6593_v26, %v8726_v11  ;;  %v5456_v48 = vrot.slane %v5440_v58, 5  ;;  %v5457_v42 = vrot.slane %v5440_v58, 6  ;;  %v5491_v34 = vadd.f32 %v5459_v6, %v8713_v52 }
 0xa7a   :  { %v5483_v63 = vadd.f32 %v5452_v4, %v8734_v30  ;;  %v5492_v62 = vadd.f32 %v5460_v25, %v8717_v15  ;;  %v5484_v55 = vadd.f32 %v5453_v50, %v8755_v29  ;;  %v5485_v22 = vadd.f32 %v5454_v8, %v8760_v41 }
 0xa7b   :  { %v5486_v3 = vadd.f32 %v5455_v37, %v8763_v28  ;;  %v5458_v46 = vrot.slane %v5440_v58, 7  ;;  %v5463_v14 = vrot.slane %v6593_v26, 5  ;;  %v5482_v11 = vadd.f32 %v5440_v58, %v8767_v19 }
 0xa7c   :  { %v5503_v54 = vadd.f32 %v5591_v32, %v5483_v63  ;;  %v5504_v39 = vadd.f32 %v5591_v32, %v5484_v55  ;;  %v5464_v23 = vrot.slane %v6593_v26, 6  ;;  %v5465_v0 = vrot.slane %v6593_v26, 7 }
 0xa7d   :  { %v5505_v30 = vadd.f32 %v5591_v32, %v5485_v22  ;;  %v5487_v21 = vadd.f32 %v5456_v48, %v8770_v47  ;;  %v5488_v52 = vadd.f32 %v5457_v42, %v8775_v53  ;;  %v5489_v15 = vadd.f32 %v5458_v46, %v8780_v31 }
 0xa7e   :  { %v5534_v29 = vrot.slane %v5503_v54, 7  ;;  %v5493_v41 = vadd.f32 %v5461_v49, %v8720_v9  ;;  %v5494_v28 = vadd.f32 %v5462_v12, %v8723_v60  ;;  %v5495_v59 = vadd.f32 %v5463_v14, %v8729_v33 }
 0xa7f   :  { %v5511_v61 = vadd.f32 %v5591_v32, %v5491_v34  ;;  %v5536_v2 = vrot.slane %v5504_v39, 6  ;;  %v5496_v19 = vadd.f32 %v5464_v23, %v8737_v18  ;;  %v5506_v24 = vadd.f32 %v5591_v32, %v5486_v3 }
 0xa80   :  { %v5502_v56 = vadd.f32 %v5591_v32, %v5482_v11  ;;  %v5497_v57 = vadd.f32 %v5465_v0, %v8740_v43  ;;  %v5507_v47 = vadd.f32 %v5591_v32, %v5487_v21  ;;  %v5512_v20 = vadd.f32 %v5591_v32, %v5492_v62 }
 0xa81   :  { %v5510_v53 = vadd.f32 %v5591_v32, %v5490_v5  ;;  %v5508_v45 = vadd.f32 %v5591_v32, %v5488_v52  ;;  %v5509_v31 = vadd.f32 %v5591_v32, %v5489_v15  ;;  %v5513_v36 = vadd.f32 %v5591_v32, %v5493_v41 }
 0xa82   :  { %v5514_v35 = vadd.f32 %v5591_v32, %v5494_v28  ;;  %v5515_v9 = vadd.f32 %v5591_v32, %v5495_v59  ;;  %v5535_v60 = vsel %vm3384_vm1, %v5534_v29, %v5502_v56  ;;  %v5538_v1 = vrot.slane %v5505_v30, 5 }
 0xa83   :  { %v5516_v33 = vadd.f32 %v5591_v32, %v5496_v19  ;;  %v5537_v44 = vsel %vm3386_vm2, %v5536_v2, %v5535_v60  ;;  %v5540_v10 = vrot.slane %v5506_v24, 4  ;;  %v5548_v18 = vrot.slane %v5511_v61, 7 }
 0xa84   :  { %v5517_v51 = vadd.f32 %v5591_v32, %v5497_v57  ;;  %v5539_v17 = vsel %vm3388_vm3, %v5538_v1, %v5537_v44  ;;  %v5542_v43 = vrot.slane %v5507_v47, 3  ;;  %v5550_v40 = vrot.slane %v5512_v20, 6 }
 0xa85   :  { %v5541_v27 = vsel %vm3390_vm4, %v5540_v10, %v5539_v17  ;;  %v5544_v7 = vrot.slane %v5508_v45, 2  ;;  %v5549_v13 = vsel %vm3384_vm1, %v5548_v18, %v5510_v53  ;;  %v5552_v38 = vrot.slane %v5513_v36, 5 }
 0xa86   :  { %v5543_v16 = vsel %vm3392_vm5, %v5542_v43, %v5541_v27  ;;  %v5546_v26 = vrot.slane %v5509_v31, 1  ;;  %v5551_v6 = vsel %vm3386_vm2, %v5550_v40, %v5549_v13  ;;  %v5554_v25 = vrot.slane %v5514_v35, 4 }
 0xa87   :  { %v5545_v58 = vsel %vm3394_vm6, %v5544_v7, %v5543_v16  ;;  %v5553_v4 = vsel %vm3388_vm3, %v5552_v38, %v5551_v6  ;;  %v5556_v50 = vrot.slane %v5515_v9, 3  ;;  %v5558_v12 = vrot.slane %v5516_v33, 2 }
 0xa88   :  { %v5547_v8 = vsel %vm3396_vm7, %v5546_v26, %v5545_v58  ;;  %v5555_v49 = vsel %vm3390_vm4, %v5554_v25, %v5553_v4  ;;  %v5560_v5 = vrot.slane %v5517_v51, 1 }
 0xa89   :  { %v5557_v37 = vsel %vm3392_vm5, %v5556_v50, %v5555_v49  ;;  %5564 = vst.msk [vmem:[#allocation8] sm:$0xff] %vm90_vm0, %v5547_v8 }
 0xa8a   :  { %v5559_v48 = vsel %vm3394_vm6, %v5558_v12, %v5557_v37 }
 0xa8b   :  { %v5561_v42 = vsel %vm3396_vm7, %v5560_v5, %v5559_v48 }
 0xa8c   :  { %5565 = vst.msk [vmem:[#allocation8 + $0x8] sm:$0xff] %vm90_vm0, %v5561_v42 }
 0xa8d   :  { %7295 = shalt.err (!%p7292_p0)
}
 0xa8e   :  { %s7296_s9 = scalar_lea.hbm %s9122_s7, 256 }
 0xa8f   :  { %p7297_p1 = scmp.ne.s32.totalorder %s9122_s7, %s7296_s9  ;;  %p7300_p2 = scmp.lt.u32.totalorder %s7296_s9, %s9122_s7 }
 0xa91   :  { %p7302_p3 = pnand %p7300_p2, %p7297_p1 }
 0xa93   :  { %7305 = shalt.err (!%p7302_p3)
}
 0xa94   :  { %5577 = dma.vmem_to_hbm [thread:$0]  %s5572_s29, 256, %s9122_s7, [#allocation4], %s7314_s13, %s7314_s13, %s7315_s14  }
 0xa95   :  { %7310 = dma.done.wait [#allocation4], 256  }
 0xa96   :  { %7311 = vsyncadd [#allocation4], 4294967040 }
 0xa97   :  { %5581 = vsyncpa [#allocation3], 1 }
 0xa98   :  { %5582 = vsyncpa [#allocation6], 1 }
 0xa99   :  { %5583 = vsyncpa [#allocation4], 1 }

</bundles_post_ra>
